<compile_context>
chip_gen: v5e
topology: v5e:2x2
jax: 0.10.0
libtpu: 0.0.40
codegen_flags: <defaults>
</compile_context>

<pallas_src>
import functools

import jax
import jax.numpy as jnp
from jax import lax
from jax.experimental import pallas as pl
from jax.experimental.pallas import tpu as pltpu

LEAKY_SLOPE = 0.01          # nn.LeakyReLU() default
BN_EPS = 1e-5

# (kernel, stride, pad, Cin, Cout, has_bn) for the x_to_vector conv stack
_CONV_CFG = (
    (3, 3, 1, 1, 64, False),
    (2, 2, 1, 64, 128, True),
    (2, 2, 1, 128, 256, True),
    (2, 2, 1, 256, 512, True),
)


def _round_up(x, m):
    return (x + m - 1) // m * m


# ---------------------------------------------------------------------------
# Pallas kernels
# ---------------------------------------------------------------------------
def _linear_leaky_kernel(x_ref, w_ref, b_ref, o_ref):
    """Fused (TM, K) @ (K, N) + bias -> LeakyReLU. bf16 in, f32 accum, bf16 out."""
    h = jnp.dot(x_ref[...], w_ref[...], preferred_element_type=jnp.float32)
    h = h + b_ref[...]
    h = jnp.where(h > 0, h, LEAKY_SLOPE * h)
    o_ref[...] = h.astype(o_ref.dtype)


def _fc_head_kernel(h_ref, w_ref, b_ref, ybias_ref, o_ref):
    """Final Linear(D, 1) as a lane reduction (avoids an N=1 MXU matmul)."""
    h = h_ref[...].astype(jnp.float32)          # (B, D)
    w = w_ref[...].astype(jnp.float32)          # (1, D)
    o_ref[...] = (jnp.sum(h * w, axis=-1, keepdims=True)
                  + b_ref[...] + ybias_ref[...])


# ---------------------------------------------------------------------------
# pallas_call wrappers
# ---------------------------------------------------------------------------
def _matmul_leaky(rows, w, b):
    """rows: (M, K) bf16, w: (K, N) bf16, b: (1, N) f32  ->  (M, N) bf16."""
    M, K = rows.shape
    N = w.shape[1]
    tm = _round_up(M, 8) if M <= 256 else 256
    m_pad = _round_up(M, tm)
    if m_pad != M:
        rows = jnp.pad(rows, ((0, m_pad - M), (0, 0)))
    grid = (m_pad // tm,)
    cost = pl.CostEstimate(
        flops=2 * m_pad * K * N,
        transcendentals=0,
        bytes_accessed=(m_pad * K + K * N + m_pad * N) * 2 + N * 4)
    out = pl.pallas_call(
        _linear_leaky_kernel,
        out_shape=jax.ShapeDtypeStruct((m_pad, N), jnp.bfloat16),
        grid_spec=pltpu.PrefetchScalarGridSpec(
            num_scalar_prefetch=0,
            grid=grid,
            in_specs=[
                pl.BlockSpec((tm, K), lambda i: (i, 0)),
                pl.BlockSpec((K, N), lambda i: (0, 0)),   # weight VMEM-resident
                pl.BlockSpec((1, N), lambda i: (0, 0)),   # bias  VMEM-resident
            ],
            out_specs=pl.BlockSpec((tm, N), lambda i: (i, 0))),
        compiler_params=pltpu.CompilerParams(
            dimension_semantics=("parallel",)),
        cost_estimate=cost,
    )(rows, w, b)
    return out[:M] if m_pad != M else out


def _fc_head(h_flat, wx, b_fc, y_bias):
    """h_flat: (B, D) bf16, wx: (1, D) bf16, b_fc/y_bias: f32 -> (B, 1) f32."""
    B, D = h_flat.shape
    vmem = pl.BlockSpec(memory_space=pltpu.MemorySpace.VMEM)
    cost = pl.CostEstimate(flops=2 * B * D, transcendentals=0,
                           bytes_accessed=(B * D + D) * 2 + B * 8)
    return pl.pallas_call(
        _fc_head_kernel,
        out_shape=jax.ShapeDtypeStruct((B, 1), jnp.float32),
        in_specs=[vmem] * 4,
        out_specs=vmem,
        cost_estimate=cost,
    )(h_flat, wx, b_fc, y_bias)


# ---------------------------------------------------------------------------
# Parameters (PyTorch-layout init) and kernel-ready preparation
# ---------------------------------------------------------------------------
def init_params(key, condition_classes_cnt=10):
    """PyTorch-style U(-1/sqrt(fan_in), 1/sqrt(fan_in)) init, torch layouts."""
    params = {"condition_classes_cnt": condition_classes_cnt}
    keys = iter(jax.random.split(key, 32))
    for li, (k, s, p, cin, cout, has_bn) in enumerate(_CONV_CFG, start=1):
        bound = 1.0 / (cin * k * k) ** 0.5
        params[f"conv{li}_w"] = jax.random.uniform(
            next(keys), (cout, cin, k, k), jnp.float32, -bound, bound)
        params[f"conv{li}_b"] = jax.random.uniform(
            next(keys), (cout,), jnp.float32, -bound, bound)
        if has_bn:
            # Non-default BN params / running stats so BN folding is exercised.
            params[f"bn{li}_gamma"] = 1.0 + 0.1 * jax.random.normal(next(keys), (cout,))
            params[f"bn{li}_beta"] = 0.1 * jax.random.normal(next(keys), (cout,))
            params[f"bn{li}_mean"] = 0.1 * jax.random.normal(next(keys), (cout,))
            params[f"bn{li}_var"] = 1.0 + 0.5 * jax.random.uniform(next(keys), (cout,))
    y_out = 10 if condition_classes_cnt != 0 else 0
    fc_in = 3 * 3 * 512 + y_out
    bound = 1.0 / fc_in ** 0.5
    params["fc_w"] = jax.random.uniform(next(keys), (1, fc_in), jnp.float32, -bound, bound)
    params["fc_b"] = jax.random.uniform(next(keys), (1,), jnp.float32, -bound, bound)
    return params


def prepare_params(params):
    """Fold BN, reshape conv weights to matmul form, cast weights to bf16 ONCE."""
    prep = {"layers": []}
    for li, (k, s, p, cin, cout, has_bn) in enumerate(_CONV_CFG, start=1):
        w = params[f"conv{li}_w"]                               # (Cout, Cin, k, k)
        b = params[f"conv{li}_b"]
        # patch layout is (kh, kw, cin) -> W_mat[(kh*k+kw)*cin + ci, co]
        w_mat = jnp.transpose(w, (2, 3, 1, 0)).reshape(k * k * cin, cout)
        if has_bn:
            scale = params[f"bn{li}_gamma"] / jnp.sqrt(params[f"bn{li}_var"] + BN_EPS)
            b_eff = (b - params[f"bn{li}_mean"]) * scale + params[f"bn{li}_beta"]
            w_mat = w_mat * scale[None, :]
        else:
            b_eff = b
        # Pad the contraction dim to a multiple of 16 (bf16 sublane packing).
        kk = w_mat.shape[0]
        kk_pad = _round_up(kk, 16)
        if kk_pad != kk:
            w_mat = jnp.pad(w_mat, ((0, kk_pad - kk), (0, 0)))
        prep["layers"].append(dict(
            w=w_mat.astype(jnp.bfloat16),
            b=b_eff.reshape(1, cout).astype(jnp.float32)))
    # Final fc: split into x-part (re-ordered to the NHWC flatten order produced
    # by the kernels) and the one-hot class part (a per-class scalar).
    fc_w = params["fc_w"]
    wx = jnp.transpose(fc_w[:, :4608].reshape(1, 512, 3, 3), (0, 2, 3, 1)).reshape(1, 4608)
    prep["fc_wx"] = wx.astype(jnp.bfloat16)
    prep["fc_b"] = params["fc_b"].reshape(1, 1).astype(jnp.float32)
    if params["condition_classes_cnt"] != 0:
        prep["fc_wy"] = fc_w[:, 4608:].T.astype(jnp.float32)    # (n_classes, 1)
    return prep


# ---------------------------------------------------------------------------
# Forward pass
# ---------------------------------------------------------------------------
def _space_to_depth(x_nhwc, k, pad):
    """Zero-pad and extract non-overlapping kxk patches (stride == k)."""
    B, S, _, C = x_nhwc.shape
    xp = jnp.pad(x_nhwc, ((0, 0), (pad, pad), (pad, pad), (0, 0)))
    T = (S + 2 * pad) // k
    xp = xp.reshape(B, T, k, T, k, C)
    xp = jnp.transpose(xp, (0, 1, 3, 2, 4, 5))
    return xp.reshape(B * T * T, k * k * C), T


def mnist_discriminator_fwd(x, y, prep):
    """x: (B, 1, 28, 28) float; y: (B,) int class ids or None -> (B, 1) f32."""
    B = x.shape[0]
    h = jnp.transpose(x.reshape(B, 1, 28, 28), (0, 2, 3, 1)).astype(jnp.bfloat16)  # NHWC
    for (k, s, p, cin, cout, _), layer in zip(_CONV_CFG, prep["layers"]):
        rows, T = _space_to_depth(h, k, p)
        k_in, k_pad = k * k * cin, layer["w"].shape[0]
        if k_pad != k_in:
            rows = jnp.pad(rows, ((0, 0), (0, k_pad - k_in)))
        out_rows = _matmul_leaky(rows, layer["w"], layer["b"])
        h = out_rows.reshape(B, T, T, cout)
    h_flat = h.reshape(B, 3 * 3 * 512)                     # NHWC flatten order
    if y is not None:
        y_bias = prep["fc_wy"][y.astype(jnp.int32)]        # (B, 1) class scalar
    else:
        y_bias = jnp.zeros((B, 1), jnp.float32)
    return _fc_head(h_flat, prep["fc_wx"], prep["fc_b"], y_bias)


# ---------------------------------------------------------------------------
# Pure-JAX reference (torch-faithful: NCHW convs, eval BatchNorm, concat + fc)
# ---------------------------------------------------------------------------
def _reference(x, y, params):
    h = x.reshape(x.shape[0], 1, 28, 28).astype(jnp.float32)
    for li, (k, s, p, cin, cout, has_bn) in enumerate(_CONV_CFG, start=1):
        h = lax.conv_general_dilated(
            h, params[f"conv{li}_w"], window_strides=(s, s),
            padding=((p, p), (p, p)),
            dimension_numbers=("NCHW", "OIHW", "NCHW"))
        h = h + params[f"conv{li}_b"][None, :, None, None]
        if has_bn:
            scale = params[f"bn{li}_gamma"] / jnp.sqrt(params[f"bn{li}_var"] + BN_EPS)
            h = ((h - params[f"bn{li}_mean"][None, :, None, None])
                 * scale[None, :, None, None]
                 + params[f"bn{li}_beta"][None, :, None, None])
        h = jnp.where(h > 0, h, LEAKY_SLOPE * h)
    x_vec = h.reshape(h.shape[0], -1)                      # torch Flatten: (C,H,W)
    if y is not None:
        onehot = jax.nn.one_hot(y, params["condition_classes_cnt"], dtype=jnp.float32)
        x_vec = jnp.concatenate([x_vec, onehot], axis=1)
    return x_vec @ params["fc_w"].T + params["fc_b"]


if __name__ == "__main__":
    key = jax.random.PRNGKey(0)
    k_param, k_x, k_y = jax.random.split(key, 3)

    params = init_params(k_param, condition_classes_cnt=10)
    prep = prepare_params(params)

    B = 4
    x = jax.random.normal(k_x, (B, 1, 28, 28), jnp.float32)   # MNIST-shaped NCHW input
    y = jax.random.randint(k_y, (B,), 0, 10, jnp.int32)

    fwd = jax.jit(mnist_discriminator_fwd)
    out = jax.block_until_ready(fwd(x, y, prep))

    ref = jax.block_until_ready(_reference(x, y, params))
    assert out.shape == (B, 1)
    # bf16 weight/activation streaming vs f32 reference -> relaxed tolerance.
    assert jnp.allclose(out, ref, atol=3e-2, rtol=3e-2), (out, ref)

    print("KERNEL_OK")
</pallas_src>

<mosaic_0001>
module attributes {stable_mosaic.version = 11 : i64} {
  func.func @_linear_leaky_kernel(%arg0: i32, %arg1: memref<256x16xbf16, #tpu.memory_space<vmem>>, %arg2: memref<16x64xbf16, #tpu.memory_space<vmem>>, %arg3: memref<1x64xf32, #tpu.memory_space<vmem>>, %arg4: memref<256x64xbf16, #tpu.memory_space<vmem>>) attributes {dimension_semantics = [#tpu.dimension_semantics<parallel>], iteration_bounds = array<i64: 2>, scalar_prefetch = 0 : i64, scratch_operands = 0 : i64, tpu.core_type = #tpu.core_type<tc>, window_params = [{transform_indices = @transform_0, window_bounds = array<i64: 256, 16>}, {pipeline_mode = #tpu.pipeline_mode<synchronous>, transform_indices = @transform_1, window_bounds = array<i64: 16, 64>}, {pipeline_mode = #tpu.pipeline_mode<synchronous>, transform_indices = @transform_2, window_bounds = array<i64: 1, 64>}, {transform_indices = @transform_3, window_bounds = array<i64: 256, 64>}]} {
    %c0 = arith.constant 0 : index
    %c0_0 = arith.constant 0 : index
    %0 = vector.load %arg1[%c0, %c0_0] : memref<256x16xbf16, #tpu.memory_space<vmem>>, vector<256x16xbf16>
    %c0_1 = arith.constant 0 : index
    %c0_2 = arith.constant 0 : index
    %1 = vector.load %arg2[%c0_1, %c0_2] : memref<16x64xbf16, #tpu.memory_space<vmem>>, vector<16x64xbf16>
    %cst = arith.constant dense<0.000000e+00> : vector<256x64xf32>
    %2 = tpu.matmul %0, %1, %cst {dimension_numbers = #tpu.dot_dimension_numbers<[1], [0], [0], [1], [0, 0, 1, 1], [], []>} : vector<256x16xbf16>, vector<16x64xbf16>, vector<256x64xf32> -> vector<256x64xf32>
    %c0_3 = arith.constant 0 : index
    %c0_4 = arith.constant 0 : index
    %3 = vector.load %arg3[%c0_3, %c0_4] : memref<1x64xf32, #tpu.memory_space<vmem>>, vector<1x64xf32>
    %4 = vector.broadcast %3 : vector<1x64xf32> to vector<256x64xf32>
    %5 = arith.addf %2, %4 : vector<256x64xf32>
    %cst_5 = arith.constant 0.000000e+00 : f32
    %6 = vector.broadcast %cst_5 : f32 to vector<256x64xf32>
    %7 = arith.cmpf ogt, %5, %6 : vector<256x64xf32>
    %cst_6 = arith.constant 0.00999999977 : f32
    %8 = vector.broadcast %cst_6 : f32 to vector<256x64xf32>
    %9 = arith.mulf %8, %5 : vector<256x64xf32>
    %10 = arith.select %7, %5, %9 : vector<256x64xi1>, vector<256x64xf32>
    %11 = arith.truncf %10 : vector<256x64xf32> to vector<256x64xbf16>
    %c0_7 = arith.constant 0 : index
    %c0_8 = arith.constant 0 : index
    %12 = vector.load %arg4[%c0_7, %c0_8] : memref<256x64xbf16, #tpu.memory_space<vmem>>, vector<256x64xbf16>
    tpu.vector_store %arg4[%c0_7, %c0_8], %11 {strides = array<i32>} : memref<256x64xbf16, #tpu.memory_space<vmem>>, vector<256x64xbf16>,
    return
  }
  func.func @transform_0(%arg0: i32) -> (i32, i32) {
    %c0_i32 = arith.constant 0 : i32
    %c0_i32_0 = arith.constant 0 : i32
    return %arg0, %c0_i32 : i32, i32
  }
  func.func @transform_1(%arg0: i32) -> (i32, i32) {
    %c0_i32 = arith.constant 0 : i32
    %c0_i32_0 = arith.constant 0 : i32
    %c0_i32_1 = arith.constant 0 : i32
    return %c0_i32, %c0_i32_0 : i32, i32
  }
  func.func @transform_2(%arg0: i32) -> (i32, i32) {
    %c0_i32 = arith.constant 0 : i32
    %c0_i32_0 = arith.constant 0 : i32
    %c0_i32_1 = arith.constant 0 : i32
    return %c0_i32, %c0_i32_0 : i32, i32
  }
  func.func @transform_3(%arg0: i32) -> (i32, i32) {
    %c0_i32 = arith.constant 0 : i32
    %c0_i32_0 = arith.constant 0 : i32
    return %arg0, %c0_i32 : i32, i32
  }
}

module attributes {stable_mosaic.version = 11 : i64} {
  func.func @_linear_leaky_kernel(%arg0: i32, %arg1: memref<144x256xbf16, #tpu.memory_space<vmem>>, %arg2: memref<256x128xbf16, #tpu.memory_space<vmem>>, %arg3: memref<1x128xf32, #tpu.memory_space<vmem>>, %arg4: memref<144x128xbf16, #tpu.memory_space<vmem>>) attributes {dimension_semantics = [#tpu.dimension_semantics<parallel>], iteration_bounds = array<i64: 1>, scalar_prefetch = 0 : i64, scratch_operands = 0 : i64, tpu.core_type = #tpu.core_type<tc>, window_params = [{transform_indices = @transform_0, window_bounds = array<i64: 144, 256>}, {pipeline_mode = #tpu.pipeline_mode<synchronous>, transform_indices = @transform_1, window_bounds = array<i64: 256, 128>}, {pipeline_mode = #tpu.pipeline_mode<synchronous>, transform_indices = @transform_2, window_bounds = array<i64: 1, 128>}, {transform_indices = @transform_3, window_bounds = array<i64: 144, 128>}]} {
    %c0 = arith.constant 0 : index
    %c0_0 = arith.constant 0 : index
    %0 = vector.load %arg1[%c0, %c0_0] : memref<144x256xbf16, #tpu.memory_space<vmem>>, vector<144x256xbf16>
    %c0_1 = arith.constant 0 : index
    %c0_2 = arith.constant 0 : index
    %1 = vector.load %arg2[%c0_1, %c0_2] : memref<256x128xbf16, #tpu.memory_space<vmem>>, vector<256x128xbf16>
    %cst = arith.constant dense<0.000000e+00> : vector<144x128xf32>
    %2 = tpu.matmul %0, %1, %cst {dimension_numbers = #tpu.dot_dimension_numbers<[1], [0], [0], [1], [0, 0, 1, 1], [], []>} : vector<144x256xbf16>, vector<256x128xbf16>, vector<144x128xf32> -> vector<144x128xf32>
    %c0_3 = arith.constant 0 : index
    %c0_4 = arith.constant 0 : index
    %3 = vector.load %arg3[%c0_3, %c0_4] : memref<1x128xf32, #tpu.memory_space<vmem>>, vector<1x128xf32>
    %4 = vector.broadcast %3 : vector<1x128xf32> to vector<144x128xf32>
    %5 = arith.addf %2, %4 : vector<144x128xf32>
    %cst_5 = arith.constant 0.000000e+00 : f32
    %6 = vector.broadcast %cst_5 : f32 to vector<144x128xf32>
    %7 = arith.cmpf ogt, %5, %6 : vector<144x128xf32>
    %cst_6 = arith.constant 0.00999999977 : f32
    %8 = vector.broadcast %cst_6 : f32 to vector<144x128xf32>
    %9 = arith.mulf %8, %5 : vector<144x128xf32>
    %10 = arith.select %7, %5, %9 : vector<144x128xi1>, vector<144x128xf32>
    %11 = arith.truncf %10 : vector<144x128xf32> to vector<144x128xbf16>
    %c0_7 = arith.constant 0 : index
    %c0_8 = arith.constant 0 : index
    %12 = vector.load %arg4[%c0_7, %c0_8] : memref<144x128xbf16, #tpu.memory_space<vmem>>, vector<144x128xbf16>
    tpu.vector_store %arg4[%c0_7, %c0_8], %11 {strides = array<i32>} : memref<144x128xbf16, #tpu.memory_space<vmem>>, vector<144x128xbf16>,
    return
  }
  func.func @transform_0(%arg0: i32) -> (i32, i32) {
    %c0_i32 = arith.constant 0 : i32
    %c0_i32_0 = arith.constant 0 : i32
    return %arg0, %c0_i32 : i32, i32
  }
  func.func @transform_1(%arg0: i32) -> (i32, i32) {
    %c0_i32 = arith.constant 0 : i32
    %c0_i32_0 = arith.constant 0 : i32
    %c0_i32_1 = arith.constant 0 : i32
    return %c0_i32, %c0_i32_0 : i32, i32
  }
  func.func @transform_2(%arg0: i32) -> (i32, i32) {
    %c0_i32 = arith.constant 0 : i32
    %c0_i32_0 = arith.constant 0 : i32
    %c0_i32_1 = arith.constant 0 : i32
    return %c0_i32, %c0_i32_0 : i32, i32
  }
  func.func @transform_3(%arg0: i32) -> (i32, i32) {
    %c0_i32 = arith.constant 0 : i32
    %c0_i32_0 = arith.constant 0 : i32
    return %arg0, %c0_i32 : i32, i32
  }
}

module attributes {stable_mosaic.version = 11 : i64} {
  func.func @_linear_leaky_kernel(%arg0: i32, %arg1: memref<64x512xbf16, #tpu.memory_space<vmem>>, %arg2: memref<512x256xbf16, #tpu.memory_space<vmem>>, %arg3: memref<1x256xf32, #tpu.memory_space<vmem>>, %arg4: memref<64x256xbf16, #tpu.memory_space<vmem>>) attributes {dimension_semantics = [#tpu.dimension_semantics<parallel>], iteration_bounds = array<i64: 1>, scalar_prefetch = 0 : i64, scratch_operands = 0 : i64, tpu.core_type = #tpu.core_type<tc>, window_params = [{transform_indices = @transform_0, window_bounds = array<i64: 64, 512>}, {pipeline_mode = #tpu.pipeline_mode<synchronous>, transform_indices = @transform_1, window_bounds = array<i64: 512, 256>}, {pipeline_mode = #tpu.pipeline_mode<synchronous>, transform_indices = @transform_2, window_bounds = array<i64: 1, 256>}, {transform_indices = @transform_3, window_bounds = array<i64: 64, 256>}]} {
    %c0 = arith.constant 0 : index
    %c0_0 = arith.constant 0 : index
    %0 = vector.load %arg1[%c0, %c0_0] : memref<64x512xbf16, #tpu.memory_space<vmem>>, vector<64x512xbf16>
    %c0_1 = arith.constant 0 : index
    %c0_2 = arith.constant 0 : index
    %1 = vector.load %arg2[%c0_1, %c0_2] : memref<512x256xbf16, #tpu.memory_space<vmem>>, vector<512x256xbf16>
    %cst = arith.constant dense<0.000000e+00> : vector<64x256xf32>
    %2 = tpu.matmul %0, %1, %cst {dimension_numbers = #tpu.dot_dimension_numbers<[1], [0], [0], [1], [0, 0, 1, 1], [], []>} : vector<64x512xbf16>, vector<512x256xbf16>, vector<64x256xf32> -> vector<64x256xf32>
    %c0_3 = arith.constant 0 : index
    %c0_4 = arith.constant 0 : index
    %3 = vector.load %arg3[%c0_3, %c0_4] : memref<1x256xf32, #tpu.memory_space<vmem>>, vector<1x256xf32>
    %4 = vector.broadcast %3 : vector<1x256xf32> to vector<64x256xf32>
    %5 = arith.addf %2, %4 : vector<64x256xf32>
    %cst_5 = arith.constant 0.000000e+00 : f32
    %6 = vector.broadcast %cst_5 : f32 to vector<64x256xf32>
    %7 = arith.cmpf ogt, %5, %6 : vector<64x256xf32>
    %cst_6 = arith.constant 0.00999999977 : f32
    %8 = vector.broadcast %cst_6 : f32 to vector<64x256xf32>
    %9 = arith.mulf %8, %5 : vector<64x256xf32>
    %10 = arith.select %7, %5, %9 : vector<64x256xi1>, vector<64x256xf32>
    %11 = arith.truncf %10 : vector<64x256xf32> to vector<64x256xbf16>
    %c0_7 = arith.constant 0 : index
    %c0_8 = arith.constant 0 : index
    %12 = vector.load %arg4[%c0_7, %c0_8] : memref<64x256xbf16, #tpu.memory_space<vmem>>, vector<64x256xbf16>
    tpu.vector_store %arg4[%c0_7, %c0_8], %11 {strides = array<i32>} : memref<64x256xbf16, #tpu.memory_space<vmem>>, vector<64x256xbf16>,
    return
  }
  func.func @transform_0(%arg0: i32) -> (i32, i32) {
    %c0_i32 = arith.constant 0 : i32
    %c0_i32_0 = arith.constant 0 : i32
    return %arg0, %c0_i32 : i32, i32
  }
  func.func @transform_1(%arg0: i32) -> (i32, i32) {
    %c0_i32 = arith.constant 0 : i32
    %c0_i32_0 = arith.constant 0 : i32
    %c0_i32_1 = arith.constant 0 : i32
    return %c0_i32, %c0_i32_0 : i32, i32
  }
  func.func @transform_2(%arg0: i32) -> (i32, i32) {
    %c0_i32 = arith.constant 0 : i32
    %c0_i32_0 = arith.constant 0 : i32
    %c0_i32_1 = arith.constant 0 : i32
    return %c0_i32, %c0_i32_0 : i32, i32
  }
  func.func @transform_3(%arg0: i32) -> (i32, i32) {
    %c0_i32 = arith.constant 0 : i32
    %c0_i32_0 = arith.constant 0 : i32
    return %arg0, %c0_i32 : i32, i32
  }
}

module attributes {stable_mosaic.version = 11 : i64} {
  func.func @_linear_leaky_kernel(%arg0: i32, %arg1: memref<40x1024xbf16, #tpu.memory_space<vmem>>, %arg2: memref<1024x512xbf16, #tpu.memory_space<vmem>>, %arg3: memref<1x512xf32, #tpu.memory_space<vmem>>, %arg4: memref<40x512xbf16, #tpu.memory_space<vmem>>) attributes {dimension_semantics = [#tpu.dimension_semantics<parallel>], iteration_bounds = array<i64: 1>, scalar_prefetch = 0 : i64, scratch_operands = 0 : i64, tpu.core_type = #tpu.core_type<tc>, window_params = [{transform_indices = @transform_0, window_bounds = array<i64: 40, 1024>}, {pipeline_mode = #tpu.pipeline_mode<synchronous>, transform_indices = @transform_1, window_bounds = array<i64: 1024, 512>}, {pipeline_mode = #tpu.pipeline_mode<synchronous>, transform_indices = @transform_2, window_bounds = array<i64: 1, 512>}, {transform_indices = @transform_3, window_bounds = array<i64: 40, 512>}]} {
    %c0 = arith.constant 0 : index
    %c0_0 = arith.constant 0 : index
    %0 = vector.load %arg1[%c0, %c0_0] : memref<40x1024xbf16, #tpu.memory_space<vmem>>, vector<40x1024xbf16>
    %c0_1 = arith.constant 0 : index
    %c0_2 = arith.constant 0 : index
    %1 = vector.load %arg2[%c0_1, %c0_2] : memref<1024x512xbf16, #tpu.memory_space<vmem>>, vector<1024x512xbf16>
    %cst = arith.constant dense<0.000000e+00> : vector<40x512xf32>
    %2 = tpu.matmul %0, %1, %cst {dimension_numbers = #tpu.dot_dimension_numbers<[1], [0], [0], [1], [0, 0, 1, 1], [], []>} : vector<40x1024xbf16>, vector<1024x512xbf16>, vector<40x512xf32> -> vector<40x512xf32>
    %c0_3 = arith.constant 0 : index
    %c0_4 = arith.constant 0 : index
    %3 = vector.load %arg3[%c0_3, %c0_4] : memref<1x512xf32, #tpu.memory_space<vmem>>, vector<1x512xf32>
    %4 = vector.broadcast %3 : vector<1x512xf32> to vector<40x512xf32>
    %5 = arith.addf %2, %4 : vector<40x512xf32>
    %cst_5 = arith.constant 0.000000e+00 : f32
    %6 = vector.broadcast %cst_5 : f32 to vector<40x512xf32>
    %7 = arith.cmpf ogt, %5, %6 : vector<40x512xf32>
    %cst_6 = arith.constant 0.00999999977 : f32
    %8 = vector.broadcast %cst_6 : f32 to vector<40x512xf32>
    %9 = arith.mulf %8, %5 : vector<40x512xf32>
    %10 = arith.select %7, %5, %9 : vector<40x512xi1>, vector<40x512xf32>
    %11 = arith.truncf %10 : vector<40x512xf32> to vector<40x512xbf16>
    %c0_7 = arith.constant 0 : index
    %c0_8 = arith.constant 0 : index
    %12 = vector.load %arg4[%c0_7, %c0_8] : memref<40x512xbf16, #tpu.memory_space<vmem>>, vector<40x512xbf16>
    tpu.vector_store %arg4[%c0_7, %c0_8], %11 {strides = array<i32>} : memref<40x512xbf16, #tpu.memory_space<vmem>>, vector<40x512xbf16>,
    return
  }
  func.func @transform_0(%arg0: i32) -> (i32, i32) {
    %c0_i32 = arith.constant 0 : i32
    %c0_i32_0 = arith.constant 0 : i32
    return %arg0, %c0_i32 : i32, i32
  }
  func.func @transform_1(%arg0: i32) -> (i32, i32) {
    %c0_i32 = arith.constant 0 : i32
    %c0_i32_0 = arith.constant 0 : i32
    %c0_i32_1 = arith.constant 0 : i32
    return %c0_i32, %c0_i32_0 : i32, i32
  }
  func.func @transform_2(%arg0: i32) -> (i32, i32) {
    %c0_i32 = arith.constant 0 : i32
    %c0_i32_0 = arith.constant 0 : i32
    %c0_i32_1 = arith.constant 0 : i32
    return %c0_i32, %c0_i32_0 : i32, i32
  }
  func.func @transform_3(%arg0: i32) -> (i32, i32) {
    %c0_i32 = arith.constant 0 : i32
    %c0_i32_0 = arith.constant 0 : i32
    return %arg0, %c0_i32 : i32, i32
  }
}

module attributes {stable_mosaic.version = 11 : i64} {
  func.func @_fc_head_kernel(%arg0: memref<4x4608xbf16, #tpu.memory_space<vmem>>, %arg1: memref<1x4608xbf16, #tpu.memory_space<vmem>>, %arg2: memref<1x1xf32, #tpu.memory_space<vmem>>, %arg3: memref<4x1xf32, #tpu.memory_space<vmem>>, %arg4: memref<4x1xf32, #tpu.memory_space<vmem>>) attributes {dimension_semantics = [], scalar_prefetch = 0 : i64, scratch_operands = 0 : i64, tpu.core_type = #tpu.core_type<tc>} {
    %c0 = arith.constant 0 : index
    %c0_0 = arith.constant 0 : index
    %0 = vector.load %arg0[%c0, %c0_0] : memref<4x4608xbf16, #tpu.memory_space<vmem>>, vector<4x4608xbf16>
    %1 = arith.extf %0 : vector<4x4608xbf16> to vector<4x4608xf32>
    %c0_1 = arith.constant 0 : index
    %c0_2 = arith.constant 0 : index
    %2 = vector.load %arg1[%c0_1, %c0_2] : memref<1x4608xbf16, #tpu.memory_space<vmem>>, vector<1x4608xbf16>
    %3 = arith.extf %2 : vector<1x4608xbf16> to vector<1x4608xf32>
    %4 = vector.broadcast %3 : vector<1x4608xf32> to vector<4x4608xf32>
    %5 = arith.mulf %1, %4 : vector<4x4608xf32>
    %cst = arith.constant dense<0.000000e+00> : vector<4xf32>
    %6 = vector.multi_reduction <add>, %5, %cst [1] : vector<4x4608xf32> to vector<4xf32>
    %7 = vector.shape_cast %6 : vector<4xf32> to vector<4x1xf32>
    %c0_3 = arith.constant 0 : index
    %c0_4 = arith.constant 0 : index
    %8 = vector.load %arg2[%c0_3, %c0_4] : memref<1x1xf32, #tpu.memory_space<vmem>>, vector<1x1xf32>
    %9 = vector.broadcast %8 : vector<1x1xf32> to vector<4x1xf32>
    %10 = arith.addf %7, %9 : vector<4x1xf32>
    %c0_5 = arith.constant 0 : index
    %c0_6 = arith.constant 0 : index
    %11 = vector.load %arg3[%c0_5, %c0_6] : memref<4x1xf32, #tpu.memory_space<vmem>>, vector<4x1xf32>
    %12 = arith.addf %10, %11 : vector<4x1xf32>
    %c0_7 = arith.constant 0 : index
    %c0_8 = arith.constant 0 : index
    %13 = vector.load %arg4[%c0_7, %c0_8] : memref<4x1xf32, #tpu.memory_space<vmem>>, vector<4x1xf32>
    tpu.vector_store %arg4[%c0_7, %c0_8], %12 {strides = array<i32>} : memref<4x1xf32, #tpu.memory_space<vmem>>, vector<4x1xf32>,
    return
  }
}

</mosaic_0001>

<bundles_post_ra>
// kernel: mnist_discriminator_fwd.5
= control target key start
LH: loop header
LB: loop body
LE: loop exit
PB: predicated region body
PF: predicated region fallthrough
CT: control target
= control target key end

     0   :  { %s806_s12 = smov 0   ;;  %s952_s0 = inlined_call_operand.vmem [shape: bf16[512,16], index: 0, kind: input, shape index: {}]   ;;  %s953_s1 = inlined_call_operand.vmem [shape: bf16[16,64], index: 1, kind: input, shape index: {}]   ;;  %s954_s2 = inlined_call_operand.vmem [shape: f32[1,64], index: 2, kind: input, shape index: {}]   ;;  %s955_s3 = inlined_call_operand.vmem [shape: bf16[512,64], index: 3, kind: output, shape index: {}]  }
   0x1 LB: > { %s654_s13 = sadd.s32 4294967295, %s784_s12   ;;  %p658_p0 = scmp.ge.s32.totalorder %s784_s12, 1  ;;  %s784_s12 = sphi %s806_s12, %s13_s12  }
   0x2   : > { %p138_p1 = scmp.lt.s32.totalorder %s784_s12, 3 }
   0x4   : > { %p139_p2 = pnand %p658_p0, %p138_p1 }
   0x5   : > { %s659_s16 = sshll.u32 (!%p139_p2), %s654_s13, 5 }
   0x6   : > { %142 = sbr.rel (%p139_p2) target bundleno = 214 (0xd6), region = 32  ;;  %p163_p3 = scmp.lt.s32.totalorder (!%p139_p2), %s659_s16, 63 }
   0xb   : > { %v765_v0 = vld [vmem:[%s953_s1] sm:$0xff]  ;;  %s957_s16 = smov (!%p163_p3, %s659_s16), 63  ;;  %vm299_vm0 = vcmask 130048   ;;  %vm565_vm3 = vcmask 519168  }
   0xc   : > { %355 = vmatpush.bf16.msra.mxu0 %v765_v0  ;;  %766 = vmatpush.bf16.msra.mxu1 %v765_v0  ;;  %s660_s17 = sshll.u32 %s957_s16, 2  ;;  %v844_v17 = vld [vmem:[%s954_s2] ss:$0 sm:$0xff] }
   0xd   : > { %767 = vmatpush.bf16.msra.mxu2 %v765_v0  ;;  %768 = vmatpush.bf16.msra.mxu3 %v765_v0  ;;  %s166_s20 = scalar_lea.vmem %s952_s0, %s660_s17  ;;  %s853_s25 = scalar_lea.vmem %s955_s3, %s660_s17 }
   0xe   : > { %v749_v1 = vld [vmem:[%s166_s20] sm:$0xff]  ;;  %v750_v5 = vld [vmem:[%s166_s20 + $0x8] sm:$0xff]  ;;  %v751_v9 = vld [vmem:[%s166_s20 + $0x10] sm:$0xff] }
   0xf   : > { %v753_v2 = vld [vmem:[%s166_s20 + $0x20] sm:$0xff]  ;;  %731 = vmatmul.msk.bf16.vlgmr.msra.gmra.mxu0 %vm299_vm0, %v749_v1  ;;  %v754_v6 = vld [vmem:[%s166_s20 + $0x28] sm:$0xff]  ;;  %v755_v10 = vld [vmem:[%s166_s20 + $0x30] sm:$0xff] }
  0x10   : > { %v757_v3 = vld [vmem:[%s166_s20 + $0x40] sm:$0xff]  ;;  %735 = vmatmul.msk.bf16.vlgmr.msra.gmra.mxu1 %vm299_vm0, %v753_v2  ;;  %v758_v7 = vld [vmem:[%s166_s20 + $0x48] sm:$0xff]  ;;  %v759_v11 = vld [vmem:[%s166_s20 + $0x50] sm:$0xff] }
  0x11   : > { %v761_v4 = vld [vmem:[%s166_s20 + $0x60] sm:$0xff]  ;;  %739 = vmatmul.msk.bf16.vlgmr.msra.gmra.mxu2 %vm299_vm0, %v757_v3  ;;  %v762_v8 = vld [vmem:[%s166_s20 + $0x68] sm:$0xff]  ;;  %v763_v12 = vld [vmem:[%s166_s20 + $0x70] sm:$0xff] }
  0x12   : > { %743 = vmatmul.msk.bf16.vlgmr.msra.gmra.mxu3 %vm299_vm0, %v761_v4  ;;  %v752_v13 = vld [vmem:[%s166_s20 + $0x18] sm:$0xff] }
  0x13   : > { %v756_v14 = vld [vmem:[%s166_s20 + $0x38] sm:$0xff] }
  0x14   : > { %v760_v15 = vld [vmem:[%s166_s20 + $0x58] sm:$0xff] }
  0x15   : > { %v764_v16 = vld [vmem:[%s166_s20 + $0x78] sm:$0xff] }
  0x1f   : > { %732 = vmatmul.msk.bf16.gmra.mxu0 %vm299_vm0, %v750_v5 }
  0x20   : > { %736 = vmatmul.msk.bf16.gmra.mxu1 %vm299_vm0, %v754_v6 }
  0x21   : > { %740 = vmatmul.msk.bf16.gmra.mxu2 %vm299_vm0, %v758_v7 }
  0x22   : > { %744 = vmatmul.msk.bf16.gmra.mxu3 %vm299_vm0, %v762_v8 }
  0x2f   : > { %733 = vmatmul.msk.bf16.gmra.mxu0 %vm299_vm0, %v751_v9 }
  0x30   : > { %737 = vmatmul.msk.bf16.gmra.mxu1 %vm299_vm0, %v755_v10 }
  0x31   : > { %741 = vmatmul.msk.bf16.gmra.mxu2 %vm299_vm0, %v759_v11 }
  0x32   : > { %745 = vmatmul.msk.bf16.gmra.mxu3 %vm299_vm0, %v763_v12 }
  0x3f   : > { %734 = vmatmul.msk.bf16.gmra.mxu0 %vm299_vm0, %v752_v13 }
  0x40   : > { %738 = vmatmul.msk.bf16.gmra.mxu1 %vm299_vm0, %v756_v14 }
  0x41   : > { %742 = vmatmul.msk.bf16.gmra.mxu2 %vm299_vm0, %v760_v15 }
  0x42   : > { %746 = vmatmul.msk.bf16.gmra.mxu3 %vm299_vm0, %v764_v16 }
  0x8c   : > { %v357_v18 = vpop.f32.mrf.mxu0 }
  0x8d   : > { %v377_v19 = vpop.f32.mrf.mxu1  ;;  %v358_v20 = vadd.f32 %v844_v17, %v357_v18 }
  0x8e   : > { %v378_v21 = vadd.f32 %v844_v17, %v377_v19 }
  0x8f   : > { %vm437_vm1 = vcmp.gt.f32.partialorder %v358_v20, 0.0  ;;  %v469_v22 = vmul.f32 0.01, %v358_v20 }
  0x90   : > { %vm445_vm2 = vcmp.gt.f32.partialorder %v378_v21, 0.0  ;;  %v477_v23 = vmul.f32 0.01, %v378_v21 }
  0x91   : > { %v501_v24 = vsel %vm437_vm1, %v358_v20, %v469_v22 }
  0x92   : > { %v509_v25 = vsel %vm445_vm2, %v378_v21, %v477_v23  ;;  %v533_v26 = vpack.c.bf16 %v501_v24, %v501_v24 }
  0x93   : > { %v541_v27 = vpack.c.bf16 %v509_v25, %v509_v25 }
  0x94   : > { %v397_v28 = vpop.f32.mrf.mxu2  ;;  %566 = vst.msk [vmem:[%s853_s25] sm:$0xf] %vm565_vm3, %v533_v26  ;;  %v359_v32 = vpop.f32.mrf.mxu0 }
  0x95   : > { %v417_v29 = vpop.f32.mrf.mxu3  ;;  %v398_v30 = vadd.f32 %v844_v17, %v397_v28  ;;  %v379_v33 = vpop.f32.mrf.mxu1  ;;  %574 = vst.msk [vmem:[%s853_s25 + $0x20] sm:$0xf] %vm565_vm3, %v541_v27  ;;  %v360_v34 = vadd.f32 %v844_v17, %v359_v32 }
  0x96   : > { %v418_v31 = vadd.f32 %v844_v17, %v417_v29  ;;  %v380_v35 = vadd.f32 %v844_v17, %v379_v33 }
  0x97   : > { %vm453_vm4 = vcmp.gt.f32.partialorder %v398_v30, 0.0  ;;  %v485_v36 = vmul.f32 0.01, %v398_v30  ;;  %vm438_vm6 = vcmp.gt.f32.partialorder %v360_v34, 0.0  ;;  %v470_v38 = vmul.f32 0.01, %v360_v34 }
  0x98   : > { %vm461_vm5 = vcmp.gt.f32.partialorder %v418_v31, 0.0  ;;  %v493_v37 = vmul.f32 0.01, %v418_v31  ;;  %vm446_vm7 = vcmp.gt.f32.partialorder %v380_v35, 0.0  ;;  %v478_v39 = vmul.f32 0.01, %v380_v35 }
  0x99   : > { %v517_v40 = vsel %vm453_vm4, %v398_v30, %v485_v36  ;;  %v502_v44 = vsel %vm438_vm6, %v360_v34, %v470_v38 }
  0x9a   : > { %v525_v41 = vsel %vm461_vm5, %v418_v31, %v493_v37  ;;  %v549_v42 = vpack.c.bf16 %v517_v40, %v517_v40  ;;  %v510_v45 = vsel %vm446_vm7, %v380_v35, %v478_v39  ;;  %v534_v46 = vpack.c.bf16 %v502_v44, %v502_v44 }
  0x9b   : > { %v557_v43 = vpack.c.bf16 %v525_v41, %v525_v41  ;;  %v542_v47 = vpack.c.bf16 %v510_v45, %v510_v45 }
  0x9c   : > { %582 = vst.msk [vmem:[%s853_s25 + $0x40] sm:$0xf] %vm565_vm3, %v549_v42  ;;  %v399_v48 = vpop.f32.mrf.mxu2  ;;  %v362_v52 = vpop.f32.mrf.mxu0 }
  0x9d   : > { %v419_v49 = vpop.f32.mrf.mxu3  ;;  %590 = vst.msk [vmem:[%s853_s25 + $0x60] sm:$0xf] %vm565_vm3, %v557_v43  ;;  %v400_v50 = vadd.f32 %v844_v17, %v399_v48  ;;  %v382_v53 = vpop.f32.mrf.mxu1  ;;  %v363_v54 = vadd.f32 %v844_v17, %v362_v52 }
  0x9e   : > { %v420_v51 = vadd.f32 %v844_v17, %v419_v49  ;;  %567 = vst.msk [vmem:[%s853_s25 + $0x4] sm:$0xf] %vm565_vm3, %v534_v46  ;;  %v383_v55 = vadd.f32 %v844_v17, %v382_v53 }
  0x9f   : > { %575 = vst.msk [vmem:[%s853_s25 + $0x24] sm:$0xf] %vm565_vm3, %v542_v47  ;;  %vm454_vm8 = vcmp.gt.f32.partialorder %v400_v50, 0.0  ;;  %v486_v56 = vmul.f32 0.01, %v400_v50  ;;  %vm439_vm10 = vcmp.gt.f32.partialorder %v363_v54, 0.0 }
  0xa0   : > { %vm462_vm9 = vcmp.gt.f32.partialorder %v420_v51, 0.0  ;;  %v494_v57 = vmul.f32 0.01, %v420_v51  ;;  %v471_v58 = vmul.f32 0.01, %v363_v54  ;;  %vm447_vm11 = vcmp.gt.f32.partialorder %v383_v55, 0.0 }
  0xa1   : > { %v518_v59 = vsel %vm454_vm8, %v400_v50, %v486_v56  ;;  %v479_v60 = vmul.f32 0.01, %v383_v55 }
  0xa2   : > { %v550_v61 = vpack.c.bf16 %v518_v59, %v518_v59  ;;  %v526_v62 = vsel %vm462_vm9, %v420_v51, %v494_v57  ;;  %v503_v63 = vsel %vm439_vm10, %v363_v54, %v471_v58 }
  0xa3   : > { %v558_v0 = vpack.c.bf16 %v526_v62, %v526_v62  ;;  %v535_v1 = vpack.c.bf16 %v503_v63, %v503_v63  ;;  %v511_v2 = vsel %vm447_vm11, %v383_v55, %v479_v60 }
  0xa4   : > { %583 = vst.msk [vmem:[%s853_s25 + $0x44] sm:$0xf] %vm565_vm3, %v550_v61  ;;  %v543_v3 = vpack.c.bf16 %v511_v2, %v511_v2  ;;  %v402_v4 = vpop.f32.mrf.mxu2  ;;  %v364_v8 = vpop.f32.mrf.mxu0 }
  0xa5   : > { %v422_v5 = vpop.f32.mrf.mxu3  ;;  %591 = vst.msk [vmem:[%s853_s25 + $0x64] sm:$0xf] %vm565_vm3, %v558_v0  ;;  %v403_v6 = vadd.f32 %v844_v17, %v402_v4  ;;  %v384_v9 = vpop.f32.mrf.mxu1  ;;  %v365_v10 = vadd.f32 %v844_v17, %v364_v8 }
  0xa6   : > { %v423_v7 = vadd.f32 %v844_v17, %v422_v5  ;;  %568 = vst.msk [vmem:[%s853_s25 + $0x8] sm:$0xf] %vm565_vm3, %v535_v1  ;;  %v385_v11 = vadd.f32 %v844_v17, %v384_v9 }
  0xa7   : > { %576 = vst.msk [vmem:[%s853_s25 + $0x28] sm:$0xf] %vm565_vm3, %v543_v3  ;;  %vm455_vm12 = vcmp.gt.f32.partialorder %v403_v6, 0.0  ;;  %v487_v12 = vmul.f32 0.01, %v403_v6  ;;  %vm440_vm14 = vcmp.gt.f32.partialorder %v365_v10, 0.0 }
  0xa8   : > { %vm463_vm13 = vcmp.gt.f32.partialorder %v423_v7, 0.0  ;;  %v495_v13 = vmul.f32 0.01, %v423_v7  ;;  %v472_v14 = vmul.f32 0.01, %v365_v10  ;;  %vm448_vm15 = vcmp.gt.f32.partialorder %v385_v11, 0.0 }
  0xa9   : > { %v519_v15 = vsel %vm455_vm12, %v403_v6, %v487_v12  ;;  %v480_v16 = vmul.f32 0.01, %v385_v11 }
  0xaa   : > { %v551_v18 = vpack.c.bf16 %v519_v15, %v519_v15  ;;  %v527_v19 = vsel %vm463_vm13, %v423_v7, %v495_v13  ;;  %v504_v20 = vsel %vm440_vm14, %v365_v10, %v472_v14 }
  0xab   : > { %v559_v21 = vpack.c.bf16 %v527_v19, %v527_v19  ;;  %v536_v22 = vpack.c.bf16 %v504_v20, %v504_v20  ;;  %v512_v23 = vsel %vm448_vm15, %v385_v11, %v480_v16 }
  0xac   : > { %584 = vst.msk [vmem:[%s853_s25 + $0x48] sm:$0xf] %vm565_vm3, %v551_v18  ;;  %v544_v24 = vpack.c.bf16 %v512_v23, %v512_v23  ;;  %v404_v25 = vpop.f32.mrf.mxu2  ;;  %v367_v29 = vpop.f32.mrf.mxu0 }
  0xad   : > { %v424_v26 = vpop.f32.mrf.mxu3  ;;  %592 = vst.msk [vmem:[%s853_s25 + $0x68] sm:$0xf] %vm565_vm3, %v559_v21  ;;  %v405_v27 = vadd.f32 %v844_v17, %v404_v25  ;;  %v387_v30 = vpop.f32.mrf.mxu1  ;;  %v368_v31 = vadd.f32 %v844_v17, %v367_v29 }
  0xae   : > { %v425_v28 = vadd.f32 %v844_v17, %v424_v26  ;;  %569 = vst.msk [vmem:[%s853_s25 + $0xc] sm:$0xf] %vm565_vm3, %v536_v22  ;;  %v388_v32 = vadd.f32 %v844_v17, %v387_v30 }
  0xaf   : > { %577 = vst.msk [vmem:[%s853_s25 + $0x2c] sm:$0xf] %vm565_vm3, %v544_v24  ;;  %vm456_vm0 = vcmp.gt.f32.partialorder %v405_v27, 0.0  ;;  %v488_v33 = vmul.f32 0.01, %v405_v27  ;;  %vm441_vm2 = vcmp.gt.f32.partialorder %v368_v31, 0.0 }
  0xb0   : > { %vm464_vm1 = vcmp.gt.f32.partialorder %v425_v28, 0.0  ;;  %v496_v34 = vmul.f32 0.01, %v425_v28  ;;  %v473_v35 = vmul.f32 0.01, %v368_v31  ;;  %vm449_vm4 = vcmp.gt.f32.partialorder %v388_v32, 0.0 }
  0xb1   : > { %v520_v36 = vsel %vm456_vm0, %v405_v27, %v488_v33  ;;  %v481_v37 = vmul.f32 0.01, %v388_v32 }
  0xb2   : > { %v552_v38 = vpack.c.bf16 %v520_v36, %v520_v36  ;;  %v528_v39 = vsel %vm464_vm1, %v425_v28, %v496_v34  ;;  %v505_v40 = vsel %vm441_vm2, %v368_v31, %v473_v35 }
  0xb3   : > { %v560_v41 = vpack.c.bf16 %v528_v39, %v528_v39  ;;  %v537_v42 = vpack.c.bf16 %v505_v40, %v505_v40  ;;  %v513_v43 = vsel %vm449_vm4, %v388_v32, %v481_v37 }
  0xb4   : > { %585 = vst.msk [vmem:[%s853_s25 + $0x4c] sm:$0xf] %vm565_vm3, %v552_v38  ;;  %v545_v44 = vpack.c.bf16 %v513_v43, %v513_v43  ;;  %v407_v45 = vpop.f32.mrf.mxu2  ;;  %v369_v49 = vpop.f32.mrf.mxu0 }
  0xb5   : > { %v427_v46 = vpop.f32.mrf.mxu3  ;;  %593 = vst.msk [vmem:[%s853_s25 + $0x6c] sm:$0xf] %vm565_vm3, %v560_v41  ;;  %v408_v47 = vadd.f32 %v844_v17, %v407_v45  ;;  %v389_v50 = vpop.f32.mrf.mxu1  ;;  %v370_v51 = vadd.f32 %v844_v17, %v369_v49 }
  0xb6   : > { %v428_v48 = vadd.f32 %v844_v17, %v427_v46  ;;  %570 = vst.msk [vmem:[%s853_s25 + $0x10] sm:$0xf] %vm565_vm3, %v537_v42  ;;  %v390_v52 = vadd.f32 %v844_v17, %v389_v50 }
  0xb7   : > { %578 = vst.msk [vmem:[%s853_s25 + $0x30] sm:$0xf] %vm565_vm3, %v545_v44  ;;  %vm457_vm5 = vcmp.gt.f32.partialorder %v408_v47, 0.0  ;;  %v489_v53 = vmul.f32 0.01, %v408_v47  ;;  %vm442_vm7 = vcmp.gt.f32.partialorder %v370_v51, 0.0 }
  0xb8   : > { %vm465_vm6 = vcmp.gt.f32.partialorder %v428_v48, 0.0  ;;  %v497_v54 = vmul.f32 0.01, %v428_v48  ;;  %v474_v55 = vmul.f32 0.01, %v370_v51  ;;  %vm450_vm8 = vcmp.gt.f32.partialorder %v390_v52, 0.0 }
  0xb9   : > { %v521_v56 = vsel %vm457_vm5, %v408_v47, %v489_v53  ;;  %v482_v57 = vmul.f32 0.01, %v390_v52 }
  0xba   : > { %v553_v58 = vpack.c.bf16 %v521_v56, %v521_v56  ;;  %v529_v59 = vsel %vm465_vm6, %v428_v48, %v497_v54  ;;  %v506_v60 = vsel %vm442_vm7, %v370_v51, %v474_v55 }
  0xbb   : > { %v561_v61 = vpack.c.bf16 %v529_v59, %v529_v59  ;;  %v538_v62 = vpack.c.bf16 %v506_v60, %v506_v60  ;;  %v514_v63 = vsel %vm450_vm8, %v390_v52, %v482_v57 }
  0xbc   : > { %586 = vst.msk [vmem:[%s853_s25 + $0x50] sm:$0xf] %vm565_vm3, %v553_v58  ;;  %v546_v0 = vpack.c.bf16 %v514_v63, %v514_v63  ;;  %v409_v1 = vpop.f32.mrf.mxu2  ;;  %v372_v5 = vpop.f32.mrf.mxu0 }
  0xbd   : > { %v429_v2 = vpop.f32.mrf.mxu3  ;;  %594 = vst.msk [vmem:[%s853_s25 + $0x70] sm:$0xf] %vm565_vm3, %v561_v61  ;;  %v410_v3 = vadd.f32 %v844_v17, %v409_v1  ;;  %v392_v6 = vpop.f32.mrf.mxu1  ;;  %v373_v7 = vadd.f32 %v844_v17, %v372_v5 }
  0xbe   : > { %v430_v4 = vadd.f32 %v844_v17, %v429_v2  ;;  %571 = vst.msk [vmem:[%s853_s25 + $0x14] sm:$0xf] %vm565_vm3, %v538_v62  ;;  %v393_v8 = vadd.f32 %v844_v17, %v392_v6 }
  0xbf   : > { %579 = vst.msk [vmem:[%s853_s25 + $0x34] sm:$0xf] %vm565_vm3, %v546_v0  ;;  %vm458_vm9 = vcmp.gt.f32.partialorder %v410_v3, 0.0  ;;  %v490_v9 = vmul.f32 0.01, %v410_v3  ;;  %vm443_vm11 = vcmp.gt.f32.partialorder %v373_v7, 0.0 }
  0xc0   : > { %vm466_vm10 = vcmp.gt.f32.partialorder %v430_v4, 0.0  ;;  %v498_v10 = vmul.f32 0.01, %v430_v4  ;;  %v475_v11 = vmul.f32 0.01, %v373_v7  ;;  %vm451_vm12 = vcmp.gt.f32.partialorder %v393_v8, 0.0 }
  0xc1   : > { %v522_v12 = vsel %vm458_vm9, %v410_v3, %v490_v9  ;;  %v483_v13 = vmul.f32 0.01, %v393_v8 }
  0xc2   : > { %v554_v14 = vpack.c.bf16 %v522_v12, %v522_v12  ;;  %v530_v15 = vsel %vm466_vm10, %v430_v4, %v498_v10  ;;  %v507_v16 = vsel %vm443_vm11, %v373_v7, %v475_v11 }
  0xc3   : > { %v562_v18 = vpack.c.bf16 %v530_v15, %v530_v15  ;;  %v539_v19 = vpack.c.bf16 %v507_v16, %v507_v16  ;;  %v515_v20 = vsel %vm451_vm12, %v393_v8, %v483_v13 }
  0xc4   : > { %587 = vst.msk [vmem:[%s853_s25 + $0x54] sm:$0xf] %vm565_vm3, %v554_v14  ;;  %v547_v21 = vpack.c.bf16 %v515_v20, %v515_v20  ;;  %v412_v22 = vpop.f32.mrf.mxu2  ;;  %v374_v26 = vpop.f32.mrf.mxu0 }
  0xc5   : > { %v432_v23 = vpop.f32.mrf.mxu3  ;;  %595 = vst.msk [vmem:[%s853_s25 + $0x74] sm:$0xf] %vm565_vm3, %v562_v18  ;;  %v413_v24 = vadd.f32 %v844_v17, %v412_v22  ;;  %v394_v27 = vpop.f32.mrf.mxu1  ;;  %v375_v28 = vadd.f32 %v844_v17, %v374_v26 }
  0xc6   : > { %v433_v25 = vadd.f32 %v844_v17, %v432_v23  ;;  %572 = vst.msk [vmem:[%s853_s25 + $0x18] sm:$0xf] %vm565_vm3, %v539_v19  ;;  %v395_v29 = vadd.f32 %v844_v17, %v394_v27 }
  0xc7   : > { %580 = vst.msk [vmem:[%s853_s25 + $0x38] sm:$0xf] %vm565_vm3, %v547_v21  ;;  %vm459_vm13 = vcmp.gt.f32.partialorder %v413_v24, 0.0  ;;  %v491_v30 = vmul.f32 0.01, %v413_v24  ;;  %vm444_vm15 = vcmp.gt.f32.partialorder %v375_v28, 0.0 }
  0xc8   : > { %vm467_vm14 = vcmp.gt.f32.partialorder %v433_v25, 0.0  ;;  %v499_v31 = vmul.f32 0.01, %v433_v25  ;;  %v476_v32 = vmul.f32 0.01, %v375_v28  ;;  %vm452_vm0 = vcmp.gt.f32.partialorder %v395_v29, 0.0 }
  0xc9   : > { %v523_v33 = vsel %vm459_vm13, %v413_v24, %v491_v30  ;;  %v484_v34 = vmul.f32 0.01, %v395_v29 }
  0xca   : > { %v555_v35 = vpack.c.bf16 %v523_v33, %v523_v33  ;;  %v531_v36 = vsel %vm467_vm14, %v433_v25, %v499_v31  ;;  %v508_v37 = vsel %vm444_vm15, %v375_v28, %v476_v32 }
  0xcb   : > { %v563_v38 = vpack.c.bf16 %v531_v36, %v531_v36  ;;  %v540_v39 = vpack.c.bf16 %v508_v37, %v508_v37  ;;  %v516_v40 = vsel %vm452_vm0, %v395_v29, %v484_v34 }
  0xcc   : > { %588 = vst.msk [vmem:[%s853_s25 + $0x58] sm:$0xf] %vm565_vm3, %v555_v35  ;;  %v548_v41 = vpack.c.bf16 %v516_v40, %v516_v40  ;;  %v414_v42 = vpop.f32.mrf.mxu2 }
  0xcd   : > { %v434_v43 = vpop.f32.mrf.mxu3  ;;  %596 = vst.msk [vmem:[%s853_s25 + $0x78] sm:$0xf] %vm565_vm3, %v563_v38  ;;  %v415_v44 = vadd.f32 %v844_v17, %v414_v42 }
  0xce   : > { %v435_v45 = vadd.f32 %v844_v17, %v434_v43  ;;  %573 = vst.msk [vmem:[%s853_s25 + $0x1c] sm:$0xf] %vm565_vm3, %v540_v39 }
  0xcf   : > { %581 = vst.msk [vmem:[%s853_s25 + $0x3c] sm:$0xf] %vm565_vm3, %v548_v41  ;;  %vm460_vm1 = vcmp.gt.f32.partialorder %v415_v44, 0.0  ;;  %v492_v46 = vmul.f32 0.01, %v415_v44 }
  0xd0   : > { %vm468_vm2 = vcmp.gt.f32.partialorder %v435_v45, 0.0  ;;  %v500_v47 = vmul.f32 0.01, %v435_v45 }
  0xd1   : > { %v524_v48 = vsel %vm460_vm1, %v415_v44, %v492_v46 }
  0xd2   : > { %v556_v49 = vpack.c.bf16 %v524_v48, %v524_v48  ;;  %v532_v50 = vsel %vm468_vm2, %v435_v45, %v500_v47 }
  0xd3   : > { %v564_v51 = vpack.c.bf16 %v532_v50, %v532_v50 }
  0xd4   : > { %589 = vst.msk [vmem:[%s853_s25 + $0x5c] sm:$0xf] %vm565_vm3, %v556_v49 }
  0xd5   : > { %597 = vst.msk [vmem:[%s853_s25 + $0x7c] sm:$0xf] %vm565_vm3, %v564_v51 }
  0xd6 PF: > { %s13_s12 = sadd.s32 1, %s784_s12  }
  0xd7   : > { %p10_p4 = scmp.ge.s32.totalorder %s13_s12, 4  }
  0xd9   :  { %12 = sbr.rel (!%p10_p4) target bundleno = 1 (0x1), region = 62 }

// kernel: mnist_discriminator_fwd.6
= control target key start
LH: loop header
LB: loop body
LE: loop exit
PB: predicated region body
PF: predicated region fallthrough
CT: control target
= control target key end

     0   :  { %s928_s1 = inlined_call_operand.vmem [shape: bf16[256,128], index: 1, kind: input, shape index: {}]   ;;  %s929_s2 = inlined_call_operand.vmem [shape: f32[1,128], index: 2, kind: input, shape index: {}]   ;;  %s930_s0 = inlined_call_operand.vmem [shape: bf16[144,256], index: 0, kind: input, shape index: {}]   ;;  %s931_s3 = inlined_call_operand.vmem [shape: bf16[144,128], index: 3, kind: output, shape index: {}]  }
   0x1   :  { %v617_v0 = vld [vmem:[%s928_s1 + $0x38] sm:$0xff]  ;;  %v616_v2 = vld [vmem:[%s928_s1 + $0x30] sm:$0xff]  ;;  %v615_v4 = vld [vmem:[%s928_s1 + $0x28] sm:$0xff] }
   0x2   :  { %v625_v1 = vld [vmem:[%s928_s1 + $0x78] sm:$0xff]  ;;  %254 = vmatpush.bf16.msra.mxu0 %v617_v0  ;;  %679 = vmatpush.bf16.msra.mxu2 %v617_v0  ;;  %v624_v3 = vld [vmem:[%s928_s1 + $0x70] sm:$0xff]  ;;  %v623_v5 = vld [vmem:[%s928_s1 + $0x68] sm:$0xff] }
   0x3   :  { %308 = vmatpush.bf16.msra.mxu1 %v625_v1  ;;  %687 = vmatpush.bf16.msra.mxu3 %v625_v1  ;;  %v614_v6 = vld [vmem:[%s928_s1 + $0x20] sm:$0xff]  ;;  %v613_v8 = vld [vmem:[%s928_s1 + $0x18] sm:$0xff]  ;;  %v612_v10 = vld [vmem:[%s928_s1 + $0x10] sm:$0xff] }
   0x4   :  { %v622_v7 = vld [vmem:[%s928_s1 + $0x60] sm:$0xff]  ;;  %v621_v9 = vld [vmem:[%s928_s1 + $0x58] sm:$0xff]  ;;  %v620_v11 = vld [vmem:[%s928_s1 + $0x50] sm:$0xff] }
   0x5   :  { %v611_v12 = vld [vmem:[%s928_s1 + $0x8] sm:$0xff]  ;;  %v610_v14 = vld [vmem:[%s928_s1] sm:$0xff]  ;;  %v602_v22 = vld [vmem:[%s930_s0 + $0x54] sm:$0xf] }
   0x6   :  { %255 = vmatpush.bf16.msra.mxu0 %v616_v2  ;;  %680 = vmatpush.bf16.msra.mxu2 %v616_v2  ;;  %v619_v13 = vld [vmem:[%s928_s1 + $0x48] sm:$0xff]  ;;  %v618_v15 = vld [vmem:[%s928_s1 + $0x40] sm:$0xff]  ;;  %v500_v23 = vld [vmem:[%s930_s0 + $0x58] sm:$0xf0] }
   0x7   :  { %309 = vmatpush.bf16.msra.mxu1 %v624_v3  ;;  %688 = vmatpush.bf16.msra.mxu3 %v624_v3  ;;  %v458_v16 = vld [vmem:[%s930_s0] sm:$0xf]  ;;  %v593_v17 = vld [vmem:[%s930_s0 + $0x4] sm:$0xf0]  ;;  %v592_v20 = vld [vmem:[%s930_s0 + $0x4] sm:$0xf]  ;;  %v503_v27 = vor.u32 %v602_v22, %v500_v23 }
   0x8   :  { %v490_v18 = vld [vmem:[%s930_s0 + $0x40] sm:$0xf]  ;;  %v601_v19 = vld [vmem:[%s930_s0 + $0x44] sm:$0xf0]  ;;  %v460_v21 = vld [vmem:[%s930_s0 + $0x8] sm:$0xf0]  ;;  %v459_v24 = vor.u32 %v593_v17, %v458_v16 }
   0x9   :  { %v491_v25 = vor.u32 %v601_v19, %v490_v18  ;;  %v463_v26 = vor.u32 %v592_v20, %v460_v21  ;;  %v466_v28 = vld [vmem:[%s930_s0 + $0x10] sm:$0xf]  ;;  %v595_v29 = vld [vmem:[%s930_s0 + $0x14] sm:$0xf0]  ;;  %v594_v32 = vld [vmem:[%s930_s0 + $0x14] sm:$0xf] }
   0xa   :  { %256 = vmatpush.bf16.msra.mxu0 %v615_v4  ;;  %681 = vmatpush.bf16.msra.mxu2 %v615_v4  ;;  %v498_v30 = vld [vmem:[%s930_s0 + $0x50] sm:$0xf]  ;;  %v603_v31 = vld [vmem:[%s930_s0 + $0x54] sm:$0xf0]  ;;  %v468_v33 = vld [vmem:[%s930_s0 + $0x18] sm:$0xf0]  ;;  %v467_v36 = vor.u32 %v595_v29, %v466_v28 }
   0xb   :  { %310 = vmatpush.bf16.msra.mxu1 %v623_v5  ;;  %689 = vmatpush.bf16.msra.mxu3 %v623_v5  ;;  %v604_v34 = vld [vmem:[%s930_s0 + $0x64] sm:$0xf]  ;;  %v508_v35 = vld [vmem:[%s930_s0 + $0x68] sm:$0xf0]  ;;  %v499_v37 = vor.u32 %v603_v31, %v498_v30  ;;  %v471_v38 = vor.u32 %v594_v32, %v468_v33  ;;  %v474_v40 = vld [vmem:[%s930_s0 + $0x20] sm:$0xf] }
   0xc   :  { %v511_v39 = vor.u32 %v604_v34, %v508_v35  ;;  %v597_v41 = vld [vmem:[%s930_s0 + $0x24] sm:$0xf0]  ;;  %v506_v42 = vld [vmem:[%s930_s0 + $0x60] sm:$0xf]  ;;  %v596_v44 = vld [vmem:[%s930_s0 + $0x24] sm:$0xf] }
   0xd   :  { %v605_v43 = vld [vmem:[%s930_s0 + $0x64] sm:$0xf0]  ;;  %v476_v45 = vld [vmem:[%s930_s0 + $0x28] sm:$0xf0]  ;;  %v606_v46 = vld [vmem:[%s930_s0 + $0x74] sm:$0xf]  ;;  %v475_v48 = vor.u32 %v597_v41, %v474_v40 }
   0xe   :  { %257 = vmatpush.bf16.msra.mxu0 %v614_v6  ;;  %682 = vmatpush.bf16.msra.mxu2 %v614_v6  ;;  %v516_v47 = vld [vmem:[%s930_s0 + $0x78] sm:$0xf0]  ;;  %v507_v49 = vor.u32 %v605_v43, %v506_v42  ;;  %v479_v50 = vor.u32 %v596_v44, %v476_v45  ;;  %v482_v52 = vld [vmem:[%s930_s0 + $0x30] sm:$0xf]  ;;  %v599_v53 = vld [vmem:[%s930_s0 + $0x34] sm:$0xf0] }
   0xf   :  { %311 = vmatpush.bf16.msra.mxu1 %v622_v7  ;;  %690 = vmatpush.bf16.msra.mxu3 %v622_v7  ;;  %v519_v51 = vor.u32 %v606_v46, %v516_v47  ;;  %v514_v54 = vld [vmem:[%s930_s0 + $0x70] sm:$0xf]  ;;  %v607_v55 = vld [vmem:[%s930_s0 + $0x74] sm:$0xf0]  ;;  %v598_v56 = vld [vmem:[%s930_s0 + $0x34] sm:$0xf]  ;;  %v483_v60 = vor.u32 %v599_v53, %v482_v52 }
  0x10   :  { %v484_v57 = vld [vmem:[%s930_s0 + $0x38] sm:$0xf0]  ;;  %v608_v58 = vld [vmem:[%s930_s0 + $0x84] sm:$0xf]  ;;  %v524_v59 = vld [vmem:[%s930_s0 + $0x88] sm:$0xf0]  ;;  %v515_v61 = vor.u32 %v607_v55, %v514_v54 }
  0x11   :  { %v487_v62 = vor.u32 %v598_v56, %v484_v57  ;;  %v527_v63 = vor.u32 %v608_v58, %v524_v59  ;;  %v522_v0 = vld [vmem:[%s930_s0 + $0x80] sm:$0xf]  ;;  %v609_v1 = vld [vmem:[%s930_s0 + $0x84] sm:$0xf0]  ;;  %v600_v2 = vld [vmem:[%s930_s0 + $0x44] sm:$0xf] }
  0x12   :  { %258 = vmatpush.bf16.msra.mxu0 %v613_v8  ;;  %683 = vmatpush.bf16.msra.mxu2 %v613_v8  ;;  %v492_v3 = vld [vmem:[%s930_s0 + $0x48] sm:$0xf0]  ;;  %v523_v4 = vor.u32 %v609_v1, %v522_v0  ;;  %v875_v6 = vld [vmem:[%s929_s2] ss:$0 sm:$0xff] }
  0x13   :  { %312 = vmatpush.bf16.msra.mxu1 %v621_v9  ;;  %691 = vmatpush.bf16.msra.mxu3 %v621_v9  ;;  %v495_v5 = vor.u32 %v600_v2, %v492_v3 }
  0x16   :  { %259 = vmatpush.bf16.msra.mxu0 %v612_v10  ;;  %684 = vmatpush.bf16.msra.mxu2 %v612_v10 }
  0x17   :  { %313 = vmatpush.bf16.msra.mxu1 %v620_v11  ;;  %692 = vmatpush.bf16.msra.mxu3 %v620_v11 }
  0x1a   :  { %260 = vmatpush.bf16.msra.mxu0 %v611_v12  ;;  %685 = vmatpush.bf16.msra.mxu2 %v611_v12 }
  0x1b   :  { %314 = vmatpush.bf16.msra.mxu1 %v619_v13  ;;  %693 = vmatpush.bf16.msra.mxu3 %v619_v13 }
  0x1e   :  { %261 = vmatpush.bf16.msra.mxu0 %v610_v14  ;;  %686 = vmatpush.bf16.msra.mxu2 %v610_v14 }
  0x1f   :  { %315 = vmatpush.bf16.msra.mxu1 %v618_v15  ;;  %694 = vmatpush.bf16.msra.mxu3 %v618_v15 }
  0x21   :  { %262 = vmatmul.bf16.vlgmr.msra.gmra.mxu0 %v459_v24  ;;  %282 = vmatmul.bf16.vlgmr.msra.gmra.mxu2 %v491_v25 }
  0x22   :  { %316 = vmatmul.bf16.vlgmr.msra.gmra.mxu1 %v463_v26  ;;  %341 = vmatmul.bf16.vlgmr.msra.gmra.mxu3 %v503_v27 }
  0x31   :  { %267 = vmatmul.bf16.gmra.mxu0 %v467_v36  ;;  %287 = vmatmul.bf16.gmra.mxu2 %v499_v37 }
  0x32   :  { %321 = vmatmul.bf16.gmra.mxu1 %v471_v38  ;;  %346 = vmatmul.bf16.gmra.mxu3 %v511_v39 }
  0x41   :  { %272 = vmatmul.bf16.gmra.mxu0 %v475_v48  ;;  %292 = vmatmul.bf16.gmra.mxu2 %v507_v49 }
  0x42   :  { %326 = vmatmul.bf16.gmra.mxu1 %v479_v50  ;;  %351 = vmatmul.bf16.gmra.mxu3 %v519_v51 }
  0x51   :  { %277 = vmatmul.bf16.gmra.mxu0 %v483_v60  ;;  %297 = vmatmul.bf16.gmra.mxu2 %v515_v61 }
  0x52   :  { %331 = vmatmul.bf16.gmra.mxu1 %v487_v62  ;;  %356 = vmatmul.bf16.gmra.mxu3 %v527_v63 }
  0x61   :  { %302 = vmatmul.bf16.gmra.mxu2 %v523_v4 }
  0x62   :  { %336 = vmatmul.bf16.gmra.mxu1 %v495_v5 }
  0x9e   :  { %v263_v7 = vpop.f32.mrf.mxu0 }
  0x9f   :  { %v317_v8 = vpop.f32.mrf.mxu1  ;;  %v264_v9 = vadd.f32 %v875_v6, %v263_v7 }
  0xa1   :  { %v318_v11 = vadd.f32 %v317_v8, %v264_v9 }
  0xa3   :  { %v380_v16 = vmul.f32 0.01, %v318_v11  ;;  %vm362_vm0 = vcmp.gt.f32.partialorder %v318_v11, 0.0 }
  0xa4   :  { %v878_v10 = vpop.f32.mrf.mxu2 }
  0xa5   :  { %v342_v15 = vpop.f32.mrf.mxu3  ;;  %v398_v20 = vsel %vm362_vm0, %v318_v11, %v380_v16 }
  0xa6   :  { %v265_v12 = vpop.f32.mrf.mxu0 }
  0xa7   :  { %v266_v13 = vadd.f32 %v875_v6, %v265_v12  ;;  %v319_v14 = vpop.f32.mrf.mxu1 }
  0xa9   :  { %v320_v17 = vadd.f32 %v319_v14, %v266_v13 }
  0xab   :  { %vm363_vm1 = vcmp.gt.f32.partialorder %v320_v17, 0.0  ;;  %v381_v18 = vmul.f32 0.01, %v320_v17 }
  0xac   :  { %v881_v19 = vpop.f32.mrf.mxu2 }
  0xad   :  { %v399_v21 = vsel %vm363_vm1, %v320_v17, %v381_v18  ;;  %v344_v26 = vpop.f32.mrf.mxu3 }
  0xae   :  { %v629_v22 = vpack.c.bf16 %v399_v21, %v398_v20  ;;  %v268_v23 = vpop.f32.mrf.mxu0 }
  0xaf   :  { %v322_v24 = vpop.f32.mrf.mxu1  ;;  %v269_v25 = vadd.f32 %v875_v6, %v268_v23 }
  0xb0   :  { %630 = vst [vmem:[%s931_s3] sm:$0xff] %v629_v22  }
  0xb1   :  { %v323_v28 = vadd.f32 %v322_v24, %v269_v25 }
  0xb3   :  { %v382_v33 = vmul.f32 0.01, %v323_v28  ;;  %vm364_vm2 = vcmp.gt.f32.partialorder %v323_v28, 0.0 }
  0xb4   :  { %v288_v27 = vpop.f32.mrf.mxu2 }
  0xb5   :  { %v289_v30 = vadd.f32 %v875_v6, %v288_v27  ;;  %v347_v38 = vpop.f32.mrf.mxu3  ;;  %v400_v39 = vsel %vm364_vm2, %v323_v28, %v382_v33 }
  0xb6   :  { %v270_v29 = vpop.f32.mrf.mxu0 }
  0xb7   :  { %v271_v31 = vadd.f32 %v875_v6, %v270_v29  ;;  %v324_v32 = vpop.f32.mrf.mxu1  ;;  %v343_v35 = vadd.f32 %v342_v15, %v289_v30 }
  0xb9   :  { %v325_v34 = vadd.f32 %v324_v32, %v271_v31  ;;  %v390_v44 = vmul.f32 0.01, %v343_v35  ;;  %vm372_vm4 = vcmp.gt.f32.partialorder %v343_v35, 0.0 }
  0xbb   :  { %vm365_vm3 = vcmp.gt.f32.partialorder %v325_v34, 0.0  ;;  %v383_v36 = vmul.f32 0.01, %v325_v34  ;;  %v408_v49 = vsel %vm372_vm4, %v343_v35, %v390_v44  ;;  %v286_v44 = vadd.f32 %v875_v6, %v881_v19 }
  0xbc   :  { %v290_v37 = vpop.f32.mrf.mxu2 }
  0xbd   :  { %v401_v40 = vsel %vm365_vm3, %v325_v34, %v383_v36  ;;  %v291_v41 = vadd.f32 %v875_v6, %v290_v37  ;;  %v349_v55 = vpop.f32.mrf.mxu3  ;;  %v284_v37 = vadd.f32 %v875_v6, %v878_v10 }
  0xbe   :  { %v634_v42 = vpack.c.bf16 %v401_v40, %v400_v39  ;;  %v273_v43 = vpop.f32.mrf.mxu0 }
  0xbf   :  { %v345_v45 = vadd.f32 %v344_v26, %v291_v41  ;;  %v327_v46 = vpop.f32.mrf.mxu1  ;;  %v274_v48 = vadd.f32 %v875_v6, %v273_v43 }
  0xc0   :  { %671 = vst [vmem:[%s931_s3 + $0x8] sm:$0xff] %v634_v42  }
  0xc1   :  { %vm373_vm5 = vcmp.gt.f32.partialorder %v345_v45, 0.0  ;;  %v391_v47 = vmul.f32 0.01, %v345_v45  ;;  %v328_v53 = vadd.f32 %v327_v46, %v274_v48 }
  0xc3   :  { %v409_v50 = vsel %vm373_vm5, %v345_v45, %v391_v47  ;;  %v384_v59 = vmul.f32 0.01, %v328_v53  ;;  %vm366_vm6 = vcmp.gt.f32.partialorder %v328_v53, 0.0 }
  0xc4   :  { %v654_v51 = vpack.c.bf16 %v409_v50, %v408_v49  ;;  %v293_v52 = vpop.f32.mrf.mxu2 }
  0xc5   :  { %v294_v56 = vadd.f32 %v875_v6, %v293_v52  ;;  %v402_v0 = vsel %vm366_vm6, %v328_v53, %v384_v59  ;;  %v352_v9 = vpop.f32.mrf.mxu3 }
  0xc6   :  { %675 = vst [vmem:[%s931_s3 + $0x28] sm:$0xff] %v654_v51   ;;  %v275_v54 = vpop.f32.mrf.mxu0 }
  0xc7   :  { %v276_v57 = vadd.f32 %v875_v6, %v275_v54  ;;  %v329_v58 = vpop.f32.mrf.mxu1  ;;  %v348_v61 = vadd.f32 %v347_v38, %v294_v56 }
  0xc9   :  { %v330_v60 = vadd.f32 %v329_v58, %v276_v57  ;;  %v392_v5 = vmul.f32 0.01, %v348_v61  ;;  %vm374_vm8 = vcmp.gt.f32.partialorder %v348_v61, 0.0 }
  0xcb   :  { %vm367_vm7 = vcmp.gt.f32.partialorder %v330_v60, 0.0  ;;  %v385_v62 = vmul.f32 0.01, %v330_v60  ;;  %v410_v13 = vsel %vm374_vm8, %v348_v61, %v392_v5 }
  0xcc   :  { %v295_v63 = vpop.f32.mrf.mxu2 }
  0xcd   :  { %v403_v1 = vsel %vm367_vm7, %v330_v60, %v385_v62  ;;  %v296_v2 = vadd.f32 %v875_v6, %v295_v63  ;;  %v354_v25 = vpop.f32.mrf.mxu3 }
  0xce   :  { %v639_v3 = vpack.c.bf16 %v403_v1, %v402_v0  ;;  %v278_v4 = vpop.f32.mrf.mxu0 }
  0xcf   :  { %v350_v7 = vadd.f32 %v349_v55, %v296_v2  ;;  %v332_v8 = vpop.f32.mrf.mxu1  ;;  %v279_v12 = vadd.f32 %v875_v6, %v278_v4 }
  0xd0   :  { %672 = vst [vmem:[%s931_s3 + $0x10] sm:$0xff] %v639_v3  }
  0xd1   :  { %vm375_vm9 = vcmp.gt.f32.partialorder %v350_v7, 0.0  ;;  %v393_v11 = vmul.f32 0.01, %v350_v7  ;;  %v333_v17 = vadd.f32 %v332_v8, %v279_v12 }
  0xd3   :  { %v411_v14 = vsel %vm375_vm9, %v350_v7, %v393_v11  ;;  %v386_v23 = vmul.f32 0.01, %v333_v17  ;;  %vm368_vm10 = vcmp.gt.f32.partialorder %v333_v17, 0.0 }
  0xd4   :  { %v659_v15 = vpack.c.bf16 %v411_v14, %v410_v13  ;;  %v298_v16 = vpop.f32.mrf.mxu2 }
  0xd5   :  { %v299_v20 = vadd.f32 %v875_v6, %v298_v16  ;;  %v404_v29 = vsel %vm368_vm10, %v333_v17, %v386_v23  ;;  %v357_v42 = vpop.f32.mrf.mxu3 }
  0xd6   :  { %676 = vst [vmem:[%s931_s3 + $0x30] sm:$0xff] %v659_v15   ;;  %v280_v18 = vpop.f32.mrf.mxu0 }
  0xd7   :  { %v281_v21 = vadd.f32 %v875_v6, %v280_v18  ;;  %v334_v22 = vpop.f32.mrf.mxu1  ;;  %v353_v26 = vadd.f32 %v352_v9, %v299_v20 }
  0xd9   :  { %v335_v24 = vadd.f32 %v334_v22, %v281_v21  ;;  %v394_v33 = vmul.f32 0.01, %v353_v26  ;;  %vm376_vm12 = vcmp.gt.f32.partialorder %v353_v26, 0.0 }
  0xdb   :  { %vm369_vm11 = vcmp.gt.f32.partialorder %v335_v24, 0.0  ;;  %v387_v27 = vmul.f32 0.01, %v335_v24  ;;  %v412_v38 = vsel %vm376_vm12, %v353_v26, %v394_v33 }
  0xdc   :  { %v300_v28 = vpop.f32.mrf.mxu2 }
  0xdd   :  { %v405_v30 = vsel %vm369_vm11, %v335_v24, %v387_v27  ;;  %v301_v31 = vadd.f32 %v875_v6, %v300_v28  ;;  %v359_v19 = vpop.f32.mrf.mxu3 }
  0xde   :  { %v644_v32 = vpack.c.bf16 %v405_v30, %v404_v29 }
  0xdf   :  { %v355_v34 = vadd.f32 %v354_v25, %v301_v31  ;;  %v337_v35 = vpop.f32.mrf.mxu1 }
  0xe0   :  { %673 = vst [vmem:[%s931_s3 + $0x18] sm:$0xff] %v644_v32   ;;  %v338_v41 = vadd.f32 %v337_v35, %v284_v37 }
  0xe1   :  { %vm377_vm13 = vcmp.gt.f32.partialorder %v355_v34, 0.0  ;;  %v395_v36 = vmul.f32 0.01, %v355_v34 }
  0xe2   :  { %v388_v47 = vmul.f32 0.01, %v338_v41  ;;  %vm370_vm14 = vcmp.gt.f32.partialorder %v338_v41, 0.0 }
  0xe3   :  { %v413_v39 = vsel %vm377_vm13, %v355_v34, %v395_v36 }
  0xe4   :  { %v664_v40 = vpack.c.bf16 %v413_v39, %v412_v38  ;;  %v303_v43 = vpop.f32.mrf.mxu2  ;;  %v406_v50 = vsel %vm370_vm14, %v338_v41, %v388_v47 }
  0xe5   :  { %v304_v45 = vadd.f32 %v875_v6, %v303_v43 }
  0xe6   :  { %677 = vst [vmem:[%s931_s3 + $0x38] sm:$0xff] %v664_v40  }
  0xe7   :  { %v339_v46 = vpop.f32.mrf.mxu1  ;;  %v358_v49 = vadd.f32 %v357_v42, %v304_v45 }
  0xe8   :  { %v340_v48 = vadd.f32 %v339_v46, %v286_v44 }
  0xe9   :  { %v396_v55 = vmul.f32 0.01, %v358_v49  ;;  %vm378_vm0 = vcmp.gt.f32.partialorder %v358_v49, 0.0 }
  0xea   :  { %vm371_vm15 = vcmp.gt.f32.partialorder %v340_v48, 0.0  ;;  %v389_v10 = vmul.f32 0.01, %v340_v48 }
  0xeb   :  { %v414_v58 = vsel %vm378_vm0, %v358_v49, %v396_v55 }
  0xec   :  { %v407_v51 = vsel %vm371_vm15, %v340_v48, %v389_v10  ;;  %v305_v52 = vpop.f32.mrf.mxu2 }
  0xed   :  { %v649_v53 = vpack.c.bf16 %v407_v51, %v406_v50  ;;  %v306_v54 = vadd.f32 %v875_v6, %v305_v52 }
  0xef   :  { %674 = vst [vmem:[%s931_s3 + $0x20] sm:$0xff] %v649_v53   ;;  %v360_v56 = vadd.f32 %v359_v19, %v306_v54 }
  0xf1   :  { %vm379_vm1 = vcmp.gt.f32.partialorder %v360_v56, 0.0  ;;  %v397_v57 = vmul.f32 0.01, %v360_v56 }
  0xf3   :  { %v415_v59 = vsel %vm379_vm1, %v360_v56, %v397_v57 }
  0xf4   :  { %v669_v60 = vpack.c.bf16 %v415_v59, %v414_v58 }
  0xf6   :  { %678 = vst [vmem:[%s931_s3 + $0x40] sm:$0xff] %v669_v60  }

// kernel: mnist_discriminator_fwd.7
= control target key start
LH: loop header
LB: loop body
LE: loop exit
PB: predicated region body
PF: predicated region fallthrough
CT: control target
= control target key end

     0   :  { %s1809_s1 = inlined_call_operand.vmem [shape: bf16[512,256], index: 1, kind: input, shape index: {}]   ;;  %s1810_s0 = inlined_call_operand.vmem [shape: bf16[64,512], index: 0, kind: input, shape index: {}]   ;;  %s1811_s2 = inlined_call_operand.vmem [shape: f32[1,256], index: 2, kind: input, shape index: {}]   ;;  %s1812_s3 = inlined_call_operand.vmem [shape: bf16[64,256], index: 3, kind: output, shape index: {}]  }
   0x1   :  { %v922_v0 = vld [vmem:[%s1809_s1 + $0x70] sm:$0xf]  ;;  %v1151_v1 = vld [vmem:[%s1809_s1 + $0x74] sm:$0xf0]  ;;  %v914_v11 = vld [vmem:[%s1809_s1 + $0x60] sm:$0xf] }
   0x2   :  { %v986_v2 = vld [vmem:[%s1809_s1 + $0xf0] sm:$0xf]  ;;  %v923_v3 = vor.u32 %v1151_v1, %v922_v0  ;;  %v1167_v4 = vld [vmem:[%s1809_s1 + $0xf4] sm:$0xf0]  ;;  %v1149_v13 = vld [vmem:[%s1809_s1 + $0x64] sm:$0xf0] }
   0x3   :  { %v1050_v5 = vld [vmem:[%s1809_s1 + $0x170] sm:$0xf]  ;;  %v1183_v6 = vld [vmem:[%s1809_s1 + $0x174] sm:$0xf0]  ;;  %v987_v7 = vor.u32 %v1167_v4, %v986_v2  ;;  %v978_v14 = vld [vmem:[%s1809_s1 + $0xe0] sm:$0xf]  ;;  %v915_v16 = vor.u32 %v1149_v13, %v914_v11 }
   0x4   :  { %v1051_v8 = vor.u32 %v1183_v6, %v1050_v5  ;;  %v1114_v9 = vld [vmem:[%s1809_s1 + $0x1f0] sm:$0xf]  ;;  %v1199_v10 = vld [vmem:[%s1809_s1 + $0x1f4] sm:$0xf0]  ;;  %500 = vmatpush.bf16.msra.mxu0 %v923_v3  ;;  %v1165_v15 = vld [vmem:[%s1809_s1 + $0xe4] sm:$0xf0] }
   0x5   :  { %v1115_v12 = vor.u32 %v1199_v10, %v1114_v9  ;;  %529 = vmatpush.bf16.msra.mxu1 %v987_v7  ;;  %v979_v17 = vor.u32 %v1165_v15, %v978_v14  ;;  %v1042_v18 = vld [vmem:[%s1809_s1 + $0x160] sm:$0xf]  ;;  %v1181_v19 = vld [vmem:[%s1809_s1 + $0x164] sm:$0xf0]  ;;  %v906_v23 = vld [vmem:[%s1809_s1 + $0x50] sm:$0xf] }
   0x6   :  { %558 = vmatpush.bf16.msra.mxu2 %v1051_v8  ;;  %v1106_v20 = vld [vmem:[%s1809_s1 + $0x1e0] sm:$0xf]  ;;  %v1043_v21 = vor.u32 %v1181_v19, %v1042_v18  ;;  %v1197_v22 = vld [vmem:[%s1809_s1 + $0x1e4] sm:$0xf0]  ;;  %v1147_v24 = vld [vmem:[%s1809_s1 + $0x54] sm:$0xf0] }
   0x7   :  { %587 = vmatpush.bf16.msra.mxu3 %v1115_v12  ;;  %v1107_v25 = vor.u32 %v1197_v22, %v1106_v20  ;;  %v970_v26 = vld [vmem:[%s1809_s1 + $0xd0] sm:$0xf]  ;;  %v1163_v27 = vld [vmem:[%s1809_s1 + $0xd4] sm:$0xf0]  ;;  %v907_v29 = vor.u32 %v1147_v24, %v906_v23  ;;  %v898_v35 = vld [vmem:[%s1809_s1 + $0x40] sm:$0xf] }
   0x8   :  { %v1034_v28 = vld [vmem:[%s1809_s1 + $0x150] sm:$0xf]  ;;  %501 = vmatpush.bf16.msra.mxu0 %v915_v16  ;;  %v1179_v30 = vld [vmem:[%s1809_s1 + $0x154] sm:$0xf0]  ;;  %v971_v33 = vor.u32 %v1163_v27, %v970_v26  ;;  %v1145_v36 = vld [vmem:[%s1809_s1 + $0x44] sm:$0xf0] }
   0x9   :  { %v1098_v31 = vld [vmem:[%s1809_s1 + $0x1d0] sm:$0xf]  ;;  %v1195_v32 = vld [vmem:[%s1809_s1 + $0x1d4] sm:$0xf0]  ;;  %530 = vmatpush.bf16.msra.mxu1 %v979_v17  ;;  %v1035_v34 = vor.u32 %v1179_v30, %v1034_v28  ;;  %v962_v37 = vld [vmem:[%s1809_s1 + $0xc0] sm:$0xf]  ;;  %v899_v44 = vor.u32 %v1145_v36, %v898_v35 }
   0xa   :  { %559 = vmatpush.bf16.msra.mxu2 %v1043_v21  ;;  %v1099_v38 = vor.u32 %v1195_v32, %v1098_v31  ;;  %v1161_v39 = vld [vmem:[%s1809_s1 + $0xc4] sm:$0xf0]  ;;  %v1026_v40 = vld [vmem:[%s1809_s1 + $0x140] sm:$0xf]  ;;  %v890_v47 = vld [vmem:[%s1809_s1 + $0x30] sm:$0xf] }
   0xb   :  { %588 = vmatpush.bf16.msra.mxu3 %v1107_v25  ;;  %v1177_v41 = vld [vmem:[%s1809_s1 + $0x144] sm:$0xf0]  ;;  %v1090_v42 = vld [vmem:[%s1809_s1 + $0x1c0] sm:$0xf]  ;;  %v963_v45 = vor.u32 %v1161_v39, %v962_v37  ;;  %v1143_v48 = vld [vmem:[%s1809_s1 + $0x34] sm:$0xf0] }
   0xc   :  { %v1193_v43 = vld [vmem:[%s1809_s1 + $0x1c4] sm:$0xf0]  ;;  %502 = vmatpush.bf16.msra.mxu0 %v907_v29  ;;  %v1027_v46 = vor.u32 %v1177_v41, %v1026_v40  ;;  %v954_v49 = vld [vmem:[%s1809_s1 + $0xb0] sm:$0xf]  ;;  %v1159_v51 = vld [vmem:[%s1809_s1 + $0xb4] sm:$0xf0]  ;;  %v891_v56 = vor.u32 %v1143_v48, %v890_v47 }
   0xd   :  { %531 = vmatpush.bf16.msra.mxu1 %v971_v33  ;;  %v1091_v50 = vor.u32 %v1193_v43, %v1090_v42  ;;  %v1018_v52 = vld [vmem:[%s1809_s1 + $0x130] sm:$0xf]  ;;  %v1175_v53 = vld [vmem:[%s1809_s1 + $0x134] sm:$0xf0]  ;;  %v955_v57 = vor.u32 %v1159_v51, %v954_v49  ;;  %v882_v59 = vld [vmem:[%s1809_s1 + $0x20] sm:$0xf] }
   0xe   :  { %560 = vmatpush.bf16.msra.mxu2 %v1035_v34  ;;  %v1082_v54 = vld [vmem:[%s1809_s1 + $0x1b0] sm:$0xf]  ;;  %v1191_v55 = vld [vmem:[%s1809_s1 + $0x1b4] sm:$0xf0]  ;;  %v1019_v58 = vor.u32 %v1175_v53, %v1018_v52  ;;  %v1141_v60 = vld [vmem:[%s1809_s1 + $0x24] sm:$0xf0] }
   0xf   :  { %589 = vmatpush.bf16.msra.mxu3 %v1099_v38  ;;  %v946_v61 = vld [vmem:[%s1809_s1 + $0xa0] sm:$0xf]  ;;  %v1083_v62 = vor.u32 %v1191_v55, %v1082_v54  ;;  %v1157_v63 = vld [vmem:[%s1809_s1 + $0xa4] sm:$0xf0]  ;;  %v883_v4 = vor.u32 %v1141_v60, %v882_v59  ;;  %v874_v7 = vld [vmem:[%s1809_s1 + $0x10] sm:$0xf] }
  0x10   :  { %503 = vmatpush.bf16.msra.mxu0 %v899_v44  ;;  %v1010_v0 = vld [vmem:[%s1809_s1 + $0x120] sm:$0xf]  ;;  %v1173_v1 = vld [vmem:[%s1809_s1 + $0x124] sm:$0xf0]  ;;  %v947_v5 = vor.u32 %v1157_v63, %v946_v61  ;;  %v1139_v8 = vld [vmem:[%s1809_s1 + $0x14] sm:$0xf0] }
  0x11   :  { %532 = vmatpush.bf16.msra.mxu1 %v963_v45  ;;  %v1074_v2 = vld [vmem:[%s1809_s1 + $0x1a0] sm:$0xf]  ;;  %v1189_v3 = vld [vmem:[%s1809_s1 + $0x1a4] sm:$0xf0]  ;;  %v1011_v6 = vor.u32 %v1173_v1, %v1010_v0  ;;  %v938_v9 = vld [vmem:[%s1809_s1 + $0x90] sm:$0xf]  ;;  %v875_v17 = vor.u32 %v1139_v8, %v874_v7 }
  0x12   :  { %561 = vmatpush.bf16.msra.mxu2 %v1027_v46  ;;  %v1075_v10 = vor.u32 %v1189_v3, %v1074_v2  ;;  %v1155_v11 = vld [vmem:[%s1809_s1 + $0x94] sm:$0xf0]  ;;  %v1002_v12 = vld [vmem:[%s1809_s1 + $0x110] sm:$0xf]  ;;  %v866_v16 = vld [vmem:[%s1809_s1] sm:$0xf] }
  0x13   :  { %590 = vmatpush.bf16.msra.mxu3 %v1091_v50  ;;  %v1171_v13 = vld [vmem:[%s1809_s1 + $0x114] sm:$0xf0]  ;;  %v1066_v14 = vld [vmem:[%s1809_s1 + $0x190] sm:$0xf]  ;;  %v1137_v18 = vld [vmem:[%s1809_s1 + $0x4] sm:$0xf0]  ;;  %v939_v21 = vor.u32 %v1155_v11, %v938_v9 }
  0x14   :  { %504 = vmatpush.bf16.msra.mxu0 %v891_v56  ;;  %v1187_v15 = vld [vmem:[%s1809_s1 + $0x194] sm:$0xf0]  ;;  %v930_v19 = vld [vmem:[%s1809_s1 + $0x80] sm:$0xf]  ;;  %v1153_v20 = vld [vmem:[%s1809_s1 + $0x84] sm:$0xf0]  ;;  %v1003_v22 = vor.u32 %v1171_v13, %v1002_v12  ;;  %v867_v34 = vor.u32 %v1137_v18, %v866_v16 }
  0x15   :  { %533 = vmatpush.bf16.msra.mxu1 %v955_v57  ;;  %v994_v23 = vld [vmem:[%s1809_s1 + $0x100] sm:$0xf]  ;;  %v1169_v24 = vld [vmem:[%s1809_s1 + $0x104] sm:$0xf0]  ;;  %v1067_v26 = vor.u32 %v1187_v15, %v1066_v14  ;;  %v1122_v29 = vld [vmem:[%s1810_s0 + $0xc] sm:$0xf0]  ;;  %v931_v38 = vor.u32 %v1153_v20, %v930_v19 }
  0x16   :  { %562 = vmatpush.bf16.msra.mxu2 %v1019_v58  ;;  %v1058_v25 = vld [vmem:[%s1809_s1 + $0x180] sm:$0xf]  ;;  %v1185_v27 = vld [vmem:[%s1809_s1 + $0x184] sm:$0xf0]  ;;  %v1120_v30 = vld [vmem:[%s1810_s0 + $0x4] sm:$0xf]  ;;  %v995_v39 = vor.u32 %v1169_v24, %v994_v23 }
  0x17   :  { %591 = vmatpush.bf16.msra.mxu3 %v1083_v62  ;;  %v802_v28 = vld [vmem:[%s1810_s0] sm:$0xf]  ;;  %v804_v31 = vld [vmem:[%s1810_s0 + $0x10] sm:$0xf0]  ;;  %v1052_v33 = vld [vmem:[%s1809_s1 + $0x178] sm:$0xf0]  ;;  %v1059_v43 = vor.u32 %v1185_v27, %v1058_v25 }
  0x18   :  { %505 = vmatpush.bf16.msra.mxu0 %v883_v4  ;;  %v1182_v32 = vld [vmem:[%s1809_s1 + $0x174] sm:$0xf]  ;;  %v810_v35 = vld [vmem:[%s1810_s0 + $0x8] sm:$0xf]  ;;  %v1116_v37 = vld [vmem:[%s1809_s1 + $0x1f8] sm:$0xf0]  ;;  %v1457_v48 = vor.u32 %v1122_v29, %v802_v28  ;;  %v1468_v53 = vor.u32 %v1120_v30, %v804_v31 }
  0x19   :  { %534 = vmatpush.bf16.msra.mxu1 %v947_v5  ;;  %v1198_v36 = vld [vmem:[%s1809_s1 + $0x1f4] sm:$0xf]  ;;  %v1123_v40 = vld [vmem:[%s1810_s0 + $0x14] sm:$0xf0]  ;;  %v1121_v41 = vld [vmem:[%s1810_s0 + $0xc] sm:$0xf]  ;;  %v1055_v44 = vor.u32 %v1182_v32, %v1052_v33 }
  0x1a   :  { %563 = vmatpush.bf16.msra.mxu2 %v1011_v6  ;;  %v812_v42 = vld [vmem:[%s1810_s0 + $0x18] sm:$0xf0]  ;;  %v1150_v45 = vld [vmem:[%s1809_s1 + $0x74] sm:$0xf]  ;;  %v1119_v49 = vor.u32 %v1198_v36, %v1116_v37  ;;  %v1180_v51 = vld [vmem:[%s1809_s1 + $0x164] sm:$0xf]  ;;  %v1470_v54 = vor.u32 %v1123_v40, %v810_v35 }
  0x1b   :  { %592 = vmatpush.bf16.msra.mxu3 %v1075_v10  ;;  %v924_v46 = vld [vmem:[%s1809_s1 + $0x78] sm:$0xf0]  ;;  %v1166_v47 = vld [vmem:[%s1809_s1 + $0xf4] sm:$0xf]  ;;  %v1044_v52 = vld [vmem:[%s1809_s1 + $0x168] sm:$0xf0]  ;;  %v1478_v57 = vor.u32 %v1121_v41, %v812_v42 }
  0x1c   :  { %506 = vmatpush.bf16.msra.mxu0 %v875_v17  ;;  %v988_v50 = vld [vmem:[%s1809_s1 + $0xf8] sm:$0xf0]  ;;  %v1196_v55 = vld [vmem:[%s1809_s1 + $0x1e4] sm:$0xf]  ;;  %v1108_v56 = vld [vmem:[%s1809_s1 + $0x1e8] sm:$0xf0]  ;;  %v927_v58 = vor.u32 %v1150_v45, %v924_v46  ;;  %v1047_v60 = vor.u32 %v1180_v51, %v1044_v52 }
  0x1d   :  { %535 = vmatpush.bf16.msra.mxu1 %v939_v21  ;;  %v991_v59 = vor.u32 %v1166_v47, %v988_v50  ;;  %v1148_v61 = vld [vmem:[%s1809_s1 + $0x64] sm:$0xf]  ;;  %v916_v62 = vld [vmem:[%s1809_s1 + $0x68] sm:$0xf0]  ;;  %v1111_v0 = vor.u32 %v1196_v55, %v1108_v56  ;;  %v1178_v2 = vld [vmem:[%s1809_s1 + $0x154] sm:$0xf] }
  0x1e   :  { %564 = vmatpush.bf16.msra.mxu2 %v1003_v22  ;;  %v1164_v63 = vld [vmem:[%s1809_s1 + $0xe4] sm:$0xf]  ;;  %v980_v1 = vld [vmem:[%s1809_s1 + $0xe8] sm:$0xf0]  ;;  %v1036_v3 = vld [vmem:[%s1809_s1 + $0x158] sm:$0xf0]  ;;  %v919_v6 = vor.u32 %v1148_v61, %v916_v62 }
  0x1f   :  { %593 = vmatpush.bf16.msra.mxu3 %v1067_v26  ;;  %v1194_v4 = vld [vmem:[%s1809_s1 + $0x1d4] sm:$0xf]  ;;  %v1100_v5 = vld [vmem:[%s1809_s1 + $0x1d8] sm:$0xf0]  ;;  %v983_v7 = vor.u32 %v1164_v63, %v980_v1  ;;  %v1039_v8 = vor.u32 %v1178_v2, %v1036_v3  ;;  %v1176_v14 = vld [vmem:[%s1809_s1 + $0x144] sm:$0xf] }
  0x20   :  { %507 = vmatpush.bf16.msra.mxu0 %v867_v34  ;;  %v1146_v9 = vld [vmem:[%s1809_s1 + $0x54] sm:$0xf]  ;;  %v908_v10 = vld [vmem:[%s1809_s1 + $0x58] sm:$0xf0]  ;;  %v1103_v12 = vor.u32 %v1194_v4, %v1100_v5  ;;  %v1028_v15 = vld [vmem:[%s1809_s1 + $0x148] sm:$0xf0] }
  0x21   :  { %536 = vmatpush.bf16.msra.mxu1 %v931_v38  ;;  %v1162_v11 = vld [vmem:[%s1809_s1 + $0xd4] sm:$0xf]  ;;  %v972_v13 = vld [vmem:[%s1809_s1 + $0xd8] sm:$0xf0]  ;;  %v1192_v16 = vld [vmem:[%s1809_s1 + $0x1c4] sm:$0xf]  ;;  %v911_v18 = vor.u32 %v1146_v9, %v908_v10  ;;  %v1031_v22 = vor.u32 %v1176_v14, %v1028_v15 }
  0x22   :  { %565 = vmatpush.bf16.msra.mxu2 %v995_v39  ;;  %v1092_v17 = vld [vmem:[%s1809_s1 + $0x1c8] sm:$0xf0]  ;;  %v818_v19 = vld [vmem:[%s1810_s0 + $0x20] sm:$0xf]  ;;  %v1126_v20 = vld [vmem:[%s1810_s0 + $0x2c] sm:$0xf0]  ;;  %v975_v21 = vor.u32 %v1162_v11, %v972_v13 }
  0x23   :  { %594 = vmatpush.bf16.msra.mxu3 %v1059_v43  ;;  %508 = vmatmul.bf16.vlgmr.msra.gmra.mxu0 %v1457_v48  ;;  %v1144_v23 = vld [vmem:[%s1809_s1 + $0x44] sm:$0xf]  ;;  %v900_v24 = vld [vmem:[%s1809_s1 + $0x48] sm:$0xf0]  ;;  %v820_v27 = vld [vmem:[%s1810_s0 + $0x30] sm:$0xf0]  ;;  %v1095_v28 = vor.u32 %v1192_v16, %v1092_v17 }
  0x24   :  { %537 = vmatmul.bf16.vlgmr.msra.gmra.mxu1 %v1468_v53  ;;  %616 = vmatpush.bf16.msrb.mxu0 %v927_v58  ;;  %v1160_v25 = vld [vmem:[%s1809_s1 + $0xc4] sm:$0xf]  ;;  %v964_v29 = vld [vmem:[%s1809_s1 + $0xc8] sm:$0xf0]  ;;  %v1174_v30 = vld [vmem:[%s1809_s1 + $0x134] sm:$0xf]  ;;  %v903_v38 = vor.u32 %v1144_v23, %v900_v24 }
  0x25   :  { %566 = vmatmul.bf16.vlgmr.msra.gmra.mxu2 %v1470_v54  ;;  %645 = vmatpush.bf16.msrb.mxu1 %v991_v59  ;;  %v1124_v26 = vld [vmem:[%s1810_s0 + $0x24] sm:$0xf]  ;;  %v1020_v31 = vld [vmem:[%s1809_s1 + $0x138] sm:$0xf0]  ;;  %v826_v32 = vld [vmem:[%s1810_s0 + $0x28] sm:$0xf]  ;;  %v967_v39 = vor.u32 %v1160_v25, %v964_v29 }
  0x26   :  { %674 = vmatpush.bf16.msrb.mxu2 %v1055_v44  ;;  %595 = vmatmul.bf16.vlgmr.msra.gmra.mxu3 %v1478_v57  ;;  %v1190_v33 = vld [vmem:[%s1809_s1 + $0x1b4] sm:$0xf]  ;;  %v1084_v34 = vld [vmem:[%s1809_s1 + $0x1b8] sm:$0xf0]  ;;  %v1127_v35 = vld [vmem:[%s1810_s0 + $0x34] sm:$0xf0]  ;;  %v1023_v40 = vor.u32 %v1174_v30, %v1020_v31  ;;  %v1589_v44 = vor.u32 %v1126_v20, %v818_v19  ;;  %v1600_v50 = vor.u32 %v1124_v26, %v820_v27 }
  0x27   :  { %703 = vmatpush.bf16.msrb.mxu3 %v1119_v49  ;;  %v1125_v36 = vld [vmem:[%s1810_s0 + $0x2c] sm:$0xf]  ;;  %v828_v37 = vld [vmem:[%s1810_s0 + $0x38] sm:$0xf0]  ;;  %v1142_v41 = vld [vmem:[%s1809_s1 + $0x34] sm:$0xf]  ;;  %v1087_v45 = vor.u32 %v1190_v33, %v1084_v34  ;;  %v1602_v51 = vor.u32 %v1127_v35, %v826_v32 }
  0x28   :  { %617 = vmatpush.bf16.msrb.mxu0 %v919_v6  ;;  %v892_v42 = vld [vmem:[%s1809_s1 + $0x38] sm:$0xf0]  ;;  %v1158_v43 = vld [vmem:[%s1809_s1 + $0xb4] sm:$0xf]  ;;  %v1172_v47 = vld [vmem:[%s1809_s1 + $0x124] sm:$0xf]  ;;  %v1610_v56 = vor.u32 %v1125_v36, %v828_v37 }
  0x29   :  { %646 = vmatpush.bf16.msrb.mxu1 %v983_v7  ;;  %v956_v46 = vld [vmem:[%s1809_s1 + $0xb8] sm:$0xf0]  ;;  %v1012_v49 = vld [vmem:[%s1809_s1 + $0x128] sm:$0xf0]  ;;  %v1188_v52 = vld [vmem:[%s1809_s1 + $0x1a4] sm:$0xf]  ;;  %v895_v58 = vor.u32 %v1142_v41, %v892_v42 }
  0x2a   :  { %675 = vmatpush.bf16.msrb.mxu2 %v1047_v60  ;;  %v1076_v55 = vld [vmem:[%s1809_s1 + $0x1a8] sm:$0xf0]  ;;  %v959_v59 = vor.u32 %v1158_v43, %v956_v46  ;;  %v1015_v60 = vor.u32 %v1172_v47, %v1012_v49  ;;  %v1140_v61 = vld [vmem:[%s1809_s1 + $0x24] sm:$0xf]  ;;  %v1170_v3 = vld [vmem:[%s1809_s1 + $0x114] sm:$0xf] }
  0x2b   :  { %704 = vmatpush.bf16.msrb.mxu3 %v1111_v0  ;;  %v884_v62 = vld [vmem:[%s1809_s1 + $0x28] sm:$0xf0]  ;;  %v1079_v63 = vor.u32 %v1188_v52, %v1076_v55  ;;  %v1156_v0 = vld [vmem:[%s1809_s1 + $0xa4] sm:$0xf]  ;;  %v1004_v4 = vld [vmem:[%s1809_s1 + $0x118] sm:$0xf0] }
  0x2c   :  { %618 = vmatpush.bf16.msrb.mxu0 %v911_v18  ;;  %v948_v1 = vld [vmem:[%s1809_s1 + $0xa8] sm:$0xf0]  ;;  %v887_v2 = vor.u32 %v1140_v61, %v884_v62  ;;  %v1138_v5 = vld [vmem:[%s1809_s1 + $0x14] sm:$0xf]  ;;  %v1007_v7 = vor.u32 %v1170_v3, %v1004_v4  ;;  %v1068_v10 = vld [vmem:[%s1809_s1 + $0x198] sm:$0xf0] }
  0x2d   :  { %647 = vmatpush.bf16.msrb.mxu1 %v975_v21  ;;  %v951_v6 = vor.u32 %v1156_v0, %v948_v1  ;;  %v1186_v9 = vld [vmem:[%s1809_s1 + $0x194] sm:$0xf]  ;;  %v940_v13 = vld [vmem:[%s1809_s1 + $0x98] sm:$0xf0]  ;;  %v1168_v14 = vld [vmem:[%s1809_s1 + $0x104] sm:$0xf] }
  0x2e   :  { %676 = vmatpush.bf16.msrb.mxu2 %v1039_v8  ;;  %v876_v8 = vld [vmem:[%s1809_s1 + $0x18] sm:$0xf0]  ;;  %v1071_v11 = vor.u32 %v1186_v9, %v1068_v10  ;;  %v996_v15 = vld [vmem:[%s1809_s1 + $0x108] sm:$0xf0]  ;;  %v1184_v17 = vld [vmem:[%s1809_s1 + $0x184] sm:$0xf] }
  0x2f   :  { %705 = vmatpush.bf16.msrb.mxu3 %v1103_v12  ;;  %v1154_v12 = vld [vmem:[%s1809_s1 + $0x94] sm:$0xf]  ;;  %v879_v16 = vor.u32 %v1138_v5, %v876_v8  ;;  %v1060_v18 = vld [vmem:[%s1809_s1 + $0x188] sm:$0xf0]  ;;  %v999_v20 = vor.u32 %v1168_v14, %v996_v15  ;;  %v1136_v21 = vld [vmem:[%s1809_s1 + $0x4] sm:$0xf] }
  0x30   :  { %619 = vmatpush.bf16.msrb.mxu0 %v903_v38  ;;  %v943_v19 = vor.u32 %v1154_v12, %v940_v13  ;;  %v1063_v23 = vor.u32 %v1184_v17, %v1060_v18  ;;  %v1152_v24 = vld [vmem:[%s1809_s1 + $0x84] sm:$0xf]  ;;  %v932_v25 = vld [vmem:[%s1809_s1 + $0x88] sm:$0xf0]  ;;  %v834_v26 = vld [vmem:[%s1810_s0 + $0x40] sm:$0xf] }
  0x31   :  { %648 = vmatpush.bf16.msrb.mxu1 %v967_v39  ;;  %v1130_v27 = vld [vmem:[%s1810_s0 + $0x4c] sm:$0xf0]  ;;  %v836_v29 = vld [vmem:[%s1810_s0 + $0x50] sm:$0xf0]  ;;  %v842_v30 = vld [vmem:[%s1810_s0 + $0x48] sm:$0xf]  ;;  %v935_v35 = vor.u32 %v1152_v24, %v932_v25 }
  0x32   :  { %677 = vmatpush.bf16.msrb.mxu2 %v1031_v22  ;;  %v868_v22 = vld [vmem:[%s1809_s1 + $0x8] sm:$0xf0]  ;;  %v1131_v31 = vld [vmem:[%s1810_s0 + $0x54] sm:$0xf0]  ;;  %v844_v34 = vld [vmem:[%s1810_s0 + $0x58] sm:$0xf0]  ;;  %v835_v36 = vor.u32 %v1130_v27, %v834_v26 }
  0x33   :  { %706 = vmatpush.bf16.msrb.mxu3 %v1095_v28  ;;  %513 = vmatmul.bf16.gmra.mxu0 %v1589_v44  ;;  %v1128_v28 = vld [vmem:[%s1810_s0 + $0x44] sm:$0xf]  ;;  %v871_v32 = vor.u32 %v1136_v21, %v868_v22  ;;  %v1129_v33 = vld [vmem:[%s1810_s0 + $0x4c] sm:$0xf]  ;;  %v843_v38 = vor.u32 %v1131_v31, %v842_v30  ;;  %v1134_v41 = vld [vmem:[%s1810_s0 + $0x6c] sm:$0xf0] }
  0x34   :  { %542 = vmatmul.bf16.gmra.mxu1 %v1600_v50  ;;  %620 = vmatpush.bf16.msrb.mxu0 %v895_v58  ;;  %v839_v37 = vor.u32 %v1128_v28, %v836_v29  ;;  %v847_v39 = vor.u32 %v1129_v33, %v844_v34  ;;  %v1132_v42 = vld [vmem:[%s1810_s0 + $0x64] sm:$0xf]  ;;  %v852_v43 = vld [vmem:[%s1810_s0 + $0x70] sm:$0xf0]  ;;  %v1135_v46 = vld [vmem:[%s1810_s0 + $0x74] sm:$0xf0] }
  0x35   :  { %571 = vmatmul.bf16.gmra.mxu2 %v1602_v51  ;;  %649 = vmatpush.bf16.msrb.mxu1 %v959_v59  ;;  %v1133_v47 = vld [vmem:[%s1810_s0 + $0x6c] sm:$0xf]  ;;  %v860_v49 = vld [vmem:[%s1810_s0 + $0x78] sm:$0xf0]  ;;  %v855_v55 = vor.u32 %v1132_v42, %v852_v43 }
  0x36   :  { %678 = vmatpush.bf16.msrb.mxu2 %v1023_v40  ;;  %600 = vmatmul.bf16.gmra.mxu3 %v1610_v56  ;;  %v850_v40 = vld [vmem:[%s1810_s0 + $0x60] sm:$0xf]  ;;  %v863_v59 = vor.u32 %v1133_v47, %v860_v49 }
  0x37   :  { %707 = vmatpush.bf16.msrb.mxu3 %v1087_v45  ;;  %v858_v45 = vld [vmem:[%s1810_s0 + $0x68] sm:$0xf]  ;;  %v851_v52 = vor.u32 %v1134_v41, %v850_v40 }
  0x38   :  { %621 = vmatpush.bf16.msrb.mxu0 %v887_v2  ;;  %v859_v58 = vor.u32 %v1135_v46, %v858_v45 }
  0x39   :  { %650 = vmatpush.bf16.msrb.mxu1 %v951_v6 }
  0x3a   :  { %679 = vmatpush.bf16.msrb.mxu2 %v1015_v60 }
  0x3b   :  { %708 = vmatpush.bf16.msrb.mxu3 %v1079_v63 }
  0x3c   :  { %622 = vmatpush.bf16.msrb.mxu0 %v879_v16 }
  0x3d   :  { %651 = vmatpush.bf16.msrb.mxu1 %v943_v19 }
  0x3e   :  { %680 = vmatpush.bf16.msrb.mxu2 %v1007_v7 }
  0x3f   :  { %709 = vmatpush.bf16.msrb.mxu3 %v1071_v11 }
  0x40   :  { %623 = vmatpush.bf16.msrb.mxu0 %v871_v32 }
  0x41   :  { %652 = vmatpush.bf16.msrb.mxu1 %v935_v35 }
  0x42   :  { %681 = vmatpush.bf16.msrb.mxu2 %v999_v20 }
  0x43   :  { %710 = vmatpush.bf16.msrb.mxu3 %v1063_v23  ;;  %518 = vmatmul.bf16.gmra.mxu0 %v835_v36 }
  0x44   :  { %547 = vmatmul.bf16.gmra.mxu1 %v839_v37 }
  0x45   :  { %576 = vmatmul.bf16.gmra.mxu2 %v843_v38 }
  0x46   :  { %605 = vmatmul.bf16.gmra.mxu3 %v847_v39 }
  0x53   :  { %523 = vmatmul.bf16.gmra.mxu0 %v851_v52 }
  0x54   :  { %552 = vmatmul.bf16.gmra.mxu1 %v855_v55 }
  0x55   :  { %581 = vmatmul.bf16.gmra.mxu2 %v859_v58 }
  0x56   :  { %610 = vmatmul.bf16.gmra.mxu3 %v863_v59 }
  0x63   :  { %624 = vmatmul.bf16.vlgmr.msrb.gmra.mxu0 %v1457_v48  ;;  %v94_v48 = vld [vmem:[%s1811_s2] sm:$0x3] }
  0x64   :  { %653 = vmatmul.bf16.vlgmr.msrb.gmra.mxu1 %v1468_v53  ;;  %v96_v53 = vperm.slane %v94_v48, 0 }
  0x65   :  { %682 = vmatmul.bf16.vlgmr.msrb.gmra.mxu2 %v1470_v54 }
  0x66   :  { %711 = vmatmul.bf16.vlgmr.msrb.gmra.mxu3 %v1478_v57 }
  0x73   :  { %629 = vmatmul.bf16.gmra.mxu0 %v1589_v44 }
  0x74   :  { %658 = vmatmul.bf16.gmra.mxu1 %v1600_v50 }
  0x75   :  { %687 = vmatmul.bf16.gmra.mxu2 %v1602_v51 }
  0x76   :  { %716 = vmatmul.bf16.gmra.mxu3 %v1610_v56 }
  0x83   :  { %634 = vmatmul.bf16.gmra.mxu0 %v835_v36 }
  0x84   :  { %663 = vmatmul.bf16.gmra.mxu1 %v839_v37 }
  0x85   :  { %692 = vmatmul.bf16.gmra.mxu2 %v843_v38 }
  0x86   :  { %721 = vmatmul.bf16.gmra.mxu3 %v847_v39 }
  0x93   :  { %639 = vmatmul.bf16.gmra.mxu0 %v851_v52 }
  0x94   :  { %668 = vmatmul.bf16.gmra.mxu1 %v855_v55 }
  0x95   :  { %697 = vmatmul.bf16.gmra.mxu2 %v859_v58  ;;  %v1749_v58 = vperm.slane %v94_v48, 1 }
  0x96   :  { %726 = vmatmul.bf16.gmra.mxu3 %v863_v59 }
  0xa0   :  { %v509_v54 = vpop.f32.mrf.mxu0 }
  0xa1   :  { %v510_v57 = vadd.f32 %v509_v54, %v96_v53  ;;  %v538_v44 = vpop.f32.mrf.mxu1 }
  0xa3   :  { %v539_v50 = vadd.f32 %v538_v44, %v510_v57 }
  0xa8   :  { %v567_v51 = vpop.f32.mrf.mxu2  ;;  %v511_v61 = vpop.f32.mrf.mxu0 }
  0xa9   :  { %v568_v60 = vadd.f32 %v567_v51, %v539_v50  ;;  %v596_v56 = vpop.f32.mrf.mxu3  ;;  %v512_v62 = vadd.f32 %v511_v61, %v96_v53  ;;  %v540_v63 = vpop.f32.mrf.mxu1 }
  0xab   :  { %v1735_v0 = vadd.f32 %v596_v56, %v568_v60  ;;  %v541_v1 = vadd.f32 %v540_v63, %v512_v62 }
  0xad   :  { %vm732_vm0 = vcmp.gt.f32.partialorder %v1735_v0, 0.0 }
  0xb0   :  { %v569_v2 = vpop.f32.mrf.mxu2  ;;  %v514_v5 = vpop.f32.mrf.mxu0 }
  0xb1   :  { %v570_v3 = vadd.f32 %v569_v2, %v541_v1  ;;  %v598_v4 = vpop.f32.mrf.mxu3  ;;  %v515_v6 = vadd.f32 %v514_v5, %v96_v53  ;;  %v543_v7 = vpop.f32.mrf.mxu1  ;;  %v748_v2 = vmul.f32 0.01, %v1735_v0 }
  0xb3   :  { %v1737_v8 = vadd.f32 %v598_v4, %v570_v3  ;;  %v544_v9 = vadd.f32 %v543_v7, %v515_v6  ;;  %v764_v5 = vsel %vm732_vm0, %v1735_v0, %v748_v2 }
  0xb5   :  { %vm734_vm2 = vcmp.gt.f32.partialorder %v1737_v8, 0.0 }
  0xb8   :  { %v572_v10 = vpop.f32.mrf.mxu2  ;;  %v516_v13 = vpop.f32.mrf.mxu0 }
  0xb9   :  { %v573_v11 = vadd.f32 %v572_v10, %v544_v9  ;;  %v601_v12 = vpop.f32.mrf.mxu3  ;;  %v517_v14 = vadd.f32 %v516_v13, %v96_v53  ;;  %v545_v15 = vpop.f32.mrf.mxu1 }
  0xbb   :  { %v1739_v16 = vadd.f32 %v601_v12, %v573_v11  ;;  %v546_v17 = vadd.f32 %v545_v15, %v517_v14 }
  0xbd   :  { %vm736_vm4 = vcmp.gt.f32.partialorder %v1739_v16, 0.0 }
  0xc0   :  { %v574_v18 = vpop.f32.mrf.mxu2  ;;  %v519_v21 = vpop.f32.mrf.mxu0 }
  0xc1   :  { %v575_v19 = vadd.f32 %v574_v18, %v546_v17  ;;  %v603_v20 = vpop.f32.mrf.mxu3  ;;  %v520_v22 = vadd.f32 %v519_v21, %v96_v53  ;;  %v548_v23 = vpop.f32.mrf.mxu1  ;;  %v750_v17 = vmul.f32 0.01, %v1737_v8 }
  0xc3   :  { %v1741_v24 = vadd.f32 %v603_v20, %v575_v19  ;;  %v549_v25 = vadd.f32 %v548_v23, %v520_v22  ;;  %v766_v20 = vsel %vm734_vm2, %v1737_v8, %v750_v17 }
  0xc5   :  { %vm738_vm6 = vcmp.gt.f32.partialorder %v1741_v24, 0.0 }
  0xc8   :  { %v577_v26 = vpop.f32.mrf.mxu2  ;;  %v521_v29 = vpop.f32.mrf.mxu0 }
  0xc9   :  { %v578_v27 = vadd.f32 %v577_v26, %v549_v25  ;;  %v606_v28 = vpop.f32.mrf.mxu3  ;;  %v522_v30 = vadd.f32 %v521_v29, %v96_v53  ;;  %v550_v31 = vpop.f32.mrf.mxu1  ;;  %v752_v29 = vmul.f32 0.01, %v1739_v16 }
  0xcb   :  { %v1743_v32 = vadd.f32 %v606_v28, %v578_v27  ;;  %v551_v33 = vadd.f32 %v550_v31, %v522_v30 }
  0xcd   :  { %vm740_vm8 = vcmp.gt.f32.partialorder %v1743_v32, 0.0 }
  0xd0   :  { %v579_v34 = vpop.f32.mrf.mxu2  ;;  %v524_v37 = vpop.f32.mrf.mxu0 }
  0xd1   :  { %v580_v35 = vadd.f32 %v579_v34, %v551_v33  ;;  %v608_v36 = vpop.f32.mrf.mxu3  ;;  %v525_v38 = vadd.f32 %v524_v37, %v96_v53  ;;  %v553_v39 = vpop.f32.mrf.mxu1  ;;  %v768_v33 = vsel %vm736_vm4, %v1739_v16, %v752_v29 }
  0xd3   :  { %v1745_v40 = vadd.f32 %v608_v36, %v580_v35  ;;  %v554_v41 = vadd.f32 %v553_v39, %v525_v38 }
  0xd5   :  { %vm742_vm10 = vcmp.gt.f32.partialorder %v1745_v40, 0.0 }
  0xd8   :  { %v582_v42 = vpop.f32.mrf.mxu2  ;;  %v526_v46 = vpop.f32.mrf.mxu0 }
  0xd9   :  { %v583_v43 = vadd.f32 %v582_v42, %v554_v41  ;;  %v611_v45 = vpop.f32.mrf.mxu3  ;;  %v527_v47 = vadd.f32 %v526_v46, %v96_v53  ;;  %v555_v49 = vpop.f32.mrf.mxu1 }
  0xdb   :  { %v1747_v52 = vadd.f32 %v611_v45, %v583_v43  ;;  %v556_v55 = vadd.f32 %v555_v49, %v527_v47  ;;  %v754_v45 = vmul.f32 0.01, %v1741_v24 }
  0xdd   :  { %v770_v49 = vsel %vm738_vm6, %v1741_v24, %v754_v45  ;;  %vm744_vm12 = vcmp.gt.f32.partialorder %v1747_v52, 0.0 }
  0xe0   :  { %v584_v59 = vpop.f32.mrf.mxu2  ;;  %v625_v44 = vpop.f32.mrf.mxu0 }
  0xe1   :  { %v585_v54 = vadd.f32 %v584_v59, %v556_v55  ;;  %v613_v57 = vpop.f32.mrf.mxu3  ;;  %v626_v50 = vadd.f32 %v625_v44, %v1749_v58  ;;  %v654_v51 = vpop.f32.mrf.mxu1 }
  0xe3   :  { %v1752_v60 = vadd.f32 %v613_v57, %v585_v54  ;;  %v655_v56 = vadd.f32 %v654_v51, %v626_v50 }
  0xe5   :  { %vm746_vm14 = vcmp.gt.f32.partialorder %v1752_v60, 0.0 }
  0xe8   :  { %v683_v61 = vpop.f32.mrf.mxu2  ;;  %v627_v53 = vpop.f32.mrf.mxu0 }
  0xe9   :  { %v684_v62 = vadd.f32 %v683_v61, %v655_v56  ;;  %v712_v63 = vpop.f32.mrf.mxu3  ;;  %v656_v1 = vpop.f32.mrf.mxu1  ;;  %v628_v48 = vadd.f32 %v627_v53, %v1749_v58  ;;  %v756_v56 = vmul.f32 0.01, %v1743_v32 }
  0xeb   :  { %v713_v3 = vadd.f32 %v712_v63, %v684_v62  ;;  %v657_v7 = vadd.f32 %v656_v1, %v628_v48  ;;  %v772_v63 = vsel %vm740_vm8, %v1743_v32, %v756_v56 }
  0xed   :  { %vm733_vm1 = vcmp.gt.f32.partialorder %v713_v3, 0.0  ;;  %v749_v4 = vmul.f32 0.01, %v713_v3 }
  0xef   :  { %v765_v6 = vsel %vm733_vm1, %v713_v3, %v749_v4 }
  0xf0   :  { %v780_v9 = vpack.c.bf16 %v765_v6, %v764_v5  ;;  %v685_v10 = vpop.f32.mrf.mxu2  ;;  %v630_v13 = vpop.f32.mrf.mxu0 }
  0xf1   :  { %v686_v11 = vadd.f32 %v685_v10, %v657_v7  ;;  %v714_v12 = vpop.f32.mrf.mxu3  ;;  %v631_v14 = vadd.f32 %v630_v13, %v1749_v58  ;;  %v659_v15 = vpop.f32.mrf.mxu1  ;;  %v758_v7 = vmul.f32 0.01, %v1745_v40 }
  0xf2   :  { %788 = vst [vmem:[%s1812_s3] sm:$0xff] %v780_v9 }
  0xf3   :  { %v715_v18 = vadd.f32 %v714_v12, %v686_v11  ;;  %v660_v19 = vadd.f32 %v659_v15, %v631_v14  ;;  %v774_v12 = vsel %vm742_vm10, %v1745_v40, %v758_v7 }
  0xf5   :  { %vm735_vm3 = vcmp.gt.f32.partialorder %v715_v18, 0.0  ;;  %v751_v0 = vmul.f32 0.01, %v715_v18 }
  0xf7   :  { %v767_v21 = vsel %vm735_vm3, %v715_v18, %v751_v0 }
  0xf8   :  { %v781_v22 = vpack.c.bf16 %v767_v21, %v766_v20  ;;  %v688_v23 = vpop.f32.mrf.mxu2  ;;  %v632_v27 = vpop.f32.mrf.mxu0 }
  0xf9   :  { %v689_v25 = vadd.f32 %v688_v23, %v660_v19  ;;  %v717_v26 = vpop.f32.mrf.mxu3  ;;  %v661_v28 = vpop.f32.mrf.mxu1  ;;  %v633_v31 = vadd.f32 %v632_v27, %v1749_v58  ;;  %v760_v19 = vmul.f32 0.01, %v1747_v52 }
  0xfa   :  { %789 = vst [vmem:[%s1812_s3 + $0x8] sm:$0xff] %v781_v22 }
  0xfb   :  { %v718_v30 = vadd.f32 %v717_v26, %v689_v25  ;;  %v662_v35 = vadd.f32 %v661_v28, %v633_v31  ;;  %v776_v23 = vsel %vm744_vm12, %v1747_v52, %v760_v19  ;;  %v762_v31 = vmul.f32 0.01, %v1752_v60 }
  0xfd   :  { %vm737_vm5 = vcmp.gt.f32.partialorder %v718_v30, 0.0  ;;  %v753_v8 = vmul.f32 0.01, %v718_v30 }
  0xff   :  { %v769_v34 = vsel %vm737_vm5, %v718_v30, %v753_v8 }
 0x100   :  { %v782_v36 = vpack.c.bf16 %v769_v34, %v768_v33  ;;  %v690_v37 = vpop.f32.mrf.mxu2  ;;  %v635_v41 = vpop.f32.mrf.mxu0  ;;  %v778_v33 = vsel %vm746_vm14, %v1752_v60, %v762_v31 }
 0x101   :  { %v691_v38 = vadd.f32 %v690_v37, %v662_v35  ;;  %v719_v39 = vpop.f32.mrf.mxu3  ;;  %v636_v42 = vadd.f32 %v635_v41, %v1749_v58  ;;  %v664_v43 = vpop.f32.mrf.mxu1 }
 0x102   :  { %790 = vst [vmem:[%s1812_s3 + $0x10] sm:$0xff] %v782_v36 }
 0x103   :  { %v720_v46 = vadd.f32 %v719_v39, %v691_v38  ;;  %v665_v47 = vadd.f32 %v664_v43, %v636_v42 }
 0x105   :  { %vm739_vm7 = vcmp.gt.f32.partialorder %v720_v46, 0.0  ;;  %v755_v16 = vmul.f32 0.01, %v720_v46 }
 0x107   :  { %v771_v55 = vsel %vm739_vm7, %v720_v46, %v755_v16 }
 0x108   :  { %v783_v59 = vpack.c.bf16 %v771_v55, %v770_v49  ;;  %v693_v54 = vpop.f32.mrf.mxu2  ;;  %v637_v50 = vpop.f32.mrf.mxu0 }
 0x109   :  { %v694_v57 = vadd.f32 %v693_v54, %v665_v47  ;;  %v722_v44 = vpop.f32.mrf.mxu3  ;;  %v666_v51 = vpop.f32.mrf.mxu1  ;;  %v638_v62 = vadd.f32 %v637_v50, %v1749_v58 }
 0x10a   :  { %791 = vst [vmem:[%s1812_s3 + $0x18] sm:$0xff] %v783_v59 }
 0x10b   :  { %v723_v61 = vadd.f32 %v722_v44, %v694_v57  ;;  %v667_v1 = vadd.f32 %v666_v51, %v638_v62 }
 0x10d   :  { %vm741_vm9 = vcmp.gt.f32.partialorder %v723_v61, 0.0  ;;  %v757_v24 = vmul.f32 0.01, %v723_v61 }
 0x10f   :  { %v773_v53 = vsel %vm741_vm9, %v723_v61, %v757_v24 }
 0x110   :  { %v784_v2 = vpack.c.bf16 %v773_v53, %v772_v63  ;;  %v695_v3 = vpop.f32.mrf.mxu2  ;;  %v640_v5 = vpop.f32.mrf.mxu0 }
 0x111   :  { %v696_v48 = vadd.f32 %v695_v3, %v667_v1  ;;  %v724_v4 = vpop.f32.mrf.mxu3  ;;  %v641_v6 = vadd.f32 %v640_v5, %v1749_v58  ;;  %v669_v10 = vpop.f32.mrf.mxu1 }
 0x112   :  { %792 = vst [vmem:[%s1812_s3 + $0x20] sm:$0xff] %v784_v2 }
 0x113   :  { %v725_v9 = vadd.f32 %v724_v4, %v696_v48  ;;  %v670_v11 = vadd.f32 %v669_v10, %v641_v6 }
 0x115   :  { %vm743_vm11 = vcmp.gt.f32.partialorder %v725_v9, 0.0  ;;  %v759_v32 = vmul.f32 0.01, %v725_v9 }
 0x117   :  { %v775_v13 = vsel %vm743_vm11, %v725_v9, %v759_v32 }
 0x118   :  { %v785_v14 = vpack.c.bf16 %v775_v13, %v774_v12  ;;  %v698_v15 = vpop.f32.mrf.mxu2  ;;  %v642_v0 = vpop.f32.mrf.mxu0 }
 0x119   :  { %v699_v17 = vadd.f32 %v698_v15, %v670_v11  ;;  %v727_v18 = vpop.f32.mrf.mxu3  ;;  %v643_v21 = vadd.f32 %v642_v0, %v1749_v58  ;;  %v671_v40 = vpop.f32.mrf.mxu1 }
 0x11a   :  { %793 = vst [vmem:[%s1812_s3 + $0x28] sm:$0xff] %v785_v14 }
 0x11b   :  { %v728_v20 = vadd.f32 %v727_v18, %v699_v17  ;;  %v672_v26 = vadd.f32 %v671_v40, %v643_v21 }
 0x11d   :  { %vm745_vm13 = vcmp.gt.f32.partialorder %v728_v20, 0.0  ;;  %v761_v22 = vmul.f32 0.01, %v728_v20 }
 0x11f   :  { %v777_v25 = vsel %vm745_vm13, %v728_v20, %v761_v22 }
 0x120   :  { %v786_v27 = vpack.c.bf16 %v777_v25, %v776_v23  ;;  %v700_v28 = vpop.f32.mrf.mxu2 }
 0x121   :  { %v701_v29 = vadd.f32 %v700_v28, %v672_v26  ;;  %v729_v30 = vpop.f32.mrf.mxu3 }
 0x122   :  { %794 = vst [vmem:[%s1812_s3 + $0x30] sm:$0xff] %v786_v27 }
 0x123   :  { %v730_v58 = vadd.f32 %v729_v30, %v701_v29 }
 0x125   :  { %vm747_vm15 = vcmp.gt.f32.partialorder %v730_v58, 0.0  ;;  %v763_v8 = vmul.f32 0.01, %v730_v58 }
 0x127   :  { %v779_v52 = vsel %vm747_vm15, %v730_v58, %v763_v8 }
 0x128   :  { %v787_v34 = vpack.c.bf16 %v779_v52, %v778_v33 }
 0x12a   :  { %795 = vst [vmem:[%s1812_s3 + $0x38] sm:$0xff] %v787_v34 }

// kernel: mnist_discriminator_fwd.9
= control target key start
LH: loop header
LB: loop body
LE: loop exit
PB: predicated region body
PF: predicated region fallthrough
CT: control target
= control target key end

     0   :  { %vm231_vm0 = vcmask 1043456   ;;  %vm477_vm1 = vcmask 3072   ;;  %s670_s2 = inlined_call_operand.<no memory space> [shape: f32[1,1], index: 2, kind: input, shape index: {}]   ;;  %s671_s1 = inlined_call_operand.vmem [shape: bf16[1,4608], index: 1, kind: input, shape index: {}]   ;;  %s672_s0 = inlined_call_operand.vmem [shape: bf16[4,4608], index: 0, kind: input, shape index: {}]   ;;  %s673_s3 = inlined_call_operand.vmem [shape: f32[4,1], index: 3, kind: input, shape index: {}]   ;;  %s674_s4 = inlined_call_operand.vmem [shape: f32[4,1], index: 4, kind: output, shape index: {}]  }
   0x1   :  { %v9_v0 = vstv %s670_s2  ;;  %v46_v1 = vld [vmem:[%s671_s1] sm:$0xff]  ;;  %v47_v5 = vld [vmem:[%s671_s1 + $0x8] sm:$0xff]  ;;  %v529_v11 = vld [vmem:[%s672_s0 + $0x10] sm:$0xff] }
   0x2   :  { %10 = vst [vmem:[#allocation2] sm:$0x1] %v9_v0  ;;  %v51_v2 = vunpack.c.l.bf16 %v46_v1  ;;  %v52_v3 = vunpack.c.h.bf16 %v46_v1  ;;  %v518_v4 = vld [vmem:[%s672_s0] sm:$0xff]  ;;  %v20_v10 = vld [vmem:[%s672_s0 + $0x8] sm:$0xff]  ;;  %v533_v14 = vunpack.c.l.bf16 %v47_v5  ;;  %v538_v15 = vld [vmem:[%s672_s0 + $0x18] sm:$0xff]  ;;  %v32_v26 = vunpack.c.l.bf16 %v529_v11 }
   0x3   :  { %v28_v12 = vunpack.c.l.bf16 %v518_v4  ;;  %v29_v13 = vunpack.c.h.bf16 %v518_v4  ;;  %v30_v24 = vunpack.c.l.bf16 %v20_v10  ;;  %v31_v25 = vunpack.c.h.bf16 %v20_v10  ;;  %v48_v30 = vld [vmem:[%s671_s1 + $0x10] sm:$0xff]  ;;  %v49_v31 = vld [vmem:[%s671_s1 + $0x18] sm:$0xff]  ;;  %v50_v34 = vld [vmem:[%s671_s1 + $0x20] sm:$0xf] }
   0x4   :  { %v70_v6 = vperm.slane %v51_v2, 2  ;;  %v72_v7 = vperm.slane %v51_v2, 6  ;;  %v74_v8 = vperm.slane %v52_v3, 2  ;;  %v76_v9 = vperm.slane %v52_v3, 6 }
   0x5   :  { %v69_v16 = vperm.slane %v51_v2, 0  ;;  %v71_v17 = vperm.slane %v51_v2, 4  ;;  %v73_v18 = vperm.slane %v52_v3, 0  ;;  %v75_v20 = vperm.slane %v52_v3, 4 }
   0x6   :  { %v142_v19 = vperm.slane %v70_v6, 0  ;;  %v144_v21 = vperm.slane %v72_v7, 0  ;;  %v146_v22 = vperm.slane %v74_v8, 0  ;;  %v148_v23 = vperm.slane %v76_v9, 0 }
   0x7   :  { %v33_v27 = vunpack.c.h.bf16 %v529_v11  ;;  %v34_v28 = vunpack.c.l.bf16 %v538_v15  ;;  %v35_v29 = vunpack.c.h.bf16 %v538_v15  ;;  %v54_v32 = vunpack.c.h.bf16 %v47_v5 }
   0x8   :  { %v78_v33 = vperm.slane %v533_v14, 2  ;;  %v141_v35 = vperm.slane %v69_v16, 0  ;;  %v143_v36 = vperm.slane %v71_v17, 0  ;;  %v145_v37 = vperm.slane %v73_v18, 0 }
   0x9   :  { %v213_v38 = vrot.slane %v142_v19, 4  ;;  %v147_v39 = vperm.slane %v75_v20, 0  ;;  %v214_v40 = vrot.slane %v144_v21, 4  ;;  %v215_v41 = vrot.slane %v146_v22, 4 }
   0xa   :  { %v216_v42 = vrot.slane %v148_v23, 4  ;;  %v55_v43 = vunpack.c.l.bf16 %v48_v30  ;;  %v554_v44 = vunpack.c.h.bf16 %v48_v30  ;;  %v556_v45 = vunpack.c.l.bf16 %v49_v31 }
   0xb   :  { %v80_v46 = vperm.slane %v533_v14, 6  ;;  %v559_v47 = vunpack.c.h.bf16 %v49_v31  ;;  %v561_v48 = vunpack.c.l.bf16 %v50_v34  ;;  %v77_v49 = vperm.slane %v533_v14, 0 }
   0xc   :  { %v82_v50 = vperm.slane %v54_v32, 2  ;;  %v79_v51 = vperm.slane %v533_v14, 4  ;;  %v81_v52 = vperm.slane %v54_v32, 0  ;;  %v84_v53 = vperm.slane %v54_v32, 6 }
   0xd   :  { %v232_v54 = vsel %vm231_vm0, %v141_v35, %v213_v38  ;;  %v150_v55 = vperm.slane %v78_v33, 0  ;;  %v233_v56 = vsel %vm231_vm0, %v143_v36, %v214_v40  ;;  %v234_v57 = vsel %vm231_vm0, %v145_v37, %v215_v41  ;;  %v23_v41 = vld [vmem:[%s672_s0 + $0x20] sm:$0xff] }
   0xe   :  { %v235_v58 = vsel %vm231_vm0, %v147_v39, %v216_v42  ;;  %v83_v59 = vperm.slane %v54_v32, 4  ;;  %v85_v60 = vperm.slane %v55_v43, 0  ;;  %v86_v61 = vperm.slane %v55_v43, 2 }
   0xf   :  { %v152_v62 = vperm.slane %v80_v46, 0  ;;  %v87_v63 = vperm.slane %v55_v43, 4  ;;  %v88_v0 = vperm.slane %v55_v43, 6  ;;  %v154_v1 = vperm.slane %v82_v50, 0 }
  0x10   :  { %v268_v2 = vmul.f32 %v232_v54, %v28_v12  ;;  %v156_v3 = vperm.slane %v84_v53, 0  ;;  %v269_v4 = vmul.f32 %v233_v56, %v29_v13  ;;  %v270_v5 = vmul.f32 %v234_v57, %v30_v24 }
  0x11   :  { %v271_v6 = vmul.f32 %v235_v58, %v31_v25  ;;  %v89_v7 = vperm.slane %v554_v44, 0  ;;  %v90_v8 = vperm.slane %v554_v44, 2  ;;  %v149_v9 = vperm.slane %v77_v49, 0  ;;  %v24_v49 = vld [vmem:[%s672_s0 + $0x28] sm:$0xff] }
  0x12   :  { %v217_v10 = vrot.slane %v150_v55, 4  ;;  %304 = vst [vmem:[#allocation1] ss:$2 sm:$0xff] %v268_v2  ;;  %v91_v14 = vperm.slane %v554_v44, 4  ;;  %v92_v16 = vperm.slane %v554_v44, 6  ;;  %v151_v17 = vperm.slane %v79_v51, 0 }
  0x13   :  { %v218_v18 = vrot.slane %v152_v62, 4  ;;  %306 = vst [vmem:[#allocation1 + $0x10] ss:$2 sm:$0xff] %v269_v4  ;;  %v93_v12 = vperm.slane %v556_v45, 0  ;;  %v94_v13 = vperm.slane %v556_v45, 2  ;;  %v153_v19 = vperm.slane %v81_v52, 0 }
  0x14   :  { %v219_v20 = vrot.slane %v154_v1, 4  ;;  %308 = vst [vmem:[#allocation1 + $0x20] ss:$2 sm:$0xff] %v270_v5  ;;  %v95_v21 = vperm.slane %v556_v45, 4  ;;  %v96_v22 = vperm.slane %v556_v45, 6  ;;  %v155_v23 = vperm.slane %v83_v59, 0 }
  0x15   :  { %v220_v24 = vrot.slane %v156_v3, 4  ;;  %310 = vst [vmem:[#allocation1 + $0x30] ss:$2 sm:$0xff] %v271_v6  ;;  %v97_v25 = vperm.slane %v559_v47, 0  ;;  %v98_v30 = vperm.slane %v559_v47, 2  ;;  %v99_v31 = vperm.slane %v559_v47, 4 }
  0x16   :  { %v236_v32 = vsel %vm231_vm0, %v149_v9, %v217_v10  ;;  %v100_v33 = vperm.slane %v559_v47, 6  ;;  %v101_v34 = vperm.slane %v561_v48, 0  ;;  %v158_v35 = vperm.slane %v86_v61, 0 }
  0x17   :  { %v237_v36 = vsel %vm231_vm0, %v151_v17, %v218_v18  ;;  %v102_v37 = vperm.slane %v561_v48, 2  ;;  %v157_v38 = vperm.slane %v85_v60, 0  ;;  %v159_v39 = vperm.slane %v87_v63, 0 }
  0x18   :  { %v238_v40 = vsel %vm231_vm0, %v153_v19, %v219_v20  ;;  %v160_v42 = vperm.slane %v88_v0, 0  ;;  %v162_v43 = vperm.slane %v90_v8, 0  ;;  %v239_v44 = vsel %vm231_vm0, %v155_v23, %v220_v24 }
  0x19   :  { %v272_v45 = vmul.f32 %v236_v32, %v32_v26  ;;  %v311_v46 = vld.sshfl [vmem:[#allocation1] sm:$0xff pattern:$0x75316420]  ;;  %v273_v50 = vmul.f32 %v237_v36, %v33_v27  ;;  %v312_v51 = vld.sshfl [vmem:[#allocation1 + $0x8] sm:$0xff pattern:$0x75316420]  ;;  %v274_v56 = vmul.f32 %v238_v40, %v34_v28  ;;  %v275_v26 = vmul.f32 %v239_v44, %v35_v29 }
  0x1a   :  { %v313_v52 = vld.sshfl [vmem:[#allocation1 + $0x10] sm:$0xff pattern:$0x75316420]  ;;  %v161_v53 = vperm.slane %v89_v7, 0  ;;  %v164_v54 = vperm.slane %v92_v16, 0  ;;  %v221_v55 = vrot.slane %v158_v35, 4  ;;  %v36_v62 = vunpack.c.l.bf16 %v23_v41 }
  0x1b   :  { %v314_v57 = vld.sshfl [vmem:[#allocation1 + $0x18] sm:$0xff pattern:$0x75316420]  ;;  %v315_v58 = vld.sshfl [vmem:[#allocation1 + $0x20] sm:$0xff pattern:$0x75316420]  ;;  %v37_v28 = vunpack.c.h.bf16 %v23_v41  ;;  %v38_v2 = vunpack.c.l.bf16 %v24_v49  ;;  %v39_v3 = vunpack.c.h.bf16 %v24_v49 }
  0x1c   :  { %v316_v59 = vld.sshfl [vmem:[#allocation1 + $0x28] sm:$0xff pattern:$0x75316420]  ;;  %v222_v60 = vrot.slane %v160_v42, 4  ;;  %319 = vst [vmem:[#allocation1] ss:$2 sm:$0xff] %v272_v45  ;;  %v240_v10 = vsel %vm231_vm0, %v157_v38, %v221_v55 }
  0x1d   :  { %v397_v61 = vsel %vm231_vm0, %v311_v46, 0.0  ;;  %v398_v11 = vsel %vm231_vm0, %v312_v51, 0.0  ;;  %v400_v27 = vsel %vm231_vm0, %v313_v52, 0.0  ;;  %v223_v63 = vrot.slane %v162_v43, 4  ;;  %320 = vst [vmem:[#allocation1 + $0x10] ss:$2 sm:$0xff] %v273_v50 }
  0x1e   :  { %v317_v0 = vld.sshfl [vmem:[#allocation1 + $0x30] sm:$0xff pattern:$0x75316420]  ;;  %v399_v1 = vadd.f32 %v398_v11, %v397_v61  ;;  %v318_v15 = vld.sshfl [vmem:[#allocation1 + $0x38] sm:$0xff pattern:$0x75316420]  ;;  %v241_v19 = vsel %vm231_vm0, %v159_v39, %v222_v60 }
  0x1f   :  { %321 = vst [vmem:[#allocation1 + $0x20] ss:$2 sm:$0xff] %v274_v56  ;;  %v402_v29 = vsel %vm231_vm0, %v314_v57, 0.0  ;;  %v103_v4 = vperm.slane %v561_v48, 4  ;;  %v163_v5 = vperm.slane %v91_v14, 0  ;;  %v224_v6 = vrot.slane %v164_v54, 4 }
  0x20   :  { %322 = vst [vmem:[#allocation1 + $0x30] ss:$2 sm:$0xff] %v275_v26  ;;  %v401_v7 = vadd.f32 %v400_v27, %v399_v1  ;;  %v165_v8 = vperm.slane %v93_v12, 0  ;;  %v166_v9 = vperm.slane %v94_v13, 0  ;;  %v404_v16 = vsel %vm231_vm0, %v315_v58, 0.0  ;;  %v25_v38 = vld [vmem:[%s672_s0 + $0x30] sm:$0xff] }
  0x21   :  { %v167_v17 = vperm.slane %v95_v21, 0  ;;  %v168_v18 = vperm.slane %v96_v22, 0  ;;  %v169_v23 = vperm.slane %v97_v25, 0  ;;  %v170_v24 = vperm.slane %v98_v30, 0  ;;  %v26_v46 = vld [vmem:[%s672_s0 + $0x38] sm:$0xff] }
  0x22   :  { %v403_v20 = vadd.f32 %v402_v29, %v401_v7  ;;  %v242_v32 = vsel %vm231_vm0, %v161_v53, %v223_v63  ;;  %v406_v14 = vsel %vm231_vm0, %v316_v59, 0.0  ;;  %v172_v35 = vperm.slane %v100_v33, 0 }
  0x23   :  { %v243_v36 = vsel %vm231_vm0, %v163_v5, %v224_v6  ;;  %v276_v12 = vmul.f32 %v240_v10, %v36_v62  ;;  %v225_v21 = vrot.slane %v166_v9, 4  ;;  %v277_v22 = vmul.f32 %v241_v19, %v37_v28  ;;  %v323_v40 = vld.sshfl [vmem:[#allocation1] sm:$0xff pattern:$0x75316420] }
  0x24   :  { %v405_v13 = vadd.f32 %v404_v16, %v403_v20  ;;  %v408_v39 = vsel %vm231_vm0, %v317_v0, 0.0  ;;  %v410_v25 = vsel %vm231_vm0, %v318_v15, 0.0  ;;  %v278_v30 = vmul.f32 %v242_v32, %v38_v2  ;;  %v324_v41 = vld.sshfl [vmem:[#allocation1 + $0x8] sm:$0xff pattern:$0x75316420] }
  0x25   :  { %v325_v42 = vld.sshfl [vmem:[#allocation1 + $0x10] sm:$0xff pattern:$0x75316420]  ;;  %v279_v33 = vmul.f32 %v243_v36, %v39_v3  ;;  %v326_v44 = vld.sshfl [vmem:[#allocation1 + $0x18] sm:$0xff pattern:$0x75316420]  ;;  %v40_v54 = vunpack.c.l.bf16 %v25_v38  ;;  %v41_v61 = vunpack.c.h.bf16 %v25_v38  ;;  %v244_v27 = vsel %vm231_vm0, %v165_v8, %v225_v21 }
  0x26   :  { %v407_v43 = vadd.f32 %v406_v14, %v405_v13  ;;  %v327_v45 = vld.sshfl [vmem:[#allocation1 + $0x20] sm:$0xff pattern:$0x75316420]  ;;  %v226_v49 = vrot.slane %v168_v18, 4  ;;  %331 = vst [vmem:[#allocation1] ss:$2 sm:$0xff] %v276_v12  ;;  %v42_v63 = vunpack.c.l.bf16 %v26_v46  ;;  %v43_v0 = vunpack.c.h.bf16 %v26_v46 }
  0x27   :  { %v328_v50 = vld.sshfl [vmem:[#allocation1 + $0x28] sm:$0xff pattern:$0x75316420]  ;;  %v329_v52 = vld.sshfl [vmem:[#allocation1 + $0x30] sm:$0xff pattern:$0x75316420] }
  0x28   :  { %v409_v51 = vadd.f32 %v408_v39, %v407_v43  ;;  %332 = vst [vmem:[#allocation1 + $0x10] ss:$2 sm:$0xff] %v277_v22  ;;  %v412_v53 = vsel %vm231_vm0, %v323_v40, 0.0  ;;  %v227_v55 = vrot.slane %v170_v24, 4  ;;  %v104_v26 = vperm.slane %v561_v48, 6  ;;  %v27_v48 = vld [vmem:[%s672_s0 + $0x40] sm:$0xff] }
  0x29   :  { %v330_v56 = vld.sshfl [vmem:[#allocation1 + $0x38] sm:$0xff pattern:$0x75316420]  ;;  %333 = vst [vmem:[#allocation1 + $0x20] ss:$2 sm:$0xff] %v278_v30  ;;  %v171_v58 = vperm.slane %v99_v31, 0  ;;  %v245_v1 = vsel %vm231_vm0, %v167_v17, %v226_v49  ;;  %v44_v13 = vunpack.c.l.bf16 %v27_v48  ;;  %v45_v21 = vunpack.c.h.bf16 %v27_v48 }
  0x2a   :  { %v411_v57 = vadd.f32 %v410_v25, %v409_v51  ;;  %v228_v59 = vrot.slane %v172_v35, 4  ;;  %334 = vst [vmem:[#allocation1 + $0x30] ss:$2 sm:$0xff] %v279_v33  ;;  %v414_v60 = vsel %vm231_vm0, %v324_v41, 0.0  ;;  %v174_v11 = vperm.slane %v102_v37, 0 }
  0x2b   :  { %v416_v28 = vsel %vm231_vm0, %v325_v42, 0.0  ;;  %v173_v47 = vperm.slane %v101_v34, 0  ;;  %v175_v31 = vperm.slane %v103_v4, 0  ;;  %v246_v2 = vsel %vm231_vm0, %v169_v23, %v227_v55 }
  0x2c   :  { %v413_v62 = vadd.f32 %v412_v53, %v411_v57  ;;  %v176_v15 = vperm.slane %v104_v26, 0  ;;  %v247_v29 = vsel %vm231_vm0, %v171_v58, %v228_v59  ;;  %v280_v37 = vmul.f32 %v244_v27, %v40_v54 }
  0x2d   :  { %v418_v5 = vsel %vm231_vm0, %v326_v44, 0.0  ;;  %v229_v6 = vrot.slane %v174_v11, 4  ;;  %v281_v7 = vmul.f32 %v245_v1, %v41_v61  ;;  %v335_v8 = vld.sshfl [vmem:[#allocation1] sm:$0xff pattern:$0x75316420]  ;;  %v420_v10 = vsel %vm231_vm0, %v327_v45, 0.0 }
  0x2e   :  { %v415_v3 = vadd.f32 %v414_v60, %v413_v62  ;;  %v282_v34 = vmul.f32 %v246_v2, %v42_v63  ;;  %v336_v4 = vld.sshfl [vmem:[#allocation1 + $0x8] sm:$0xff pattern:$0x75316420]  ;;  %v283_v17 = vmul.f32 %v247_v29, %v43_v0  ;;  %v422_v24 = vsel %vm231_vm0, %v328_v50, 0.0 }
  0x2f   :  { %v337_v16 = vld.sshfl [vmem:[#allocation1 + $0x10] sm:$0xff pattern:$0x75316420]  ;;  %v338_v18 = vld.sshfl [vmem:[#allocation1 + $0x18] sm:$0xff pattern:$0x75316420]  ;;  %v248_v22 = vsel %vm231_vm0, %v173_v47, %v229_v6 }
  0x30   :  { %v417_v9 = vadd.f32 %v416_v28, %v415_v3  ;;  %v339_v19 = vld.sshfl [vmem:[#allocation1 + $0x20] sm:$0xff pattern:$0x75316420]  ;;  %v340_v23 = vld.sshfl [vmem:[#allocation1 + $0x28] sm:$0xff pattern:$0x75316420]  ;;  %v284_v41 = vmul.f32 %v248_v22, %v44_v13 }
  0x31   :  { %343 = vst [vmem:[#allocation1] ss:$2 sm:$0xff] %v280_v37  ;;  %v230_v32 = vrot.slane %v176_v15, 4  ;;  %v341_v14 = vld.sshfl [vmem:[#allocation1 + $0x30] sm:$0xff pattern:$0x75316420] }
  0x32   :  { %v419_v20 = vadd.f32 %v418_v5, %v417_v9  ;;  %344 = vst [vmem:[#allocation1 + $0x10] ss:$2 sm:$0xff] %v281_v7  ;;  %v342_v36 = vld.sshfl [vmem:[#allocation1 + $0x38] sm:$0xff pattern:$0x75316420]  ;;  %v424_v12 = vsel %vm231_vm0, %v329_v52, 0.0 }
  0x33   :  { %345 = vst [vmem:[#allocation1 + $0x20] ss:$2 sm:$0xff] %v282_v34  ;;  %v426_v40 = vsel %vm231_vm0, %v330_v56, 0.0  ;;  %v249_v39 = vsel %vm231_vm0, %v175_v31, %v230_v32  ;;  %v428_v30 = vsel %vm231_vm0, %v335_v8, 0.0  ;;  %v430_v33 = vsel %vm231_vm0, %v336_v4, 0.0 }
  0x34   :  { %v421_v35 = vadd.f32 %v420_v10, %v419_v20  ;;  %346 = vst [vmem:[#allocation1 + $0x30] ss:$2 sm:$0xff] %v283_v17  ;;  %v285_v43 = vmul.f32 %v249_v39, %v45_v21  ;;  %v432_v46 = vsel %vm231_vm0, %v337_v16, 0.0  ;;  %v434_v53 = vsel %vm231_vm0, %v338_v18, 0.0  ;;  %v475_v13 = vld [vmem:[%s673_s3] sm:$0xf] }
  0x35   :  { %v436_v55 = vsel %vm231_vm0, %v339_v19, 0.0  ;;  %v438_v57 = vsel %vm231_vm0, %v340_v23, 0.0  ;;  %v440_v58 = vsel %vm231_vm0, %v341_v14, 0.0  ;;  %v442_v60 = vsel %vm231_vm0, %v342_v36, 0.0  ;;  %v483_v36 = vld [vmem:[#allocation2] ss:$0 sm:$0xff] }
  0x36   :  { %v423_v38 = vadd.f32 %v422_v24, %v421_v35 }
  0x38   :  { %v425_v25 = vadd.f32 %v424_v12, %v423_v38  ;;  %v347_v44 = vld.sshfl [vmem:[#allocation1] sm:$0xff pattern:$0x75316420]  ;;  %v348_v49 = vld.sshfl [vmem:[#allocation1 + $0x8] sm:$0xff pattern:$0x75316420] }
  0x39   :  { %v349_v50 = vld.sshfl [vmem:[#allocation1 + $0x10] sm:$0xff pattern:$0x75316420]  ;;  %v350_v51 = vld.sshfl [vmem:[#allocation1 + $0x18] sm:$0xff pattern:$0x75316420] }
  0x3a   :  { %v427_v42 = vadd.f32 %v426_v40, %v425_v25  ;;  %355 = vst [vmem:[#allocation1] ss:$2 sm:$0xff] %v284_v41  ;;  %v444_v11 = vsel %vm231_vm0, %v347_v44, 0.0  ;;  %v446_v62 = vsel %vm231_vm0, %v348_v49, 0.0  ;;  %v448_v0 = vsel %vm231_vm0, %v349_v50, 0.0 }
  0x3b   :  { %356 = vst [vmem:[#allocation1 + $0x10] ss:$2 sm:$0xff] %v285_v43  ;;  %v351_v1 = vld.sshfl [vmem:[#allocation1 + $0x20] sm:$0xff pattern:$0x75316420]  ;;  %v450_v47 = vsel %vm231_vm0, %v350_v51, 0.0 }
  0x3c   :  { %v429_v45 = vadd.f32 %v428_v30, %v427_v42  ;;  %v352_v31 = vld.sshfl [vmem:[#allocation1 + $0x28] sm:$0xff pattern:$0x75316420]  ;;  %v452_v3 = vsel %vm231_vm0, %v351_v1, 0.0 }
  0x3d   :  { %v353_v15 = vld.sshfl [vmem:[#allocation1 + $0x30] sm:$0xff pattern:$0x75316420]  ;;  %v454_v37 = vsel %vm231_vm0, %v352_v31, 0.0 }
  0x3e   :  { %v431_v52 = vadd.f32 %v430_v33, %v429_v45  ;;  %v354_v5 = vld.sshfl [vmem:[#allocation1 + $0x38] sm:$0xff pattern:$0x75316420]  ;;  %v456_v7 = vsel %vm231_vm0, %v353_v15, 0.0 }
  0x3f   :  { %v458_v10 = vsel %vm231_vm0, %v354_v5, 0.0 }
  0x40   :  { %v433_v54 = vadd.f32 %v432_v46, %v431_v52 }
  0x41   :  { %v357_v8 = vld.sshfl [vmem:[#allocation1] sm:$0xff pattern:$0x75316420]  ;;  %v358_v48 = vld.sshfl [vmem:[#allocation1 + $0x8] sm:$0xff pattern:$0x75316420] }
  0x42   :  { %v435_v56 = vadd.f32 %v434_v53, %v433_v54  ;;  %v460_v4 = vsel %vm231_vm0, %v357_v8, 0.0  ;;  %v359_v16 = vld.sshfl [vmem:[#allocation1 + $0x10] sm:$0xff pattern:$0x75316420]  ;;  %v462_v18 = vsel %vm231_vm0, %v358_v48, 0.0 }
  0x43   :  { %v360_v19 = vld.sshfl [vmem:[#allocation1 + $0x18] sm:$0xff pattern:$0x75316420]  ;;  %v464_v23 = vsel %vm231_vm0, %v359_v16, 0.0 }
  0x44   :  { %v437_v26 = vadd.f32 %v436_v55, %v435_v56  ;;  %v466_v32 = vsel %vm231_vm0, %v360_v19, 0.0 }
  0x46   :  { %v439_v59 = vadd.f32 %v438_v57, %v437_v26 }
  0x48   :  { %v441_v61 = vadd.f32 %v440_v58, %v439_v59 }
  0x4a   :  { %v443_v27 = vadd.f32 %v442_v60, %v441_v61 }
  0x4c   :  { %v445_v63 = vadd.f32 %v444_v11, %v443_v27 }
  0x4e   :  { %v447_v28 = vadd.f32 %v446_v62, %v445_v63 }
  0x50   :  { %v449_v2 = vadd.f32 %v448_v0, %v447_v28 }
  0x52   :  { %v451_v29 = vadd.f32 %v450_v47, %v449_v2 }
  0x54   :  { %v453_v6 = vadd.f32 %v452_v3, %v451_v29 }
  0x56   :  { %v455_v9 = vadd.f32 %v454_v37, %v453_v6 }
  0x58   :  { %v457_v34 = vadd.f32 %v456_v7, %v455_v9 }
  0x5a   :  { %v459_v17 = vadd.f32 %v458_v10, %v457_v34 }
  0x5c   :  { %v461_v20 = vadd.f32 %v460_v4, %v459_v17 }
  0x5e   :  { %v463_v24 = vadd.f32 %v462_v18, %v461_v20 }
  0x60   :  { %v465_v14 = vadd.f32 %v464_v23, %v463_v24 }
  0x62   :  { %v467_v35 = vadd.f32 %v466_v32, %v465_v14 }
  0x64   :  { %468 = vadd.xlane.f32.xlu0 %v467_v35 }
  0xd7   :  { %v469_v12 = vpop.xlane.xlu0 %468 }
  0xd8   :  { %v474_v38 = vadd.f32 %v483_v36, %v469_v12 }
  0xda   :  { %v476_v21 = vadd.f32 %v475_v13, %v474_v38 }
  0xdc   :  { %478 = vst.msk [vmem:[%s674_s4] sm:$0xf] %vm477_vm1, %v476_v21 }

// kernel: mnist_discriminator_fwd.8
= control target key start
LH: loop header
LB: loop body
LE: loop exit
PB: predicated region body
PF: predicated region fallthrough
CT: control target
= control target key end

     0   :  { %s5872_s1 = inlined_call_operand.vmem [shape: bf16[1024,512], index: 1, kind: input, shape index: {}]   ;;  %s5873_s0 = inlined_call_operand.vmem [shape: bf16[40,1024], index: 0, kind: input, shape index: {}]   ;;  %s5874_s2 = inlined_call_operand.vmem [shape: f32[1,512], index: 2, kind: input, shape index: {}]   ;;  %s5875_s3 = inlined_call_operand.vmem [shape: bf16[40,512], index: 3, kind: output, shape index: {}]  }
   0x1   :  { %v2686_v0 = vld [vmem:[%s5872_s1 + $0xe0] sm:$0xf]  ;;  %v3642_v1 = vld [vmem:[%s5872_s1 + $0xec] sm:$0xf0] }
   0x2   :  { %v2814_v2 = vld [vmem:[%s5872_s1 + $0x1e0] sm:$0xf]  ;;  %v2687_v3 = vor.u32 %v3642_v1, %v2686_v0  ;;  %v3674_v4 = vld [vmem:[%s5872_s1 + $0x1ec] sm:$0xf0] }
   0x3   :  { %v2942_v5 = vld [vmem:[%s5872_s1 + $0x2e0] sm:$0xf]  ;;  %v3706_v6 = vld [vmem:[%s5872_s1 + $0x2ec] sm:$0xf0]  ;;  %v2815_v7 = vor.u32 %v3674_v4, %v2814_v2 }
   0x4   :  { %v2943_v8 = vor.u32 %v3706_v6, %v2942_v5  ;;  %v3070_v9 = vld [vmem:[%s5872_s1 + $0x3e0] sm:$0xf]  ;;  %v3738_v10 = vld [vmem:[%s5872_s1 + $0x3ec] sm:$0xf0]  ;;  %1688 = vmatpush.bf16.msra.mxu0 %v2687_v3 }
   0x5   :  { %v2670_v11 = vld [vmem:[%s5872_s1 + $0xc0] sm:$0xf]  ;;  %v3071_v12 = vor.u32 %v3738_v10, %v3070_v9  ;;  %v3638_v13 = vld [vmem:[%s5872_s1 + $0xcc] sm:$0xf0]  ;;  %1711 = vmatpush.bf16.msra.mxu1 %v2815_v7 }
   0x6   :  { %v2798_v14 = vld [vmem:[%s5872_s1 + $0x1c0] sm:$0xf]  ;;  %v3670_v15 = vld [vmem:[%s5872_s1 + $0x1cc] sm:$0xf0]  ;;  %1734 = vmatpush.bf16.msra.mxu2 %v2943_v8  ;;  %v2671_v16 = vor.u32 %v3638_v13, %v2670_v11 }
   0x7   :  { %v2799_v17 = vor.u32 %v3670_v15, %v2798_v14  ;;  %v2926_v18 = vld [vmem:[%s5872_s1 + $0x2c0] sm:$0xf]  ;;  %v3702_v19 = vld [vmem:[%s5872_s1 + $0x2cc] sm:$0xf0]  ;;  %1757 = vmatpush.bf16.msra.mxu3 %v3071_v12 }
   0x8   :  { %v3054_v20 = vld [vmem:[%s5872_s1 + $0x3c0] sm:$0xf]  ;;  %v2927_v21 = vor.u32 %v3702_v19, %v2926_v18  ;;  %v3734_v22 = vld [vmem:[%s5872_s1 + $0x3cc] sm:$0xf0]  ;;  %1689 = vmatpush.bf16.msra.mxu0 %v2671_v16 }
   0x9   :  { %v2654_v23 = vld [vmem:[%s5872_s1 + $0xa0] sm:$0xf]  ;;  %v3634_v24 = vld [vmem:[%s5872_s1 + $0xac] sm:$0xf0]  ;;  %v3055_v25 = vor.u32 %v3734_v22, %v3054_v20  ;;  %1712 = vmatpush.bf16.msra.mxu1 %v2799_v17 }
   0xa   :  { %v2782_v26 = vld [vmem:[%s5872_s1 + $0x1a0] sm:$0xf]  ;;  %v3666_v27 = vld [vmem:[%s5872_s1 + $0x1ac] sm:$0xf0]  ;;  %v2655_v29 = vor.u32 %v3634_v24, %v2654_v23  ;;  %1735 = vmatpush.bf16.msra.mxu2 %v2927_v21 }
   0xb   :  { %v2910_v28 = vld [vmem:[%s5872_s1 + $0x2a0] sm:$0xf]  ;;  %v3698_v30 = vld [vmem:[%s5872_s1 + $0x2ac] sm:$0xf0]  ;;  %v2783_v33 = vor.u32 %v3666_v27, %v2782_v26  ;;  %1758 = vmatpush.bf16.msra.mxu3 %v3055_v25 }
   0xc   :  { %v3038_v31 = vld [vmem:[%s5872_s1 + $0x3a0] sm:$0xf]  ;;  %v3730_v32 = vld [vmem:[%s5872_s1 + $0x3ac] sm:$0xf0]  ;;  %v2911_v34 = vor.u32 %v3698_v30, %v2910_v28  ;;  %1690 = vmatpush.bf16.msra.mxu0 %v2655_v29  ;;  %v3596_v30 = vld [vmem:[%s5873_s0 + $0x4] sm:$0xf] }
   0xd   :  { %v2638_v35 = vld [vmem:[%s5872_s1 + $0x80] sm:$0xf]  ;;  %v3630_v36 = vld [vmem:[%s5872_s1 + $0x8c] sm:$0xf0]  ;;  %v3039_v38 = vor.u32 %v3730_v32, %v3038_v31  ;;  %1713 = vmatpush.bf16.msra.mxu1 %v2783_v33  ;;  %v2512_v31 = vld [vmem:[%s5873_s0 + $0x20] sm:$0xf0] }
   0xe   :  { %v2766_v37 = vld [vmem:[%s5872_s1 + $0x180] sm:$0xf]  ;;  %v3662_v39 = vld [vmem:[%s5872_s1 + $0x18c] sm:$0xf0]  ;;  %v2639_v44 = vor.u32 %v3630_v36, %v2638_v35  ;;  %1736 = vmatpush.bf16.msra.mxu2 %v2911_v34  ;;  %v2518_v35 = vld [vmem:[%s5873_s0 + $0x8] sm:$0xf] }
   0xf   :  { %v2894_v40 = vld [vmem:[%s5872_s1 + $0x280] sm:$0xf]  ;;  %v3694_v41 = vld [vmem:[%s5872_s1 + $0x28c] sm:$0xf0]  ;;  %v2767_v45 = vor.u32 %v3662_v39, %v2766_v37  ;;  %1759 = vmatpush.bf16.msra.mxu3 %v3039_v38 }
  0x10   :  { %v3022_v42 = vld [vmem:[%s5872_s1 + $0x380] sm:$0xf]  ;;  %v3726_v43 = vld [vmem:[%s5872_s1 + $0x38c] sm:$0xf0]  ;;  %v2895_v46 = vor.u32 %v3694_v41, %v2894_v40  ;;  %1691 = vmatpush.bf16.msra.mxu0 %v2639_v44  ;;  %v3601_v40 = vld [vmem:[%s5873_s0 + $0x24] sm:$0xf0] }
  0x11   :  { %v2622_v47 = vld [vmem:[%s5872_s1 + $0x60] sm:$0xf]  ;;  %v3626_v48 = vld [vmem:[%s5872_s1 + $0x6c] sm:$0xf0]  ;;  %v3023_v50 = vor.u32 %v3726_v43, %v3022_v42  ;;  %1714 = vmatpush.bf16.msra.mxu1 %v2767_v45  ;;  %v3597_v41 = vld [vmem:[%s5873_s0 + $0xc] sm:$0xf] }
  0x12   :  { %v2750_v49 = vld [vmem:[%s5872_s1 + $0x160] sm:$0xf]  ;;  %v3658_v51 = vld [vmem:[%s5872_s1 + $0x16c] sm:$0xf0]  ;;  %v2623_v56 = vor.u32 %v3626_v48, %v2622_v47  ;;  %1737 = vmatpush.bf16.msra.mxu2 %v2895_v46  ;;  %v2520_v42 = vld [vmem:[%s5873_s0 + $0x28] sm:$0xf0] }
  0x13   :  { %v2878_v52 = vld [vmem:[%s5872_s1 + $0x260] sm:$0xf]  ;;  %v3690_v53 = vld [vmem:[%s5872_s1 + $0x26c] sm:$0xf0]  ;;  %v2751_v57 = vor.u32 %v3658_v51, %v2750_v49  ;;  %1760 = vmatpush.bf16.msra.mxu3 %v3023_v50 }
  0x14   :  { %v3006_v54 = vld [vmem:[%s5872_s1 + $0x360] sm:$0xf]  ;;  %v3722_v55 = vld [vmem:[%s5872_s1 + $0x36c] sm:$0xf0]  ;;  %v2879_v58 = vor.u32 %v3690_v53, %v2878_v52  ;;  %1692 = vmatpush.bf16.msra.mxu0 %v2623_v56  ;;  %v4137_v53 = vor.u32 %v3596_v30, %v2512_v31 }
  0x15   :  { %v2606_v59 = vld [vmem:[%s5872_s1 + $0x40] sm:$0xf]  ;;  %v3622_v60 = vld [vmem:[%s5872_s1 + $0x4c] sm:$0xf0]  ;;  %v3007_v62 = vor.u32 %v3722_v55, %v3006_v54  ;;  %1715 = vmatpush.bf16.msra.mxu1 %v2751_v57  ;;  %v4139_v54 = vor.u32 %v3601_v40, %v2518_v35  ;;  %v4147_v57 = vor.u32 %v3597_v41, %v2520_v42  ;;  %v3609_v35 = vld [vmem:[%s5873_s0 + $0x64] sm:$0xf0] }
  0x16   :  { %v2734_v61 = vld [vmem:[%s5872_s1 + $0x140] sm:$0xf]  ;;  %v3654_v63 = vld [vmem:[%s5872_s1 + $0x14c] sm:$0xf0]  ;;  %v2607_v4 = vor.u32 %v3622_v60, %v2606_v59  ;;  %1738 = vmatpush.bf16.msra.mxu2 %v2879_v58 }
  0x17   :  { %v2862_v0 = vld [vmem:[%s5872_s1 + $0x240] sm:$0xf]  ;;  %v3686_v1 = vld [vmem:[%s5872_s1 + $0x24c] sm:$0xf0]  ;;  %v2735_v5 = vor.u32 %v3654_v63, %v2734_v61  ;;  %1761 = vmatpush.bf16.msra.mxu3 %v3007_v62 }
  0x18   :  { %v2990_v2 = vld [vmem:[%s5872_s1 + $0x340] sm:$0xf]  ;;  %v3718_v3 = vld [vmem:[%s5872_s1 + $0x34c] sm:$0xf0]  ;;  %v2863_v6 = vor.u32 %v3686_v1, %v2862_v0  ;;  %1693 = vmatpush.bf16.msra.mxu0 %v2607_v4 }
  0x19   :  { %v2590_v7 = vld [vmem:[%s5872_s1 + $0x20] sm:$0xf]  ;;  %v3618_v8 = vld [vmem:[%s5872_s1 + $0x2c] sm:$0xf0]  ;;  %v2991_v10 = vor.u32 %v3718_v3, %v2990_v2  ;;  %1716 = vmatpush.bf16.msra.mxu1 %v2735_v5 }
  0x1a   :  { %v2718_v9 = vld [vmem:[%s5872_s1 + $0x120] sm:$0xf]  ;;  %v3650_v11 = vld [vmem:[%s5872_s1 + $0x12c] sm:$0xf0]  ;;  %v2591_v17 = vor.u32 %v3618_v8, %v2590_v7  ;;  %1739 = vmatpush.bf16.msra.mxu2 %v2863_v6 }
  0x1b   :  { %v2846_v12 = vld [vmem:[%s5872_s1 + $0x220] sm:$0xf]  ;;  %v3682_v13 = vld [vmem:[%s5872_s1 + $0x22c] sm:$0xf0]  ;;  %v2719_v21 = vor.u32 %v3650_v11, %v2718_v9  ;;  %1762 = vmatpush.bf16.msra.mxu3 %v2991_v10 }
  0x1c   :  { %v2974_v14 = vld [vmem:[%s5872_s1 + $0x320] sm:$0xf]  ;;  %v3714_v15 = vld [vmem:[%s5872_s1 + $0x32c] sm:$0xf0]  ;;  %v2847_v22 = vor.u32 %v3682_v13, %v2846_v12  ;;  %1694 = vmatpush.bf16.msra.mxu0 %v2591_v17 }
  0x1d   :  { %v2574_v16 = vld [vmem:[%s5872_s1] sm:$0xf]  ;;  %v3614_v18 = vld [vmem:[%s5872_s1 + $0xc] sm:$0xf0]  ;;  %v2975_v26 = vor.u32 %v3714_v15, %v2974_v14  ;;  %1717 = vmatpush.bf16.msra.mxu1 %v2719_v21 }
  0x1e   :  { %v2702_v19 = vld [vmem:[%s5872_s1 + $0x100] sm:$0xf]  ;;  %v3646_v20 = vld [vmem:[%s5872_s1 + $0x10c] sm:$0xf0]  ;;  %v2575_v34 = vor.u32 %v3614_v18, %v2574_v16  ;;  %1740 = vmatpush.bf16.msra.mxu2 %v2847_v22 }
  0x1f   :  { %v2830_v23 = vld [vmem:[%s5872_s1 + $0x200] sm:$0xf]  ;;  %v3678_v24 = vld [vmem:[%s5872_s1 + $0x20c] sm:$0xf0]  ;;  %v2703_v38 = vor.u32 %v3646_v20, %v2702_v19  ;;  %1763 = vmatpush.bf16.msra.mxu3 %v2975_v26  ;;  %v3604_v26 = vld [vmem:[%s5873_s0 + $0x44] sm:$0xf] }
  0x20   :  { %v2958_v25 = vld [vmem:[%s5872_s1 + $0x300] sm:$0xf]  ;;  %v3710_v27 = vld [vmem:[%s5872_s1 + $0x30c] sm:$0xf0]  ;;  %v2831_v39 = vor.u32 %v3678_v24, %v2830_v23  ;;  %1695 = vmatpush.bf16.msra.mxu0 %v2575_v34 }
  0x21   :  { %v2510_v28 = vld [vmem:[%s5873_s0] sm:$0xf]  ;;  %v3834_v33 = vld [vmem:[%s5872_s1 + $0x6ec] sm:$0xf0]  ;;  %v2959_v43 = vor.u32 %v3710_v27, %v2958_v25  ;;  %1718 = vmatpush.bf16.msra.mxu1 %v2703_v38  ;;  %v2544_v27 = vld [vmem:[%s5873_s0 + $0x60] sm:$0xf0] }
  0x22   :  { %v3600_v29 = vld [vmem:[%s5873_s0 + $0x1c] sm:$0xf0]  ;;  %v3866_v37 = vld [vmem:[%s5872_s1 + $0x7ec] sm:$0xf0]  ;;  %1741 = vmatpush.bf16.msra.mxu2 %v2831_v39 }
  0x23   :  { %v3454_v32 = vld [vmem:[%s5872_s1 + $0x6e0] sm:$0xf]  ;;  %v3770_v46 = vld [vmem:[%s5872_s1 + $0x4ec] sm:$0xf0]  ;;  %v4126_v48 = vor.u32 %v3600_v29, %v2510_v28  ;;  %1764 = vmatpush.bf16.msra.mxu3 %v2959_v43 }
  0x24   :  { %v3582_v36 = vld [vmem:[%s5872_s1 + $0x7e0] sm:$0xf]  ;;  %v3455_v44 = vor.u32 %v3834_v33, %v3454_v32  ;;  %v3802_v50 = vld [vmem:[%s5872_s1 + $0x5ec] sm:$0xf0]  ;;  %1719 = vmatmul.bf16.vlgmr.msra.gmra.mxu1 %v4137_v53  ;;  %v2550_v32 = vld [vmem:[%s5873_s0 + $0x48] sm:$0xf] }
  0x25   :  { %v3198_v45 = vld [vmem:[%s5872_s1 + $0x4e0] sm:$0xf]  ;;  %v3583_v49 = vor.u32 %v3866_v37, %v3582_v36  ;;  %v3830_v52 = vld [vmem:[%s5872_s1 + $0x6cc] sm:$0xf0]  ;;  %1696 = vmatmul.bf16.vlgmr.msra.gmra.mxu0 %v4126_v48  ;;  %1742 = vmatmul.bf16.vlgmr.msra.gmra.mxu2 %v4139_v54  ;;  %v3605_v36 = vld [vmem:[%s5873_s0 + $0x4c] sm:$0xf] }
  0x26   :  { %v3326_v47 = vld [vmem:[%s5872_s1 + $0x5e0] sm:$0xf]  ;;  %v3862_v56 = vld [vmem:[%s5872_s1 + $0x7cc] sm:$0xf0]  ;;  %v3199_v58 = vor.u32 %v3770_v46, %v3198_v45  ;;  %1826 = vmatpush.bf16.msrb.mxu2 %v3455_v44  ;;  %1765 = vmatmul.bf16.vlgmr.msra.gmra.mxu3 %v4147_v57  ;;  %v2552_v37 = vld [vmem:[%s5873_s0 + $0x68] sm:$0xf0] }
  0x27   :  { %v3438_v51 = vld [vmem:[%s5872_s1 + $0x6c0] sm:$0xf]  ;;  %v3327_v59 = vor.u32 %v3802_v50, %v3326_v47  ;;  %v3766_v62 = vld [vmem:[%s5872_s1 + $0x4cc] sm:$0xf0]  ;;  %1849 = vmatpush.bf16.msrb.mxu3 %v3583_v49  ;;  %v4269_v50 = vor.u32 %v3604_v26, %v2544_v27 }
  0x28   :  { %v3566_v55 = vld [vmem:[%s5872_s1 + $0x7c0] sm:$0xf]  ;;  %v3439_v60 = vor.u32 %v3830_v52, %v3438_v51  ;;  %v3798_v1 = vld [vmem:[%s5872_s1 + $0x5cc] sm:$0xf0]  ;;  %1780 = vmatpush.bf16.msrb.mxu0 %v3199_v58  ;;  %v4271_v51 = vor.u32 %v3609_v35, %v2550_v32  ;;  %v2688_v35 = vld [vmem:[%s5872_s1 + $0xf0] sm:$0xf0] }
  0x29   :  { %v3182_v61 = vld [vmem:[%s5872_s1 + $0x4c0] sm:$0xf]  ;;  %v3567_v0 = vor.u32 %v3862_v56, %v3566_v55  ;;  %v3826_v3 = vld [vmem:[%s5872_s1 + $0x6ac] sm:$0xf0]  ;;  %1803 = vmatpush.bf16.msrb.mxu1 %v3327_v59  ;;  %v4279_v56 = vor.u32 %v3605_v36, %v2552_v37 }
  0x2a   :  { %v3310_v63 = vld [vmem:[%s5872_s1 + $0x5c0] sm:$0xf]  ;;  %v3858_v5 = vld [vmem:[%s5872_s1 + $0x7ac] sm:$0xf0]  ;;  %v3183_v6 = vor.u32 %v3766_v62, %v3182_v61  ;;  %1827 = vmatpush.bf16.msrb.mxu2 %v3439_v60 }
  0x2b   :  { %v3422_v2 = vld [vmem:[%s5872_s1 + $0x6a0] sm:$0xf]  ;;  %v3311_v7 = vor.u32 %v3798_v1, %v3310_v63  ;;  %v3762_v10 = vld [vmem:[%s5872_s1 + $0x4ac] sm:$0xf0]  ;;  %1850 = vmatpush.bf16.msrb.mxu3 %v3567_v0 }
  0x2c   :  { %v3550_v4 = vld [vmem:[%s5872_s1 + $0x7a0] sm:$0xf]  ;;  %v3423_v8 = vor.u32 %v3826_v3, %v3422_v2  ;;  %v3794_v13 = vld [vmem:[%s5872_s1 + $0x5ac] sm:$0xf0]  ;;  %1781 = vmatpush.bf16.msrb.mxu0 %v3183_v6 }
  0x2d   :  { %v3166_v9 = vld [vmem:[%s5872_s1 + $0x4a0] sm:$0xf]  ;;  %v3551_v12 = vor.u32 %v3858_v5, %v3550_v4  ;;  %v3822_v15 = vld [vmem:[%s5872_s1 + $0x68c] sm:$0xf0]  ;;  %1804 = vmatpush.bf16.msrb.mxu1 %v3311_v7 }
  0x2e   :  { %v3294_v11 = vld [vmem:[%s5872_s1 + $0x5a0] sm:$0xf]  ;;  %v3854_v17 = vld [vmem:[%s5872_s1 + $0x78c] sm:$0xf0]  ;;  %v3167_v18 = vor.u32 %v3762_v10, %v3166_v9  ;;  %1828 = vmatpush.bf16.msrb.mxu2 %v3423_v8 }
  0x2f   :  { %v3406_v14 = vld [vmem:[%s5872_s1 + $0x680] sm:$0xf]  ;;  %v3295_v21 = vor.u32 %v3794_v13, %v3294_v11  ;;  %v3758_v24 = vld [vmem:[%s5872_s1 + $0x48c] sm:$0xf0]  ;;  %1851 = vmatpush.bf16.msrb.mxu3 %v3551_v12 }
  0x30   :  { %v3534_v16 = vld [vmem:[%s5872_s1 + $0x780] sm:$0xf]  ;;  %v3407_v22 = vor.u32 %v3822_v15, %v3406_v14  ;;  %v3790_v29 = vld [vmem:[%s5872_s1 + $0x58c] sm:$0xf0]  ;;  %1782 = vmatpush.bf16.msrb.mxu0 %v3167_v18 }
  0x31   :  { %v2542_v19 = vld [vmem:[%s5873_s0 + $0x40] sm:$0xf]  ;;  %v3535_v28 = vor.u32 %v3854_v17, %v3534_v16  ;;  %v3818_v31 = vld [vmem:[%s5872_s1 + $0x66c] sm:$0xf0]  ;;  %1805 = vmatpush.bf16.msrb.mxu1 %v3295_v21  ;;  %v31_v21 = vld [vmem:[%s5873_s0 + $0x88] sm:$0xff] }
  0x32   :  { %v3608_v20 = vld [vmem:[%s5873_s0 + $0x5c] sm:$0xf0]  ;;  %v3850_v34 = vld [vmem:[%s5872_s1 + $0x76c] sm:$0xf0]  ;;  %1829 = vmatpush.bf16.msrb.mxu2 %v3407_v22  ;;  %v354_v37 = vunpack.c.l.b16 %v31_v21 }
  0x33   :  { %v3150_v23 = vld [vmem:[%s5872_s1 + $0x480] sm:$0xf]  ;;  %v3754_v42 = vld [vmem:[%s5872_s1 + $0x46c] sm:$0xf0]  ;;  %v4258_v44 = vor.u32 %v3608_v20, %v2542_v19  ;;  %1852 = vmatpush.bf16.msrb.mxu3 %v3535_v28  ;;  %v3704_v19 = vld [vmem:[%s5872_s1 + $0x2e4] sm:$0xf] }
  0x34   :  { %v3278_v25 = vld [vmem:[%s5872_s1 + $0x580] sm:$0xf]  ;;  %v3151_v38 = vor.u32 %v3758_v24, %v3150_v23  ;;  %v3786_v46 = vld [vmem:[%s5872_s1 + $0x56c] sm:$0xf0]  ;;  %1724 = vmatmul.bf16.gmra.mxu1 %v4269_v50  ;;  %v2944_v20 = vld [vmem:[%s5872_s1 + $0x2f0] sm:$0xf0] }
  0x35   :  { %v3390_v30 = vld [vmem:[%s5872_s1 + $0x660] sm:$0xf]  ;;  %v3279_v39 = vor.u32 %v3790_v29, %v3278_v25  ;;  %v3814_v49 = vld [vmem:[%s5872_s1 + $0x64c] sm:$0xf0]  ;;  %1701 = vmatmul.bf16.gmra.mxu0 %v4258_v44  ;;  %1747 = vmatmul.bf16.gmra.mxu2 %v4271_v51  ;;  %v3736_v23 = vld [vmem:[%s5872_s1 + $0x3e4] sm:$0xf] }
  0x36   :  { %v3518_v33 = vld [vmem:[%s5872_s1 + $0x760] sm:$0xf]  ;;  %v3391_v40 = vor.u32 %v3818_v31, %v3390_v30  ;;  %v3846_v55 = vld [vmem:[%s5872_s1 + $0x74c] sm:$0xf0]  ;;  %1783 = vmatpush.bf16.msrb.mxu0 %v3151_v38  ;;  %1770 = vmatmul.bf16.gmra.mxu3 %v4279_v56  ;;  %v3072_v24 = vld [vmem:[%s5872_s1 + $0x3f0] sm:$0xf0] }
  0x37   :  { %v3134_v41 = vld [vmem:[%s5872_s1 + $0x460] sm:$0xf]  ;;  %v3519_v45 = vor.u32 %v3850_v34, %v3518_v33  ;;  %1806 = vmatpush.bf16.msrb.mxu1 %v3279_v39  ;;  %v3750_v62 = vld [vmem:[%s5872_s1 + $0x44c] sm:$0xf0]  ;;  %v2947_v33 = vor.u32 %v3704_v19, %v2944_v20  ;;  %v3640_v34 = vld [vmem:[%s5872_s1 + $0xe4] sm:$0xf]  ;;  %v3075_v38 = vor.u32 %v3736_v23, %v3072_v24 }
  0x38   :  { %v3262_v43 = vld [vmem:[%s5872_s1 + $0x560] sm:$0xf]  ;;  %v3135_v58 = vor.u32 %v3754_v42, %v3134_v41  ;;  %1830 = vmatpush.bf16.msrb.mxu2 %v3391_v40  ;;  %v3782_v1 = vld [vmem:[%s5872_s1 + $0x54c] sm:$0xf0]  ;;  %v3672_v39 = vld [vmem:[%s5872_s1 + $0x1e4] sm:$0xf]  ;;  %v355_v41 = vunpack.c.h.b16 %v31_v21 }
  0x39   :  { %v3374_v47 = vld [vmem:[%s5872_s1 + $0x640] sm:$0xf]  ;;  %v3263_v59 = vor.u32 %v3786_v46, %v3262_v43  ;;  %1853 = vmatpush.bf16.msrb.mxu3 %v3519_v45  ;;  %v3810_v3 = vld [vmem:[%s5872_s1 + $0x62c] sm:$0xf0]  ;;  %v2816_v40 = vld [vmem:[%s5872_s1 + $0x1f0] sm:$0xf0]  ;;  %v2691_v45 = vor.u32 %v3640_v34, %v2688_v35 }
  0x3a   :  { %v3502_v52 = vld [vmem:[%s5872_s1 + $0x740] sm:$0xf]  ;;  %v3375_v60 = vor.u32 %v3814_v49, %v3374_v47  ;;  %v3842_v5 = vld [vmem:[%s5872_s1 + $0x72c] sm:$0xf0]  ;;  %1784 = vmatpush.bf16.msrb.mxu0 %v3135_v58  ;;  %v3700_v46 = vld [vmem:[%s5872_s1 + $0x2c4] sm:$0xf] }
  0x3b   :  { %v3118_v61 = vld [vmem:[%s5872_s1 + $0x440] sm:$0xf]  ;;  %v3503_v0 = vor.u32 %v3846_v55, %v3502_v52  ;;  %1807 = vmatpush.bf16.msrb.mxu1 %v3263_v59  ;;  %v3746_v11 = vld [vmem:[%s5872_s1 + $0x42c] sm:$0xf0]  ;;  %v2928_v47 = vld [vmem:[%s5872_s1 + $0x2d0] sm:$0xf0]  ;;  %v2819_v55 = vor.u32 %v3672_v39, %v2816_v40 }
  0x3c   :  { %v3246_v63 = vld [vmem:[%s5872_s1 + $0x540] sm:$0xf]  ;;  %v3119_v6 = vor.u32 %v3750_v62, %v3118_v61  ;;  %1831 = vmatpush.bf16.msrb.mxu2 %v3375_v60  ;;  %v3778_v13 = vld [vmem:[%s5872_s1 + $0x52c] sm:$0xf0]  ;;  %v3636_v49 = vld [vmem:[%s5872_s1 + $0xc4] sm:$0xf]  ;;  %v4397_v62 = vpack.c.b16 %v354_v37, %v354_v37 }
  0x3d   :  { %v3358_v2 = vld [vmem:[%s5872_s1 + $0x620] sm:$0xf]  ;;  %v3247_v9 = vor.u32 %v3782_v1, %v3246_v63  ;;  %1854 = vmatpush.bf16.msrb.mxu3 %v3503_v0  ;;  %v3806_v16 = vld [vmem:[%s5872_s1 + $0x60c] sm:$0xf0]  ;;  %v2672_v58 = vld [vmem:[%s5872_s1 + $0xd0] sm:$0xf0]  ;;  %v4405_v1 = vpack.c.b16 %v355_v41, %v355_v41 }
  0x3e   :  { %v3486_v4 = vld [vmem:[%s5872_s1 + $0x720] sm:$0xf]  ;;  %v3359_v10 = vor.u32 %v3810_v3, %v3358_v2  ;;  %v3838_v18 = vld [vmem:[%s5872_s1 + $0x70c] sm:$0xf0]  ;;  %1785 = vmatpush.bf16.msrb.mxu0 %v3119_v6  ;;  %v3732_v59 = vld [vmem:[%s5872_s1 + $0x3c4] sm:$0xf]  ;;  %v2931_v2 = vor.u32 %v3700_v46, %v2928_v47  ;;  %v2675_v3 = vor.u32 %v3636_v49, %v2672_v58 }
  0x3f   :  { %v3102_v7 = vld [vmem:[%s5872_s1 + $0x420] sm:$0xf]  ;;  %v3487_v14 = vor.u32 %v3842_v5, %v3486_v4  ;;  %1808 = vmatpush.bf16.msrb.mxu1 %v3247_v9  ;;  %v3742_v28 = vld [vmem:[%s5872_s1 + $0x40c] sm:$0xf0]  ;;  %v3056_v60 = vld [vmem:[%s5872_s1 + $0x3d0] sm:$0xf0] }
  0x40   :  { %v30_v8 = vld [vmem:[%s5873_s0 + $0x80] sm:$0xff]  ;;  %v3103_v22 = vor.u32 %v3746_v11, %v3102_v7  ;;  %1832 = vmatpush.bf16.msrb.mxu2 %v3359_v10  ;;  %v3774_v32 = vld [vmem:[%s5872_s1 + $0x50c] sm:$0xf0]  ;;  %v2800_v0 = vld [vmem:[%s5872_s1 + $0x1d0] sm:$0xf0]  ;;  %v3059_v4 = vor.u32 %v3732_v59, %v3056_v60 }
  0x41   :  { %v3230_v12 = vld [vmem:[%s5872_s1 + $0x520] sm:$0xf]  ;;  %v352_v30 = vunpack.c.l.b16 %v30_v8  ;;  %1855 = vmatpush.bf16.msrb.mxu3 %v3487_v14  ;;  %v353_v36 = vunpack.c.h.b16 %v30_v8  ;;  %v3668_v63 = vld [vmem:[%s5872_s1 + $0x1c4] sm:$0xf]  ;;  %v2912_v6 = vld [vmem:[%s5872_s1 + $0x2b0] sm:$0xf0] }
  0x42   :  { %v3342_v15 = vld [vmem:[%s5872_s1 + $0x600] sm:$0xf]  ;;  %v3231_v25 = vor.u32 %v3778_v13, %v3230_v12  ;;  %1786 = vmatpush.bf16.msrb.mxu0 %v3103_v22  ;;  %v3696_v5 = vld [vmem:[%s5872_s1 + $0x2a4] sm:$0xf]  ;;  %v2803_v8 = vor.u32 %v3668_v63, %v2800_v0  ;;  %v2656_v9 = vld [vmem:[%s5872_s1 + $0xb0] sm:$0xf0] }
  0x43   :  { %v3470_v17 = vld [vmem:[%s5872_s1 + $0x700] sm:$0xf]  ;;  %v3343_v26 = vor.u32 %v3806_v16, %v3342_v15  ;;  %v4384_v52 = vpack.c.b16 %v352_v30, %v352_v30  ;;  %v4395_v61 = vpack.c.b16 %v353_v36, %v353_v36  ;;  %v3632_v7 = vld [vmem:[%s5872_s1 + $0xa4] sm:$0xf]  ;;  %v3040_v11 = vld [vmem:[%s5872_s1 + $0x3b0] sm:$0xf0]  ;;  %v2915_v12 = vor.u32 %v3696_v5, %v2912_v6 }
  0x44   :  { %v3086_v27 = vld [vmem:[%s5872_s1 + $0x400] sm:$0xf]  ;;  %v3471_v31 = vor.u32 %v3838_v18, %v3470_v17  ;;  %1809 = vmatpush.bf16.msrb.mxu1 %v3231_v25  ;;  %v3728_v10 = vld [vmem:[%s5872_s1 + $0x3a4] sm:$0xf]  ;;  %v2784_v14 = vld [vmem:[%s5872_s1 + $0x1b0] sm:$0xf0]  ;;  %v2659_v15 = vor.u32 %v3632_v7, %v2656_v9 }
  0x45   :  { %v3214_v29 = vld [vmem:[%s5872_s1 + $0x500] sm:$0xf]  ;;  %v3087_v42 = vor.u32 %v3742_v28, %v3086_v27  ;;  %1833 = vmatpush.bf16.msrb.mxu2 %v3343_v26  ;;  %1706 = vmatmul.bf16.gmra.mxu0 %v4384_v52  ;;  %v3664_v13 = vld [vmem:[%s5872_s1 + $0x1a4] sm:$0xf]  ;;  %v3043_v16 = vor.u32 %v3728_v10, %v3040_v11  ;;  %v2896_v18 = vld [vmem:[%s5872_s1 + $0x290] sm:$0xf0] }
  0x46   :  { %v3215_v43 = vor.u32 %v3774_v32, %v3214_v29  ;;  %1856 = vmatpush.bf16.msrb.mxu3 %v3471_v31  ;;  %1729 = vmatmul.bf16.gmra.mxu1 %v4395_v61  ;;  %v3692_v17 = vld [vmem:[%s5872_s1 + $0x284] sm:$0xf]  ;;  %v2787_v20 = vor.u32 %v3664_v13, %v2784_v14  ;;  %v2640_v21 = vld [vmem:[%s5872_s1 + $0x90] sm:$0xf0]  ;;  %v2526_v27 = vld [vmem:[%s5873_s0 + $0x10] sm:$0xf] }
  0x47   :  { %1787 = vmatpush.bf16.msrb.mxu0 %v3087_v42  ;;  %1752 = vmatmul.bf16.gmra.mxu2 %v4397_v62  ;;  %v3628_v19 = vld [vmem:[%s5872_s1 + $0x84] sm:$0xf]  ;;  %v3024_v23 = vld [vmem:[%s5872_s1 + $0x390] sm:$0xf0]  ;;  %v2899_v26 = vor.u32 %v3692_v17, %v2896_v18  ;;  %v3602_v28 = vld [vmem:[%s5873_s0 + $0x2c] sm:$0xf0] }
  0x48   :  { %1810 = vmatpush.bf16.msrb.mxu1 %v3215_v43  ;;  %1775 = vmatmul.bf16.gmra.mxu3 %v4405_v1  ;;  %v3724_v22 = vld [vmem:[%s5872_s1 + $0x384] sm:$0xf]  ;;  %v2768_v25 = vld [vmem:[%s5872_s1 + $0x190] sm:$0xf0]  ;;  %v2643_v29 = vor.u32 %v3628_v19, %v2640_v21  ;;  %v2534_v42 = vld [vmem:[%s5873_s0 + $0x18] sm:$0xf]  ;;  %v4513_v60 = vor.u32 %v3602_v28, %v2526_v27 }
  0x49   :  { %1918 = vmatpush.bf16.msra.mxu2 %v2947_v33  ;;  %v3660_v24 = vld [vmem:[%s5872_s1 + $0x184] sm:$0xf]  ;;  %v3027_v30 = vor.u32 %v3724_v22, %v3024_v23  ;;  %v2880_v32 = vld [vmem:[%s5872_s1 + $0x270] sm:$0xf0]  ;;  %v3603_v43 = vld [vmem:[%s5873_s0 + $0x34] sm:$0xf0] }
  0x4a   :  { %1941 = vmatpush.bf16.msra.mxu3 %v3075_v38  ;;  %v3688_v31 = vld [vmem:[%s5872_s1 + $0x264] sm:$0xf]  ;;  %v3598_v34 = vld [vmem:[%s5873_s0 + $0x14] sm:$0xf]  ;;  %v2771_v35 = vor.u32 %v3660_v24, %v2768_v25  ;;  %v2536_v47 = vld [vmem:[%s5873_s0 + $0x38] sm:$0xf0] }
  0x4b   :  { %1872 = vmatpush.bf16.msra.mxu0 %v2691_v45  ;;  %v3624_v33 = vld [vmem:[%s5872_s1 + $0x64] sm:$0xf]  ;;  %v2624_v36 = vld [vmem:[%s5872_s1 + $0x70] sm:$0xf0]  ;;  %v3599_v45 = vld [vmem:[%s5873_s0 + $0x1c] sm:$0xf]  ;;  %v2883_v46 = vor.u32 %v3688_v31, %v2880_v32 }
  0x4c   :  { %1895 = vmatpush.bf16.msra.mxu1 %v2819_v55  ;;  %v3720_v37 = vld [vmem:[%s5872_s1 + $0x364] sm:$0xf]  ;;  %v3008_v38 = vld [vmem:[%s5872_s1 + $0x370] sm:$0xf0]  ;;  %v2627_v49 = vor.u32 %v3624_v33, %v2624_v36 }
  0x4d   :  { %1919 = vmatpush.bf16.msra.mxu2 %v2931_v2  ;;  %v2528_v39 = vld [vmem:[%s5873_s0 + $0x30] sm:$0xf0]  ;;  %v3656_v40 = vld [vmem:[%s5872_s1 + $0x164] sm:$0xf]  ;;  %v3011_v55 = vor.u32 %v3720_v37, %v3008_v38  ;;  %v4517_v2 = vor.u32 %v3603_v43, %v2534_v42 }
  0x4e   :  { %1942 = vmatpush.bf16.msra.mxu3 %v3059_v4  ;;  %v2752_v41 = vld [vmem:[%s5872_s1 + $0x170] sm:$0xf0]  ;;  %v3684_v58 = vld [vmem:[%s5872_s1 + $0x244] sm:$0xf]  ;;  %v4515_v0 = vor.u32 %v3598_v34, %v2528_v39 }
  0x4f   :  { %1873 = vmatpush.bf16.msra.mxu0 %v2675_v3  ;;  %v2864_v59 = vld [vmem:[%s5872_s1 + $0x250] sm:$0xf0]  ;;  %v2755_v63 = vor.u32 %v3656_v40, %v2752_v41  ;;  %v4519_v3 = vor.u32 %v3599_v45, %v2536_v47  ;;  %v3620_v5 = vld [vmem:[%s5872_s1 + $0x44] sm:$0xf]  ;;  %v2566_v40 = vld [vmem:[%s5873_s0 + $0x58] sm:$0xf] }
  0x50   :  { %1896 = vmatpush.bf16.msra.mxu1 %v2803_v8  ;;  %v2867_v4 = vor.u32 %v3684_v58, %v2864_v59  ;;  %v2608_v6 = vld [vmem:[%s5872_s1 + $0x50] sm:$0xf0]  ;;  %v3716_v7 = vld [vmem:[%s5872_s1 + $0x344] sm:$0xf]  ;;  %v3611_v41 = vld [vmem:[%s5873_s0 + $0x74] sm:$0xf0] }
  0x51   :  { %1920 = vmatpush.bf16.msra.mxu2 %v2915_v12  ;;  %v2611_v8 = vor.u32 %v3620_v5, %v2608_v6  ;;  %v2992_v9 = vld [vmem:[%s5872_s1 + $0x350] sm:$0xf0]  ;;  %v3652_v10 = vld [vmem:[%s5872_s1 + $0x144] sm:$0xf]  ;;  %v3607_v45 = vld [vmem:[%s5873_s0 + $0x5c] sm:$0xf] }
  0x52   :  { %1943 = vmatpush.bf16.msra.mxu3 %v3043_v16  ;;  %v2736_v11 = vld [vmem:[%s5872_s1 + $0x150] sm:$0xf0]  ;;  %v2995_v12 = vor.u32 %v3716_v7, %v2992_v9  ;;  %v3680_v14 = vld [vmem:[%s5872_s1 + $0x224] sm:$0xf] }
  0x53   :  { %1874 = vmatpush.bf16.msra.mxu0 %v2659_v15  ;;  %v2739_v13 = vor.u32 %v3652_v10, %v2736_v11  ;;  %v2848_v15 = vld [vmem:[%s5872_s1 + $0x230] sm:$0xf0]  ;;  %v3616_v16 = vld [vmem:[%s5872_s1 + $0x24] sm:$0xf]  ;;  %v33_v10 = vld [vmem:[%s5873_s0 + $0x98] sm:$0xff] }
  0x54   :  { %1897 = vmatpush.bf16.msra.mxu1 %v2787_v20  ;;  %v2851_v17 = vor.u32 %v3680_v14, %v2848_v15  ;;  %v2592_v18 = vld [vmem:[%s5872_s1 + $0x30] sm:$0xf0]  ;;  %v3712_v19 = vld [vmem:[%s5872_s1 + $0x324] sm:$0xf] }
  0x55   :  { %1921 = vmatpush.bf16.msra.mxu2 %v2899_v26  ;;  %1788 = vmatmul.bf16.vlgmr.msrb.gmra.mxu0 %v4513_v60  ;;  %v2976_v20 = vld [vmem:[%s5872_s1 + $0x330] sm:$0xf0]  ;;  %v2595_v21 = vor.u32 %v3616_v16, %v2592_v18  ;;  %v3648_v23 = vld [vmem:[%s5872_s1 + $0x124] sm:$0xf]  ;;  %v2558_v26 = vld [vmem:[%s5873_s0 + $0x50] sm:$0xf] }
  0x56   :  { %1944 = vmatpush.bf16.msra.mxu3 %v3027_v30  ;;  %1811 = vmatmul.bf16.vlgmr.msrb.gmra.mxu1 %v4515_v0  ;;  %v2979_v22 = vor.u32 %v3712_v19, %v2976_v20  ;;  %v2720_v24 = vld [vmem:[%s5872_s1 + $0x130] sm:$0xf0]  ;;  %v3676_v25 = vld [vmem:[%s5872_s1 + $0x204] sm:$0xf] }
  0x57   :  { %1875 = vmatpush.bf16.msra.mxu0 %v2643_v29  ;;  %1834 = vmatmul.bf16.vlgmr.msrb.gmra.mxu2 %v4517_v2  ;;  %v2723_v27 = vor.u32 %v3648_v23, %v2720_v24  ;;  %v2832_v28 = vld [vmem:[%s5872_s1 + $0x210] sm:$0xf0]  ;;  %v3612_v29 = vld [vmem:[%s5872_s1 + $0x4] sm:$0xf] }
  0x58   :  { %1898 = vmatpush.bf16.msra.mxu1 %v2771_v35  ;;  %1857 = vmatmul.bf16.vlgmr.msrb.gmra.mxu3 %v4519_v3  ;;  %v2576_v30 = vld [vmem:[%s5872_s1 + $0x10] sm:$0xf0]  ;;  %v2835_v31 = vor.u32 %v3676_v25, %v2832_v28  ;;  %v3708_v32 = vld [vmem:[%s5872_s1 + $0x304] sm:$0xf]  ;;  %v3610_v35 = vld [vmem:[%s5873_s0 + $0x6c] sm:$0xf0] }
  0x59   :  { %1922 = vmatpush.bf16.msra.mxu2 %v2883_v46  ;;  %v2960_v33 = vld [vmem:[%s5872_s1 + $0x310] sm:$0xf0]  ;;  %v3644_v34 = vld [vmem:[%s5872_s1 + $0x104] sm:$0xf]  ;;  %v2579_v37 = vor.u32 %v3612_v29, %v2576_v30  ;;  %v2568_v46 = vld [vmem:[%s5873_s0 + $0x78] sm:$0xf0]  ;;  %v4615_v47 = vor.u32 %v3610_v35, %v2558_v26  ;;  %v358_v35 = vunpack.c.l.b16 %v33_v10 }
  0x5a   :  { %1945 = vmatpush.bf16.msra.mxu3 %v3011_v55  ;;  %v3606_v36 = vld [vmem:[%s5873_s0 + $0x54] sm:$0xf]  ;;  %v2963_v42 = vor.u32 %v3708_v32, %v2960_v33  ;;  %v4619_v55 = vor.u32 %v3611_v41, %v2566_v40  ;;  %v4621_v58 = vor.u32 %v3607_v45, %v2568_v46  ;;  %v3832_v59 = vld [vmem:[%s5872_s1 + $0x6e4] sm:$0xf] }
  0x5b   :  { %1876 = vmatpush.bf16.msra.mxu0 %v2627_v49  ;;  %v2704_v38 = vld [vmem:[%s5872_s1 + $0x110] sm:$0xf0]  ;;  %v3828_v15 = vld [vmem:[%s5872_s1 + $0x6c4] sm:$0xf] }
  0x5c   :  { %1899 = vmatpush.bf16.msra.mxu1 %v2755_v63  ;;  %v2560_v39 = vld [vmem:[%s5873_s0 + $0x70] sm:$0xf0]  ;;  %v2707_v43 = vor.u32 %v3644_v34, %v2704_v38  ;;  %v3764_v18 = vld [vmem:[%s5872_s1 + $0x4c4] sm:$0xf]  ;;  %v359_v38 = vunpack.c.h.b16 %v33_v10 }
  0x5d   :  { %1923 = vmatpush.bf16.msra.mxu2 %v2867_v4  ;;  %v4617_v49 = vor.u32 %v3606_v36, %v2560_v39  ;;  %v3456_v63 = vld [vmem:[%s5872_s1 + $0x6f0] sm:$0xf0]  ;;  %v3768_v4 = vld [vmem:[%s5872_s1 + $0x4e4] sm:$0xf] }
  0x5e   :  { %1946 = vmatpush.bf16.msra.mxu3 %v2995_v12  ;;  %v32_v5 = vld [vmem:[%s5873_s0 + $0x90] sm:$0xff]  ;;  %v3459_v6 = vor.u32 %v3832_v59, %v3456_v63  ;;  %v3796_v24 = vld [vmem:[%s5872_s1 + $0x5c4] sm:$0xf]  ;;  %v4705_v45 = vpack.c.b16 %v359_v38, %v359_v38 }
  0x5f   :  { %1877 = vmatpush.bf16.msra.mxu0 %v2611_v8  ;;  %v3200_v7 = vld [vmem:[%s5872_s1 + $0x4f0] sm:$0xf0]  ;;  %v3864_v8 = vld [vmem:[%s5872_s1 + $0x7e4] sm:$0xf]  ;;  %v356_v29 = vunpack.c.l.b16 %v32_v5  ;;  %v357_v34 = vunpack.c.h.b16 %v32_v5 }
  0x60   :  { %1900 = vmatpush.bf16.msra.mxu1 %v2739_v13  ;;  %v3584_v9 = vld [vmem:[%s5872_s1 + $0x7f0] sm:$0xf0]  ;;  %v3203_v11 = vor.u32 %v3768_v4, %v3200_v7  ;;  %v3800_v13 = vld [vmem:[%s5872_s1 + $0x5e4] sm:$0xf] }
  0x61   :  { %1924 = vmatpush.bf16.msra.mxu2 %v2851_v17  ;;  %v3587_v12 = vor.u32 %v3864_v8, %v3584_v9  ;;  %v3328_v14 = vld [vmem:[%s5872_s1 + $0x5f0] sm:$0xf0]  ;;  %v3856_v33 = vld [vmem:[%s5872_s1 + $0x7a4] sm:$0xf]  ;;  %v4699_v41 = vpack.c.b16 %v356_v29, %v356_v29 }
  0x62   :  { %1947 = vmatpush.bf16.msra.mxu3 %v2979_v22  ;;  %v3331_v16 = vor.u32 %v3800_v13, %v3328_v14  ;;  %v3440_v17 = vld [vmem:[%s5872_s1 + $0x6d0] sm:$0xf0]  ;;  %v3860_v22 = vld [vmem:[%s5872_s1 + $0x7c4] sm:$0xf] }
  0x63   :  { %1878 = vmatpush.bf16.msra.mxu0 %v2595_v21  ;;  %v3184_v19 = vld [vmem:[%s5872_s1 + $0x4d0] sm:$0xf0]  ;;  %v3443_v20 = vor.u32 %v3828_v15, %v3440_v17  ;;  %v3792_v46 = vld [vmem:[%s5872_s1 + $0x5a4] sm:$0xf] }
  0x64   :  { %1901 = vmatpush.bf16.msra.mxu1 %v2723_v27  ;;  %v3187_v21 = vor.u32 %v3764_v18, %v3184_v19  ;;  %v3568_v23 = vld [vmem:[%s5872_s1 + $0x7d0] sm:$0xf0]  ;;  %v3824_v27 = vld [vmem:[%s5872_s1 + $0x6a4] sm:$0xf] }
  0x65   :  { %1925 = vmatpush.bf16.msra.mxu2 %v2835_v31  ;;  %1793 = vmatmul.bf16.gmra.mxu0 %v4615_v47  ;;  %v3571_v25 = vor.u32 %v3860_v22, %v3568_v23  ;;  %v3312_v26 = vld [vmem:[%s5872_s1 + $0x5d0] sm:$0xf0]  ;;  %v3760_v31 = vld [vmem:[%s5872_s1 + $0x4a4] sm:$0xf] }
  0x66   :  { %1948 = vmatpush.bf16.msra.mxu3 %v2963_v42  ;;  %1816 = vmatmul.bf16.gmra.mxu1 %v4617_v49  ;;  %v3424_v28 = vld [vmem:[%s5872_s1 + $0x6b0] sm:$0xf0]  ;;  %v3315_v30 = vor.u32 %v3796_v24, %v3312_v26  ;;  %v4701_v42 = vpack.c.b16 %v357_v34, %v357_v34  ;;  %v3820_v63 = vld [vmem:[%s5872_s1 + $0x684] sm:$0xf] }
  0x67   :  { %1879 = vmatpush.bf16.msra.mxu0 %v2579_v37  ;;  %1839 = vmatmul.bf16.gmra.mxu2 %v4619_v55  ;;  %v3168_v32 = vld [vmem:[%s5872_s1 + $0x4b0] sm:$0xf0]  ;;  %v3427_v36 = vor.u32 %v3824_v27, %v3424_v28  ;;  %v3852_v10 = vld [vmem:[%s5872_s1 + $0x784] sm:$0xf] }
  0x68   :  { %1902 = vmatpush.bf16.msra.mxu1 %v2707_v43  ;;  %1862 = vmatmul.bf16.gmra.mxu3 %v4621_v58  ;;  %v3552_v37 = vld [vmem:[%s5872_s1 + $0x7b0] sm:$0xf0]  ;;  %v3171_v39 = vor.u32 %v3760_v31, %v3168_v32  ;;  %v4703_v43 = vpack.c.b16 %v358_v35, %v358_v35  ;;  %v3816_v15 = vld [vmem:[%s5872_s1 + $0x664] sm:$0xf] }
  0x69   :  { %2010 = vmatpush.bf16.msrb.mxu2 %v3459_v6  ;;  %v3555_v40 = vor.u32 %v3856_v33, %v3552_v37  ;;  %v3296_v59 = vld [vmem:[%s5872_s1 + $0x5b0] sm:$0xf0]  ;;  %v3756_v6 = vld [vmem:[%s5872_s1 + $0x484] sm:$0xf] }
  0x6a   :  { %2033 = vmatpush.bf16.msrb.mxu3 %v3587_v12  ;;  %v3299_v4 = vor.u32 %v3792_v46, %v3296_v59  ;;  %v3408_v5 = vld [vmem:[%s5872_s1 + $0x690] sm:$0xf0]  ;;  %v3788_v12 = vld [vmem:[%s5872_s1 + $0x584] sm:$0xf] }
  0x6b   :  { %1964 = vmatpush.bf16.msrb.mxu0 %v3203_v11  ;;  %v3152_v7 = vld [vmem:[%s5872_s1 + $0x490] sm:$0xf0]  ;;  %v3411_v8 = vor.u32 %v3820_v63, %v3408_v5  ;;  %v3752_v19 = vld [vmem:[%s5872_s1 + $0x464] sm:$0xf] }
  0x6c   :  { %1987 = vmatpush.bf16.msrb.mxu1 %v3331_v16  ;;  %v3155_v9 = vor.u32 %v3756_v6, %v3152_v7  ;;  %v3536_v11 = vld [vmem:[%s5872_s1 + $0x790] sm:$0xf0]  ;;  %v3784_v24 = vld [vmem:[%s5872_s1 + $0x564] sm:$0xf] }
  0x6d   :  { %2011 = vmatpush.bf16.msrb.mxu2 %v3443_v20  ;;  %v3539_v13 = vor.u32 %v3852_v10, %v3536_v11  ;;  %v3280_v14 = vld [vmem:[%s5872_s1 + $0x590] sm:$0xf0]  ;;  %v3812_v28 = vld [vmem:[%s5872_s1 + $0x644] sm:$0xf] }
  0x6e   :  { %2034 = vmatpush.bf16.msrb.mxu3 %v3571_v25  ;;  %v3392_v16 = vld [vmem:[%s5872_s1 + $0x670] sm:$0xf0]  ;;  %v3283_v17 = vor.u32 %v3788_v12, %v3280_v14  ;;  %v3748_v31 = vld [vmem:[%s5872_s1 + $0x444] sm:$0xf] }
  0x6f   :  { %1965 = vmatpush.bf16.msrb.mxu0 %v3187_v21  ;;  %v3395_v18 = vor.u32 %v3816_v15, %v3392_v16  ;;  %v3136_v20 = vld [vmem:[%s5872_s1 + $0x470] sm:$0xf0]  ;;  %v3848_v21 = vld [vmem:[%s5872_s1 + $0x764] sm:$0xf] }
  0x70   :  { %1988 = vmatpush.bf16.msrb.mxu1 %v3315_v30  ;;  %v3139_v22 = vor.u32 %v3752_v19, %v3136_v20  ;;  %v3520_v23 = vld [vmem:[%s5872_s1 + $0x770] sm:$0xf0]  ;;  %v3844_v33 = vld [vmem:[%s5872_s1 + $0x744] sm:$0xf] }
  0x71   :  { %2012 = vmatpush.bf16.msrb.mxu2 %v3427_v36  ;;  %v3264_v25 = vld [vmem:[%s5872_s1 + $0x570] sm:$0xf0]  ;;  %v3523_v26 = vor.u32 %v3848_v21, %v3520_v23  ;;  %v3780_v36 = vld [vmem:[%s5872_s1 + $0x544] sm:$0xf] }
  0x72   :  { %2035 = vmatpush.bf16.msrb.mxu3 %v3555_v40  ;;  %v3267_v27 = vor.u32 %v3784_v24, %v3264_v25  ;;  %v3376_v29 = vld [vmem:[%s5872_s1 + $0x650] sm:$0xf0]  ;;  %v3808_v40 = vld [vmem:[%s5872_s1 + $0x624] sm:$0xf]  ;;  %v2950_v24 = vld [vmem:[%s5872_s1 + $0x2e8] sm:$0xf] }
  0x73   :  { %1966 = vmatpush.bf16.msrb.mxu0 %v3171_v39  ;;  %v3379_v30 = vor.u32 %v3812_v28, %v3376_v29  ;;  %v3120_v32 = vld [vmem:[%s5872_s1 + $0x450] sm:$0xf0]  ;;  %v3744_v63 = vld [vmem:[%s5872_s1 + $0x424] sm:$0xf]  ;;  %v3707_v25 = vld [vmem:[%s5872_s1 + $0x2f4] sm:$0xf0] }
  0x74   :  { %1989 = vmatpush.bf16.msrb.mxu1 %v3299_v4  ;;  %v3123_v34 = vor.u32 %v3748_v31, %v3120_v32  ;;  %v3504_v35 = vld [vmem:[%s5872_s1 + $0x750] sm:$0xf0]  ;;  %v3840_v5 = vld [vmem:[%s5872_s1 + $0x724] sm:$0xf]  ;;  %v3643_v28 = vld [vmem:[%s5872_s1 + $0xf4] sm:$0xf0] }
  0x75   :  { %1798 = vmatmul.bf16.gmra.mxu0 %v4699_v41  ;;  %2013 = vmatpush.bf16.msrb.mxu2 %v3411_v8  ;;  %v3248_v37 = vld [vmem:[%s5872_s1 + $0x550] sm:$0xf0]  ;;  %v3507_v38 = vor.u32 %v3844_v33, %v3504_v35  ;;  %v3776_v8 = vld [vmem:[%s5872_s1 + $0x524] sm:$0xf]  ;;  %v3078_v29 = vld [vmem:[%s5872_s1 + $0x3e8] sm:$0xf] }
  0x76   :  { %1821 = vmatmul.bf16.gmra.mxu1 %v4701_v42  ;;  %2036 = vmatpush.bf16.msrb.mxu3 %v3539_v13  ;;  %v3251_v39 = vor.u32 %v3780_v36, %v3248_v37  ;;  %v3360_v46 = vld [vmem:[%s5872_s1 + $0x630] sm:$0xf0]  ;;  %v3804_v12 = vld [vmem:[%s5872_s1 + $0x604] sm:$0xf]  ;;  %v4866_v33 = vld [vmem:[%s5874_s2] sm:$0xf] }
  0x77   :  { %1844 = vmatmul.bf16.gmra.mxu2 %v4703_v43  ;;  %1967 = vmatpush.bf16.msrb.mxu0 %v3155_v9  ;;  %v3363_v59 = vor.u32 %v3808_v40, %v3360_v46  ;;  %v3104_v4 = vld [vmem:[%s5872_s1 + $0x430] sm:$0xf0]  ;;  %v3740_v15 = vld [vmem:[%s5872_s1 + $0x404] sm:$0xf]  ;;  %v3675_v35 = vld [vmem:[%s5872_s1 + $0x1f4] sm:$0xf0] }
  0x78   :  { %1867 = vmatmul.bf16.gmra.mxu3 %v4705_v45  ;;  %1990 = vmatpush.bf16.msrb.mxu1 %v3283_v17  ;;  %v3107_v6 = vor.u32 %v3744_v63, %v3104_v4  ;;  %v3488_v7 = vld [vmem:[%s5872_s1 + $0x730] sm:$0xf0]  ;;  %v3836_v17 = vld [vmem:[%s5872_s1 + $0x704] sm:$0xf]  ;;  %v2934_v37 = vld [vmem:[%s5872_s1 + $0x2c8] sm:$0xf] }
  0x79   :  { %2014 = vmatpush.bf16.msrb.mxu2 %v3395_v18  ;;  %v3232_v9 = vld [vmem:[%s5872_s1 + $0x530] sm:$0xf0]  ;;  %v3491_v10 = vor.u32 %v3840_v5, %v3488_v7  ;;  %v3772_v20 = vld [vmem:[%s5872_s1 + $0x504] sm:$0xf]  ;;  %v3639_v46 = vld [vmem:[%s5872_s1 + $0xd4] sm:$0xf0] }
  0x7a   :  { %2037 = vmatpush.bf16.msrb.mxu3 %v3523_v26  ;;  %v3235_v11 = vor.u32 %v3776_v8, %v3232_v9  ;;  %v3344_v13 = vld [vmem:[%s5872_s1 + $0x610] sm:$0xf0]  ;;  %v2694_v26 = vld [vmem:[%s5872_s1 + $0xe8] sm:$0xf]  ;;  %v3735_v63 = vld [vmem:[%s5872_s1 + $0x3d4] sm:$0xf0] }
  0x7b   :  { %1968 = vmatpush.bf16.msrb.mxu0 %v3139_v22  ;;  %v3347_v14 = vor.u32 %v3804_v12, %v3344_v13  ;;  %v3088_v16 = vld [vmem:[%s5872_s1 + $0x410] sm:$0xf0]  ;;  %v2695_v31 = vor.u32 %v3643_v28, %v2694_v26  ;;  %v4893_v4 = vperm.slane %v4866_v33, 0  ;;  %v2806_v7 = vld [vmem:[%s5872_s1 + $0x1c8] sm:$0xf] }
  0x7c   :  { %1991 = vmatpush.bf16.msrb.mxu1 %v3267_v27  ;;  %v3091_v18 = vor.u32 %v3740_v15, %v3088_v16  ;;  %v3472_v19 = vld [vmem:[%s5872_s1 + $0x710] sm:$0xf0]  ;;  %v2951_v27 = vor.u32 %v3707_v25, %v2950_v24  ;;  %v3671_v8 = vld [vmem:[%s5872_s1 + $0x1d4] sm:$0xf0]  ;;  %v2918_v13 = vld [vmem:[%s5872_s1 + $0x2a8] sm:$0xf] }
  0x7d   :  { %2015 = vmatpush.bf16.msrb.mxu2 %v3379_v30  ;;  %v3216_v21 = vld [vmem:[%s5872_s1 + $0x510] sm:$0xf0]  ;;  %v3475_v22 = vor.u32 %v3836_v17, %v3472_v19  ;;  %v3739_v30 = vld [vmem:[%s5872_s1 + $0x3f4] sm:$0xf0]  ;;  %v2807_v9 = vor.u32 %v3671_v8, %v2806_v7  ;;  %v2662_v17 = vld [vmem:[%s5872_s1 + $0xa8] sm:$0xf] }
  0x7e   :  { %2038 = vmatpush.bf16.msrb.mxu3 %v3507_v38  ;;  %v3219_v23 = vor.u32 %v3772_v20, %v3216_v21  ;;  %v3079_v32 = vor.u32 %v3739_v30, %v3078_v29  ;;  %v3703_v38 = vld [vmem:[%s5872_s1 + $0x2d4] sm:$0xf0]  ;;  %v3046_v19 = vld [vmem:[%s5872_s1 + $0x3a8] sm:$0xf] }
  0x7f   :  { %1969 = vmatpush.bf16.msrb.mxu0 %v3123_v34  ;;  %v2822_v34 = vld [vmem:[%s5872_s1 + $0x1e8] sm:$0xf]  ;;  %v2935_v40 = vor.u32 %v3703_v38, %v2934_v37  ;;  %v3731_v21 = vld [vmem:[%s5872_s1 + $0x3b4] sm:$0xf0] }
  0x80   :  { %1992 = vmatpush.bf16.msrb.mxu1 %v3251_v39  ;;  %v2823_v36 = vor.u32 %v3675_v35, %v2822_v34  ;;  %v2678_v39 = vld [vmem:[%s5872_s1 + $0xc8] sm:$0xf]  ;;  %v3667_v24 = vld [vmem:[%s5872_s1 + $0x1b4] sm:$0xf0] }
  0x81   :  { %2016 = vmatpush.bf16.msrb.mxu2 %v3363_v59  ;;  %v3062_v59 = vld [vmem:[%s5872_s1 + $0x3c8] sm:$0xf]  ;;  %v2679_v5 = vor.u32 %v3639_v46, %v2678_v39  ;;  %v3631_v38 = vld [vmem:[%s5872_s1 + $0x94] sm:$0xf0] }
  0x82   :  { %2039 = vmatpush.bf16.msrb.mxu3 %v3491_v10  ;;  %v2902_v25 = vld [vmem:[%s5872_s1 + $0x288] sm:$0xf] }
  0x83   :  { %1970 = vmatpush.bf16.msrb.mxu0 %v3107_v6  ;;  %v3063_v6 = vor.u32 %v3735_v63, %v3062_v59  ;;  %v2646_v37 = vld [vmem:[%s5872_s1 + $0x88] sm:$0xf]  ;;  %v3727_v59 = vld [vmem:[%s5872_s1 + $0x394] sm:$0xf0] }
  0x84   :  { %1993 = vmatpush.bf16.msrb.mxu1 %v3235_v11  ;;  %v3030_v39 = vld [vmem:[%s5872_s1 + $0x388] sm:$0xf]  ;;  %v2647_v46 = vor.u32 %v3631_v38, %v2646_v37  ;;  %v3719_v37 = vld [vmem:[%s5872_s1 + $0x354] sm:$0xf0] }
  0x85   :  { %1880 = vmatmul.bf16.vlgmr.msra.gmra.mxu0 %v4126_v48  ;;  %2017 = vmatpush.bf16.msrb.mxu2 %v3347_v14  ;;  %v3699_v14 = vld [vmem:[%s5872_s1 + $0x2b4] sm:$0xf0]  ;;  %v2774_v63 = vld [vmem:[%s5872_s1 + $0x188] sm:$0xf] }
  0x86   :  { %1903 = vmatmul.bf16.vlgmr.msra.gmra.mxu1 %v4137_v53  ;;  %2040 = vmatpush.bf16.msrb.mxu3 %v3475_v22  ;;  %v2919_v16 = vor.u32 %v3699_v14, %v2918_v13  ;;  %v3047_v22 = vor.u32 %v3731_v21, %v3046_v19  ;;  %v2886_v8 = vld [vmem:[%s5872_s1 + $0x268] sm:$0xf]  ;;  %v3723_v14 = vld [vmem:[%s5872_s1 + $0x374] sm:$0xf0] }
  0x87   :  { %1926 = vmatmul.bf16.vlgmr.msra.gmra.mxu2 %v4139_v54  ;;  %1971 = vmatpush.bf16.msrb.mxu0 %v3091_v18  ;;  %v3635_v18 = vld [vmem:[%s5872_s1 + $0xb4] sm:$0xf0]  ;;  %v3014_v13 = vld [vmem:[%s5872_s1 + $0x368] sm:$0xf] }
  0x88   :  { %1949 = vmatmul.bf16.vlgmr.msra.gmra.mxu3 %v4147_v57  ;;  %1994 = vmatpush.bf16.msrb.mxu1 %v3219_v23  ;;  %v2663_v20 = vor.u32 %v3635_v18, %v2662_v17  ;;  %v2790_v23 = vld [vmem:[%s5872_s1 + $0x1a8] sm:$0xf] }
  0x89   :  { %2102 = vmatpush.bf16.msra.mxu2 %v2951_v27  ;;  %v2791_v26 = vor.u32 %v3667_v24, %v2790_v23  ;;  %v3695_v27 = vld [vmem:[%s5872_s1 + $0x294] sm:$0xf0]  ;;  %v2758_v21 = vld [vmem:[%s5872_s1 + $0x168] sm:$0xf] }
  0x8a   :  { %2125 = vmatpush.bf16.msra.mxu3 %v3079_v32  ;;  %v2903_v29 = vor.u32 %v3695_v27, %v2902_v25  ;;  %v2742_v38 = vld [vmem:[%s5872_s1 + $0x148] sm:$0xf] }
  0x8b   :  { %2056 = vmatpush.bf16.msra.mxu0 %v2695_v31 }
  0x8c   :  { %2079 = vmatpush.bf16.msra.mxu1 %v2823_v36 }
  0x8d   :  { %2103 = vmatpush.bf16.msra.mxu2 %v2935_v40 }
  0x8e   :  { %2126 = vmatpush.bf16.msra.mxu3 %v3063_v6  ;;  %v3031_v6 = vor.u32 %v3727_v59, %v3030_v39  ;;  %v3655_v39 = vld [vmem:[%s5872_s1 + $0x154] sm:$0xf0] }
  0x8f   :  { %2057 = vmatpush.bf16.msra.mxu0 %v2679_v5  ;;  %v3663_v5 = vld [vmem:[%s5872_s1 + $0x194] sm:$0xf0]  ;;  %v2743_v59 = vor.u32 %v3655_v39, %v2742_v38 }
  0x90   :  { %2080 = vmatpush.bf16.msra.mxu1 %v2807_v9  ;;  %v2775_v7 = vor.u32 %v3663_v5, %v2774_v63  ;;  %v3691_v9 = vld [vmem:[%s5872_s1 + $0x274] sm:$0xf0] }
  0x91   :  { %2104 = vmatpush.bf16.msra.mxu2 %v2919_v16  ;;  %v3015_v16 = vor.u32 %v3723_v14, %v3014_v13  ;;  %v2598_v13 = vld [vmem:[%s5872_s1 + $0x28] sm:$0xf]  ;;  %v3647_v38 = vld [vmem:[%s5872_s1 + $0x114] sm:$0xf0] }
  0x92   :  { %2127 = vmatpush.bf16.msra.mxu3 %v3047_v22  ;;  %v3659_v22 = vld [vmem:[%s5872_s1 + $0x174] sm:$0xf0] }
  0x93   :  { %2058 = vmatpush.bf16.msra.mxu0 %v2663_v20  ;;  %v2759_v25 = vor.u32 %v3659_v22, %v2758_v21  ;;  %v3651_v21 = vld [vmem:[%s5872_s1 + $0x134] sm:$0xf0] }
  0x94   :  { %2081 = vmatpush.bf16.msra.mxu1 %v2791_v26 }
  0x95   :  { %1885 = vmatmul.bf16.gmra.mxu0 %v4258_v44  ;;  %2105 = vmatpush.bf16.msra.mxu2 %v2903_v29  ;;  %v3687_v29 = vld [vmem:[%s5872_s1 + $0x254] sm:$0xf0] }
  0x96   :  { %1908 = vmatmul.bf16.gmra.mxu1 %v4269_v50  ;;  %2128 = vmatpush.bf16.msra.mxu3 %v3031_v6 }
  0x97   :  { %1931 = vmatmul.bf16.gmra.mxu2 %v4271_v51  ;;  %2059 = vmatpush.bf16.msra.mxu0 %v2647_v46 }
  0x98   :  { %1954 = vmatmul.bf16.gmra.mxu3 %v4279_v56  ;;  %2082 = vmatpush.bf16.msra.mxu1 %v2775_v7 }
  0x9a   :  { %2129 = vmatpush.bf16.msra.mxu3 %v3015_v16  ;;  %v2982_v16 = vld [vmem:[%s5872_s1 + $0x328] sm:$0xf] }
  0x9c   :  { %2083 = vmatpush.bf16.msra.mxu1 %v2759_v25 }
  0xa0   :  { %2084 = vmatpush.bf16.msra.mxu1 %v2743_v59 }
  0xa1   :  { %v1720_v12 = vpop.f32.mrf.mxu1 }
  0xa2   :  { %v1697_v10 = vpop.f32.mrf.mxu0 }
  0xa3   :  { %v1698_v11 = vadd.f32 %v1697_v10, %v4893_v4  ;;  %v2630_v10 = vld [vmem:[%s5872_s1 + $0x68] sm:$0xf] }
  0xa5   :  { %v1721_v15 = vadd.f32 %v1720_v12, %v1698_v11  ;;  %1890 = vmatmul.bf16.gmra.mxu0 %v4384_v52  ;;  %v2887_v11 = vor.u32 %v3691_v9, %v2886_v8  ;;  %v3627_v12 = vld [vmem:[%s5872_s1 + $0x74] sm:$0xf0] }
  0xa6   :  { %1913 = vmatmul.bf16.gmra.mxu1 %v4395_v61 }
  0xa7   :  { %1936 = vmatmul.bf16.gmra.mxu2 %v4397_v62 }
  0xa8   :  { %1959 = vmatmul.bf16.gmra.mxu3 %v4405_v1  ;;  %v1743_v28 = vpop.f32.mrf.mxu2  ;;  %2106 = vmatpush.bf16.msra.mxu2 %v2887_v11  ;;  %v2854_v11 = vld [vmem:[%s5872_s1 + $0x228] sm:$0xf] }
  0xa9   :  { %v1744_v30 = vadd.f32 %v1743_v28, %v1721_v15  ;;  %v1766_v31 = vpop.f32.mrf.mxu3  ;;  %v1722_v35 = vpop.f32.mrf.mxu1  ;;  %v2631_v15 = vor.u32 %v3627_v12, %v2630_v10  ;;  %v2870_v28 = vld [vmem:[%s5872_s1 + $0x248] sm:$0xf]  ;;  %v3683_v12 = vld [vmem:[%s5872_s1 + $0x234] sm:$0xf0] }
  0xaa   :  { %v1699_v32 = vpop.f32.mrf.mxu0  ;;  %v2855_v14 = vor.u32 %v3683_v12, %v2854_v11  ;;  %v3771_v12 = vld [vmem:[%s5872_s1 + $0x4f4] sm:$0xf0] }
  0xab   :  { %v1700_v34 = vadd.f32 %v1699_v32, %v4893_v4  ;;  %v4937_v36 = vadd.f32 %v1766_v31, %v1744_v30  ;;  %2060 = vmatpush.bf16.msra.mxu0 %v2631_v15  ;;  %v2871_v30 = vor.u32 %v3687_v29, %v2870_v28  ;;  %v2614_v31 = vld [vmem:[%s5872_s1 + $0x48] sm:$0xf]  ;;  %v3623_v32 = vld [vmem:[%s5872_s1 + $0x54] sm:$0xf0] }
  0xac   :  { %v3619_v15 = vld [vmem:[%s5872_s1 + $0x34] sm:$0xf0]  ;;  %v2582_v28 = vld [vmem:[%s5872_s1 + $0x8] sm:$0xf] }
  0xad   :  { %v1723_v40 = vadd.f32 %v1722_v35, %v1700_v34  ;;  %v2998_v34 = vld [vmem:[%s5872_s1 + $0x348] sm:$0xf]  ;;  %2107 = vmatpush.bf16.msra.mxu2 %v2871_v30  ;;  %v2615_v35 = vor.u32 %v3623_v32, %v2614_v31  ;;  %v3615_v29 = vld [vmem:[%s5872_s1 + $0x14] sm:$0xf0] }
  0xae   :  { %v2999_v46 = vor.u32 %v3719_v37, %v2998_v34  ;;  %v2966_v30 = vld [vmem:[%s5872_s1 + $0x308] sm:$0xf] }
  0xaf   :  { %2061 = vmatpush.bf16.msra.mxu0 %v2615_v35  ;;  %v3711_v35 = vld [vmem:[%s5872_s1 + $0x314] sm:$0xf0]  ;;  %v2710_v37 = vld [vmem:[%s5872_s1 + $0x108] sm:$0xf] }
  0xb0   :  { %v1745_v17 = vpop.f32.mrf.mxu2  ;;  %2130 = vmatpush.bf16.msra.mxu3 %v2999_v46  ;;  %v2583_v46 = vor.u32 %v3615_v29, %v2582_v28  ;;  %v2967_v59 = vor.u32 %v3711_v35, %v2966_v30  ;;  %v3831_v28 = vld [vmem:[%s5872_s1 + $0x6d4] sm:$0xf0]  ;;  %v3190_v29 = vld [vmem:[%s5872_s1 + $0x4c8] sm:$0xf] }
  0xb1   :  { %v1746_v18 = vadd.f32 %v1745_v17, %v1723_v40  ;;  %v1768_v19 = vpop.f32.mrf.mxu3  ;;  %v1725_v24 = vpop.f32.mrf.mxu1  ;;  %v3715_v17 = vld [vmem:[%s5872_s1 + $0x334] sm:$0xf0]  ;;  %2108 = vmatpush.bf16.msra.mxu2 %v2855_v14 }
  0xb2   :  { %v1702_v20 = vpop.f32.mrf.mxu0  ;;  %v3867_v14 = vld [vmem:[%s5872_s1 + $0x7f4] sm:$0xf0] }
  0xb3   :  { %v1703_v23 = vadd.f32 %v1702_v20, %v4893_v4  ;;  %v4982_v26 = vadd.f32 %v1768_v19, %v1746_v18  ;;  %v2599_v18 = vor.u32 %v3619_v15, %v2598_v13  ;;  %v2983_v19 = vor.u32 %v3715_v17, %v2982_v16  ;;  %v2726_v20 = vld [vmem:[%s5872_s1 + $0x128] sm:$0xf]  ;;  %v3767_v30 = vld [vmem:[%s5872_s1 + $0x4d4] sm:$0xf0] }
  0xb4   :  { %v2727_v22 = vor.u32 %v3651_v21, %v2726_v20  ;;  %v3590_v13 = vld [vmem:[%s5872_s1 + $0x7e8] sm:$0xf]  ;;  %v3191_v35 = vor.u32 %v3767_v30, %v3190_v29 }
  0xb5   :  { %v1726_v27 = vadd.f32 %v1725_v24, %v1703_v23  ;;  %1972 = vmatmul.bf16.vlgmr.msrb.gmra.mxu0 %v4513_v60  ;;  %v2838_v23 = vld [vmem:[%s5872_s1 + $0x208] sm:$0xf]  ;;  %v3679_v24 = vld [vmem:[%s5872_s1 + $0x214] sm:$0xf0]  ;;  %2131 = vmatpush.bf16.msra.mxu3 %v2983_v19  ;;  %v3591_v19 = vor.u32 %v3867_v14, %v3590_v13 }
  0xb6   :  { %1995 = vmatmul.bf16.vlgmr.msrb.gmra.mxu1 %v4515_v0  ;;  %2062 = vmatpush.bf16.msra.mxu0 %v2599_v18  ;;  %v3558_v13 = vld [vmem:[%s5872_s1 + $0x7a8] sm:$0xf]  ;;  %v3859_v14 = vld [vmem:[%s5872_s1 + $0x7b4] sm:$0xf0] }
  0xb7   :  { %2018 = vmatmul.bf16.vlgmr.msrb.gmra.mxu2 %v4517_v2  ;;  %2085 = vmatpush.bf16.msra.mxu1 %v2727_v22  ;;  %v3334_v22 = vld [vmem:[%s5872_s1 + $0x5e8] sm:$0xf] }
  0xb8   :  { %2041 = vmatmul.bf16.vlgmr.msrb.gmra.mxu3 %v4519_v3  ;;  %v1748_v40 = vpop.f32.mrf.mxu2 }
  0xb9   :  { %v1749_v63 = vadd.f32 %v1748_v40, %v1726_v27  ;;  %v1771_v5 = vpop.f32.mrf.mxu3  ;;  %v1727_v8 = vpop.f32.mrf.mxu1  ;;  %v2839_v27 = vor.u32 %v3679_v24, %v2838_v23  ;;  %2132 = vmatpush.bf16.msra.mxu3 %v2967_v59  ;;  %v3803_v23 = vld [vmem:[%s5872_s1 + $0x5f4] sm:$0xf0]  ;;  %v3446_v24 = vld [vmem:[%s5872_s1 + $0x6c8] sm:$0xf] }
  0xba   :  { %v1704_v6 = vpop.f32.mrf.mxu0  ;;  %2063 = vmatpush.bf16.msra.mxu0 %v2583_v46 }
  0xbb   :  { %v1705_v7 = vadd.f32 %v1704_v6, %v4893_v4  ;;  %v5013_v9 = vadd.f32 %v1771_v5, %v1749_v63  ;;  %2109 = vmatpush.bf16.msra.mxu2 %v2839_v27  ;;  %v2711_v5 = vor.u32 %v3647_v38, %v2710_v37  ;;  %v3335_v27 = vor.u32 %v3803_v23, %v3334_v22  ;;  %v3574_v37 = vld [vmem:[%s5872_s1 + $0x7c8] sm:$0xf]  ;;  %v3863_v38 = vld [vmem:[%s5872_s1 + $0x7d4] sm:$0xf0] }
  0xbc   :  { %v3575_v59 = vor.u32 %v3863_v38, %v3574_v37  ;;  %v3795_v22 = vld [vmem:[%s5872_s1 + $0x5b4] sm:$0xf0]  ;;  %v3414_v23 = vld [vmem:[%s5872_s1 + $0x688] sm:$0xf] }
  0xbd   :  { %v1728_v10 = vadd.f32 %v1727_v8, %v1705_v7  ;;  %2086 = vmatpush.bf16.msra.mxu1 %v2711_v5  ;;  %v3835_v7 = vld [vmem:[%s5872_s1 + $0x6f4] sm:$0xf0]  ;;  %v3206_v8 = vld [vmem:[%s5872_s1 + $0x4e8] sm:$0xf]  ;;  %2217 = vmatpush.bf16.msrb.mxu3 %v3591_v19  ;;  %v3559_v19 = vor.u32 %v3859_v14, %v3558_v13 }
  0xbe   :  { %v3207_v18 = vor.u32 %v3771_v12, %v3206_v8  ;;  %v3799_v5 = vld [vmem:[%s5872_s1 + $0x5d4] sm:$0xf0]  ;;  %v3174_v8 = vld [vmem:[%s5872_s1 + $0x4a8] sm:$0xf] }
  0xbf   :  { %v3763_v12 = vld [vmem:[%s5872_s1 + $0x4b4] sm:$0xf0]  ;;  %v3526_v14 = vld [vmem:[%s5872_s1 + $0x768] sm:$0xf] }
  0xc0   :  { %v1750_v25 = vpop.f32.mrf.mxu2  ;;  %2148 = vmatpush.bf16.msrb.mxu0 %v3207_v18  ;;  %v3175_v18 = vor.u32 %v3763_v12, %v3174_v8  ;;  %v3855_v38 = vld [vmem:[%s5872_s1 + $0x794] sm:$0xf0]  ;;  %v3142_v8 = vld [vmem:[%s5872_s1 + $0x468] sm:$0xf] }
  0xc1   :  { %v1751_v31 = vadd.f32 %v1750_v25, %v1728_v10  ;;  %v1773_v32 = vpop.f32.mrf.mxu3  ;;  %2171 = vmatpush.bf16.msrb.mxu1 %v3335_v27  ;;  %2218 = vmatpush.bf16.msrb.mxu3 %v3575_v59  ;;  %v3755_v13 = vld [vmem:[%s5872_s1 + $0x474] sm:$0xf0] }
  0xc2   :  { %v1707_v34 = vpop.f32.mrf.mxu0 }
  0xc3   :  { %v1708_v39 = vadd.f32 %v1707_v34, %v4893_v4  ;;  %v1730_v40 = vpop.f32.mrf.mxu1  ;;  %v5064_v63 = vadd.f32 %v1773_v32, %v1751_v31  ;;  %v3462_v4 = vld [vmem:[%s5872_s1 + $0x6e8] sm:$0xf]  ;;  %v3447_v34 = vor.u32 %v3831_v28, %v3446_v24  ;;  %v3823_v28 = vld [vmem:[%s5872_s1 + $0x694] sm:$0xf0] }
  0xc4   :  { %v3463_v11 = vor.u32 %v3835_v7, %v3462_v4  ;;  %2149 = vmatpush.bf16.msrb.mxu0 %v3191_v35  ;;  %v3827_v7 = vld [vmem:[%s5872_s1 + $0x6b4] sm:$0xf0]  ;;  %v3415_v30 = vor.u32 %v3823_v28, %v3414_v23  ;;  %v3382_v23 = vld [vmem:[%s5872_s1 + $0x648] sm:$0xf] }
  0xc5   :  { %v1731_v6 = vadd.f32 %v1730_v40, %v1708_v39  ;;  %1977 = vmatmul.bf16.gmra.mxu0 %v4615_v47  ;;  %v3318_v39 = vld [vmem:[%s5872_s1 + $0x5c8] sm:$0xf]  ;;  %2219 = vmatpush.bf16.msrb.mxu3 %v3559_v19  ;;  %v3787_v19 = vld [vmem:[%s5872_s1 + $0x574] sm:$0xf0] }
  0xc6   :  { %2000 = vmatmul.bf16.gmra.mxu1 %v4617_v49  ;;  %2194 = vmatpush.bf16.msrb.mxu2 %v3463_v11  ;;  %v3751_v28 = vld [vmem:[%s5872_s1 + $0x454] sm:$0xf0] }
  0xc7   :  { %2023 = vmatmul.bf16.gmra.mxu2 %v4619_v55 }
  0xc8   :  { %2046 = vmatmul.bf16.gmra.mxu3 %v4621_v58  ;;  %2150 = vmatpush.bf16.msrb.mxu0 %v3175_v18  ;;  %v3270_v18 = vld [vmem:[%s5872_s1 + $0x568] sm:$0xf] }
  0xca   :  { %v1753_v10 = vpop.f32.mrf.mxu2  ;;  %v1709_v17 = vpop.f32.mrf.mxu0  ;;  %2195 = vmatpush.bf16.msrb.mxu2 %v3447_v34  ;;  %v3542_v34 = vld [vmem:[%s5872_s1 + $0x788] sm:$0xf] }
  0xcb   :  { %v1754_v15 = vadd.f32 %v1753_v10, %v1731_v6  ;;  %v1776_v16 = vpop.f32.mrf.mxu3  ;;  %v1732_v20 = vpop.f32.mrf.mxu1  ;;  %v3319_v6 = vor.u32 %v3799_v5, %v3318_v39  ;;  %v3286_v39 = vld [vmem:[%s5872_s1 + $0x588] sm:$0xf] }
  0xcc   :  { %v3302_v20 = vld [vmem:[%s5872_s1 + $0x5a8] sm:$0xf] }
  0xcd   :  { %v5088_v21 = vadd.f32 %v1776_v16, %v1754_v15  ;;  %2172 = vmatpush.bf16.msrb.mxu1 %v3319_v6  ;;  %v3303_v27 = vor.u32 %v3795_v22, %v3302_v20  ;;  %v3543_v6 = vor.u32 %v3855_v38, %v3542_v34  ;;  %v3271_v22 = vor.u32 %v3787_v19, %v3270_v18  ;;  %v3783_v34 = vld [vmem:[%s5872_s1 + $0x554] sm:$0xf0] }
  0xce   :  { %v3807_v19 = vld [vmem:[%s5872_s1 + $0x614] sm:$0xf0] }
  0xcf   :  { %2220 = vmatpush.bf16.msrb.mxu3 %v3543_v6 }
  0xd1   :  { %2173 = vmatpush.bf16.msrb.mxu1 %v3303_v27  ;;  %v3126_v27 = vld [vmem:[%s5872_s1 + $0x448] sm:$0xf] }
  0xd2   :  { %v1755_v25 = vpop.f32.mrf.mxu2  ;;  %v1789_v32 = vpop.f32.mrf.mxu0 }
  0xd3   :  { %v1778_v31 = vpop.f32.mrf.mxu3  ;;  %v1790_v40 = vadd.f32 %v1789_v32, %v4937_v36  ;;  %v1812_v46 = vpop.f32.mrf.mxu1  ;;  %v3430_v36 = vld [vmem:[%s5872_s1 + $0x6a8] sm:$0xf] }
  0xd4   :  { %v3431_v11 = vor.u32 %v3827_v7, %v3430_v36  ;;  %v3158_v32 = vld [vmem:[%s5872_s1 + $0x488] sm:$0xf]  ;;  %v3819_v7 = vld [vmem:[%s5872_s1 + $0x674] sm:$0xf0] }
  0xd5   :  { %v1813_v4 = vadd.f32 %v1812_v46, %v1790_v40  ;;  %1982 = vmatmul.bf16.gmra.mxu0 %v4699_v41  ;;  %v3791_v40 = vld [vmem:[%s5872_s1 + $0x594] sm:$0xf0]  ;;  %v3398_v36 = vld [vmem:[%s5872_s1 + $0x668] sm:$0xf] }
  0xd6   :  { %2005 = vmatmul.bf16.gmra.mxu1 %v4701_v42  ;;  %2196 = vmatpush.bf16.msrb.mxu2 %v3431_v11  ;;  %v3399_v12 = vor.u32 %v3819_v7, %v3398_v36  ;;  %v3811_v36 = vld [vmem:[%s5872_s1 + $0x634] sm:$0xf0] }
  0xd7   :  { %2028 = vmatmul.bf16.gmra.mxu2 %v4703_v43 }
  0xd8   :  { %2051 = vmatmul.bf16.gmra.mxu3 %v4705_v45 }
  0xda   :  { %v1835_v10 = vpop.f32.mrf.mxu2  ;;  %v1791_v17 = vpop.f32.mrf.mxu0  ;;  %2197 = vmatpush.bf16.msrb.mxu2 %v3415_v30  ;;  %v3510_v30 = vld [vmem:[%s5872_s1 + $0x748] sm:$0xf] }
  0xdb   :  { %v1836_v15 = vadd.f32 %v1835_v10, %v1813_v4  ;;  %v1858_v16 = vpop.f32.mrf.mxu3  ;;  %v1792_v24 = vadd.f32 %v1791_v17, %v4982_v26  ;;  %v1814_v25 = vpop.f32.mrf.mxu1  ;;  %v3759_v26 = vld [vmem:[%s5872_s1 + $0x494] sm:$0xf0]  ;;  %v3287_v4 = vor.u32 %v3791_v40, %v3286_v39 }
  0xdc   :  { %v3159_v37 = vor.u32 %v3759_v26, %v3158_v32  ;;  %v3847_v32 = vld [vmem:[%s5872_s1 + $0x754] sm:$0xf0]  ;;  %v3254_v26 = vld [vmem:[%s5872_s1 + $0x548] sm:$0xf] }
  0xdd   :  { %v5156_v29 = vadd.f32 %v1858_v16, %v1836_v15  ;;  %v1815_v31 = vadd.f32 %v1814_v25, %v1792_v24  ;;  %v3851_v15 = vld [vmem:[%s5872_s1 + $0x774] sm:$0xf0]  ;;  %2174 = vmatpush.bf16.msrb.mxu1 %v3287_v4  ;;  %v3255_v38 = vor.u32 %v3783_v34, %v3254_v26  ;;  %v3366_v4 = vld [vmem:[%s5872_s1 + $0x628] sm:$0xf] }
  0xde   :  { %2151 = vmatpush.bf16.msrb.mxu0 %v3159_v37  ;;  %v3527_v17 = vor.u32 %v3851_v15, %v3526_v14  ;;  %2198 = vmatpush.bf16.msrb.mxu2 %v3399_v12  ;;  %v3815_v24 = vld [vmem:[%s5872_s1 + $0x654] sm:$0xf0]  ;;  %v3511_v37 = vor.u32 %v3847_v32, %v3510_v30  ;;  %v3238_v15 = vld [vmem:[%s5872_s1 + $0x528] sm:$0xf] }
  0xdf   :  { %v3383_v25 = vor.u32 %v3815_v24, %v3382_v23  ;;  %v3094_v23 = vld [vmem:[%s5872_s1 + $0x408] sm:$0xf]  ;;  %v3743_v24 = vld [vmem:[%s5872_s1 + $0x414] sm:$0xf0]  ;;  %vm2424_vm0 = vcmp.gt.f32.partialorder %v5156_v29, 0.0 }
  0xe0   :  { %2221 = vmatpush.bf16.msrb.mxu3 %v3527_v17  ;;  %v3350_v17 = vld [vmem:[%s5872_s1 + $0x608] sm:$0xf]  ;;  %v3839_v32 = vld [vmem:[%s5872_s1 + $0x714] sm:$0xf0] }
  0xe1   :  { %2175 = vmatpush.bf16.msrb.mxu1 %v3271_v22  ;;  %v3351_v22 = vor.u32 %v3807_v19, %v3350_v17  ;;  %v3222_v26 = vld [vmem:[%s5872_s1 + $0x508] sm:$0xf]  ;;  %v3775_v34 = vld [vmem:[%s5872_s1 + $0x514] sm:$0xf0]  ;;  %v3673_v17 = vld [vmem:[%s5872_s1 + $0x1ec] sm:$0xf] }
  0xe2   :  { %v1837_v35 = vpop.f32.mrf.mxu2  ;;  %v1794_v5 = vpop.f32.mrf.mxu0  ;;  %2199 = vmatpush.bf16.msrb.mxu2 %v3383_v25  ;;  %v3478_v25 = vld [vmem:[%s5872_s1 + $0x708] sm:$0xf] }
  0xe3   :  { %v1838_v46 = vadd.f32 %v1837_v35, %v1815_v31  ;;  %v1860_v59 = vpop.f32.mrf.mxu3  ;;  %v1795_v10 = vadd.f32 %v1794_v5, %v5013_v9  ;;  %v1817_v11 = vpop.f32.mrf.mxu1  ;;  %v3143_v9 = vor.u32 %v3755_v13, %v3142_v8  ;;  %v3127_v31 = vor.u32 %v3751_v28, %v3126_v27  ;;  %v3843_v13 = vld [vmem:[%s5872_s1 + $0x734] sm:$0xf0] }
  0xe4   :  { %2222 = vmatpush.bf16.msrb.mxu3 %v3511_v37  ;;  %v3367_v8 = vor.u32 %v3811_v36, %v3366_v4  ;;  %v2696_v36 = vld [vmem:[%s5872_s1 + $0xf8] sm:$0xf0] }
  0xe5   :  { %v5195_v16 = vadd.f32 %v1860_v59, %v1838_v46  ;;  %v1818_v20 = vadd.f32 %v1817_v11, %v1795_v10  ;;  %2064 = vmatmul.bf16.vlgmr.msra.gmra.mxu0 %v4126_v48  ;;  %2176 = vmatpush.bf16.msrb.mxu1 %v3255_v38  ;;  %v3747_v10 = vld [vmem:[%s5872_s1 + $0x434] sm:$0xf0]  ;;  %v3494_v11 = vld [vmem:[%s5872_s1 + $0x728] sm:$0xf]  ;;  %v3479_v38 = vor.u32 %v3839_v32, %v3478_v25  ;;  %v2680_v25 = vld [vmem:[%s5872_s1 + $0xd8] sm:$0xf0] }
  0xe6   :  { %2087 = vmatmul.bf16.vlgmr.msra.gmra.mxu1 %v4137_v53  ;;  %2152 = vmatpush.bf16.msrb.mxu0 %v3143_v9  ;;  %v3495_v14 = vor.u32 %v3843_v13, %v3494_v11  ;;  %v3779_v9 = vld [vmem:[%s5872_s1 + $0x534] sm:$0xf0] }
  0xe7   :  { %2110 = vmatmul.bf16.vlgmr.msra.gmra.mxu2 %v4139_v54  ;;  %v3239_v18 = vor.u32 %v3779_v9, %v3238_v15  ;;  %vm2428_vm2 = vcmp.gt.f32.partialorder %v5195_v16, 0.0 }
  0xe8   :  { %2133 = vmatmul.bf16.vlgmr.msra.gmra.mxu3 %v4147_v57  ;;  %2200 = vmatpush.bf16.msrb.mxu2 %v3367_v8  ;;  %v3080_v8 = vld [vmem:[%s5872_s1 + $0x3f8] sm:$0xf0] }
  0xe9   :  { %2223 = vmatpush.bf16.msrb.mxu3 %v3495_v14  ;;  %2177 = vmatpush.bf16.msrb.mxu1 %v3239_v18  ;;  %v2824_v18 = vld [vmem:[%s5872_s1 + $0x1f8] sm:$0xf0] }
  0xea   :  { %v1840_v35 = vpop.f32.mrf.mxu2  ;;  %v1796_v46 = vpop.f32.mrf.mxu0  ;;  %2153 = vmatpush.bf16.msrb.mxu0 %v3127_v31  ;;  %v3095_v31 = vor.u32 %v3743_v24, %v3094_v23  ;;  %v2827_v19 = vor.u32 %v3673_v17, %v2824_v18  ;;  %v3637_v23 = vld [vmem:[%s5872_s1 + $0xcc] sm:$0xf] }
  0xeb   :  { %v1841_v39 = vadd.f32 %v1840_v35, %v1818_v20  ;;  %v1863_v40 = vpop.f32.mrf.mxu3  ;;  %v1797_v59 = vadd.f32 %v1796_v46, %v5064_v63  ;;  %v1819_v5 = vpop.f32.mrf.mxu1  ;;  %v3110_v63 = vld [vmem:[%s5872_s1 + $0x428] sm:$0xf] }
  0xec   :  { %v3111_v12 = vor.u32 %v3747_v10, %v3110_v63  ;;  %2201 = vmatpush.bf16.msrb.mxu2 %v3351_v22  ;;  %v2936_v22 = vld [vmem:[%s5872_s1 + $0x2d8] sm:$0xf0] }
  0xed   :  { %v5232_v6 = vadd.f32 %v1863_v40, %v1841_v39  ;;  %v1820_v7 = vadd.f32 %v1819_v5, %v1797_v59  ;;  %v3223_v39 = vor.u32 %v3775_v34, %v3222_v26  ;;  %2224 = vmatpush.bf16.msrb.mxu3 %v3479_v38  ;;  %v2952_v59 = vld [vmem:[%s5872_s1 + $0x2f8] sm:$0xf0]  ;;  %v3641_v5 = vld [vmem:[%s5872_s1 + $0xec] sm:$0xf] }
  0xee   :  { %2154 = vmatpush.bf16.msrb.mxu0 %v3111_v12  ;;  %v2699_v10 = vor.u32 %v3641_v5, %v2696_v36  ;;  %v2808_v26 = vld [vmem:[%s5872_s1 + $0x1d8] sm:$0xf0]  ;;  %v3633_v5 = vld [vmem:[%s5872_s1 + $0xac] sm:$0xf] }
  0xef   :  { %2178 = vmatpush.bf16.msrb.mxu1 %v3223_v39  ;;  %v3729_v36 = vld [vmem:[%s5872_s1 + $0x3ac] sm:$0xf]  ;;  %vm2432_vm4 = vcmp.gt.f32.partialorder %v5232_v6, 0.0 }
  0xf2   :  { %v1842_v20 = vpop.f32.mrf.mxu2  ;;  %v1799_v30 = vpop.f32.mrf.mxu0  ;;  %2155 = vmatpush.bf16.msrb.mxu0 %v3095_v31  ;;  %v3669_v31 = vld [vmem:[%s5872_s1 + $0x1cc] sm:$0xf] }
  0xf3   :  { %v1843_v27 = vadd.f32 %v1842_v20, %v1820_v7  ;;  %v1865_v28 = vpop.f32.mrf.mxu3  ;;  %v1800_v35 = vadd.f32 %v1799_v30, %v5088_v21  ;;  %v1822_v37 = vpop.f32.mrf.mxu1  ;;  %v3705_v21 = vld [vmem:[%s5872_s1 + $0x2ec] sm:$0xf]  ;;  %2263 = vmatpush.bf16.msra.mxu1 %v2827_v19  ;;  %v3064_v30 = vld [vmem:[%s5872_s1 + $0x3d8] sm:$0xf0] }
  0xf4   :  { %v2955_v4 = vor.u32 %v3705_v21, %v2952_v59  ;;  %v3737_v7 = vld [vmem:[%s5872_s1 + $0x3ec] sm:$0xf]  ;;  %v2920_v21 = vld [vmem:[%s5872_s1 + $0x2b8] sm:$0xf0] }
  0xf5   :  { %v5283_v40 = vadd.f32 %v1865_v28, %v1843_v27  ;;  %v1823_v46 = vadd.f32 %v1822_v37, %v1800_v35  ;;  %2069 = vmatmul.bf16.gmra.mxu0 %v4258_v44  ;;  %v3083_v11 = vor.u32 %v3737_v7, %v3080_v8  ;;  %v3701_v20 = vld [vmem:[%s5872_s1 + $0x2cc] sm:$0xf]  ;;  %v2683_v27 = vor.u32 %v3637_v23, %v2680_v25  ;;  %v3048_v8 = vld [vmem:[%s5872_s1 + $0x3b8] sm:$0xf0] }
  0xf6   :  { %2092 = vmatmul.bf16.gmra.mxu1 %v4269_v50  ;;  %2286 = vmatpush.bf16.msra.mxu2 %v2955_v4  ;;  %v2939_v24 = vor.u32 %v3701_v20, %v2936_v22  ;;  %v3733_v28 = vld [vmem:[%s5872_s1 + $0x3cc] sm:$0xf]  ;;  %v2811_v35 = vor.u32 %v3669_v31, %v2808_v26  ;;  %v2664_v4 = vld [vmem:[%s5872_s1 + $0xb8] sm:$0xf0] }
  0xf7   :  { %2115 = vmatmul.bf16.gmra.mxu2 %v4271_v51  ;;  %2240 = vmatpush.bf16.msra.mxu0 %v2699_v10  ;;  %v3067_v32 = vor.u32 %v3733_v28, %v3064_v30  ;;  %v2667_v7 = vor.u32 %v3633_v5, %v2664_v4  ;;  %v3665_v10 = vld [vmem:[%s5872_s1 + $0x1ac] sm:$0xf]  ;;  %v2648_v23 = vld [vmem:[%s5872_s1 + $0x98] sm:$0xf0]  ;;  %vm2436_vm6 = vcmp.gt.f32.partialorder %v5283_v40, 0.0 }
  0xf8   :  { %2138 = vmatmul.bf16.gmra.mxu3 %v4279_v56  ;;  %2264 = vmatpush.bf16.msra.mxu1 %v2811_v35  ;;  %v3629_v22 = vld [vmem:[%s5872_s1 + $0x8c] sm:$0xf]  ;;  %v2776_v30 = vld [vmem:[%s5872_s1 + $0x198] sm:$0xf0] }
  0xf9   :  { %2309 = vmatpush.bf16.msra.mxu3 %v3083_v11  ;;  %v2792_v11 = vld [vmem:[%s5872_s1 + $0x1b8] sm:$0xf0]  ;;  %v2651_v25 = vor.u32 %v3629_v22, %v2648_v23  ;;  %v3661_v28 = vld [vmem:[%s5872_s1 + $0x18c] sm:$0xf] }
  0xfa   :  { %v1845_v63 = vpop.f32.mrf.mxu2  ;;  %v1801_v14 = vpop.f32.mrf.mxu0  ;;  %2287 = vmatpush.bf16.msra.mxu2 %v2939_v24  ;;  %v3725_v24 = vld [vmem:[%s5872_s1 + $0x38c] sm:$0xf]  ;;  %v2616_v23 = vld [vmem:[%s5872_s1 + $0x58] sm:$0xf0] }
  0xfb   :  { %v1846_v12 = vadd.f32 %v1845_v63, %v1823_v46  ;;  %v1868_v13 = vpop.f32.mrf.mxu3  ;;  %v1824_v15 = vpop.f32.mrf.mxu1  ;;  %2241 = vmatpush.bf16.msra.mxu0 %v2683_v27  ;;  %v3697_v46 = vld [vmem:[%s5872_s1 + $0x2ac] sm:$0xf]  ;;  %v3051_v63 = vor.u32 %v3729_v36, %v3048_v8  ;;  %v2904_v14 = vld [vmem:[%s5872_s1 + $0x298] sm:$0xf0] }
  0xfc   :  { %v2923_v59 = vor.u32 %v3697_v46, %v2920_v21  ;;  %v3032_v27 = vld [vmem:[%s5872_s1 + $0x398] sm:$0xf0]  ;;  %v3689_v26 = vld [vmem:[%s5872_s1 + $0x26c] sm:$0xf] }
  0xfd   :  { %v5307_v9 = vadd.f32 %v1868_v13, %v1846_v12  ;;  %2310 = vmatpush.bf16.msra.mxu3 %v3067_v32  ;;  %v3693_v12 = vld [vmem:[%s5872_s1 + $0x28c] sm:$0xf]  ;;  %v2795_v13 = vor.u32 %v3665_v10, %v2792_v11  ;;  %v3035_v31 = vor.u32 %v3725_v24, %v3032_v27  ;;  %v2779_v32 = vor.u32 %v3661_v28, %v2776_v30  ;;  %v2632_v46 = vld [vmem:[%s5872_s1 + $0x78] sm:$0xf0] }
  0xfe   :  { %2288 = vmatpush.bf16.msra.mxu2 %v2923_v59  ;;  %v2907_v17 = vor.u32 %v3693_v12, %v2904_v14  ;;  %v3625_v35 = vld [vmem:[%s5872_s1 + $0x6c] sm:$0xf]  ;;  %v3016_v59 = vld [vmem:[%s5872_s1 + $0x378] sm:$0xf0] }
  0xff   :  { %2242 = vmatpush.bf16.msra.mxu0 %v2667_v7  ;;  %2265 = vmatpush.bf16.msra.mxu1 %v2795_v13  ;;  %v3721_v21 = vld [vmem:[%s5872_s1 + $0x36c] sm:$0xf]  ;;  %v2635_v5 = vor.u32 %v3625_v35, %v2632_v46  ;;  %v2760_v10 = vld [vmem:[%s5872_s1 + $0x178] sm:$0xf0]  ;;  %vm2440_vm8 = vcmp.gt.f32.partialorder %v5307_v9, 0.0 }
 0x100   :  { %v3019_v4 = vor.u32 %v3721_v21, %v3016_v59  ;;  %v3685_v13 = vld [vmem:[%s5872_s1 + $0x24c] sm:$0xf]  ;;  %v2872_v14 = vld [vmem:[%s5872_s1 + $0x258] sm:$0xf0] }
 0x101   :  { %2311 = vmatpush.bf16.msra.mxu3 %v3051_v63  ;;  %v3657_v63 = vld [vmem:[%s5872_s1 + $0x16c] sm:$0xf]  ;;  %v3000_v27 = vld [vmem:[%s5872_s1 + $0x358] sm:$0xf0] }
 0x102   :  { %v1847_v34 = vpop.f32.mrf.mxu2  ;;  %v5339_v38 = vpop.f32.mrf.mxu0  ;;  %2289 = vmatpush.bf16.msra.mxu2 %v2907_v17  ;;  %v2763_v12 = vor.u32 %v3657_v63, %v2760_v10  ;;  %v2875_v17 = vor.u32 %v3685_v13, %v2872_v14  ;;  %v3621_v22 = vld [vmem:[%s5872_s1 + $0x4c] sm:$0xf]  ;;  %v2744_v30 = vld [vmem:[%s5872_s1 + $0x158] sm:$0xf0] }
 0x103   :  { %v1870_v37 = vpop.f32.mrf.mxu3  ;;  %v5341_v39 = vpop.f32.mrf.mxu1  ;;  %v2888_v34 = vld [vmem:[%s5872_s1 + $0x278] sm:$0xf0]  ;;  %2243 = vmatpush.bf16.msra.mxu0 %v2651_v25  ;;  %2266 = vmatpush.bf16.msra.mxu1 %v2779_v32  ;;  %v3717_v24 = vld [vmem:[%s5872_s1 + $0x34c] sm:$0xf]  ;;  %v2619_v25 = vor.u32 %v3621_v22, %v2616_v23  ;;  %v5496_v22 = vperm.slane %v4866_v33, 1 }
 0x104   :  { %v2891_v37 = vor.u32 %v3689_v26, %v2888_v34  ;;  %v3653_v28 = vld [vmem:[%s5872_s1 + $0x14c] sm:$0xf]  ;;  %v3003_v32 = vor.u32 %v3717_v24, %v3000_v27  ;;  %v2856_v21 = vld [vmem:[%s5872_s1 + $0x238] sm:$0xf0] }
 0x105   :  { %2074 = vmatmul.bf16.gmra.mxu0 %v4384_v52  ;;  %2312 = vmatpush.bf16.msra.mxu3 %v3035_v31  ;;  %v2747_v26 = vor.u32 %v3653_v28, %v2744_v30  ;;  %v3681_v46 = vld [vmem:[%s5872_s1 + $0x22c] sm:$0xf]  ;;  %v2984_v10 = vld [vmem:[%s5872_s1 + $0x338] sm:$0xf0] }
 0x106   :  { %2097 = vmatmul.bf16.gmra.mxu1 %v4395_v61  ;;  %2290 = vmatpush.bf16.msra.mxu2 %v2891_v37  ;;  %v3617_v59 = vld [vmem:[%s5872_s1 + $0x2c] sm:$0xf]  ;;  %v2840_v27 = vld [vmem:[%s5872_s1 + $0x218] sm:$0xf0] }
 0x107   :  { %2120 = vmatmul.bf16.gmra.mxu2 %v4397_v62  ;;  %2244 = vmatpush.bf16.msra.mxu0 %v2635_v5  ;;  %v2859_v5 = vor.u32 %v3681_v46, %v2856_v21  ;;  %v3713_v63 = vld [vmem:[%s5872_s1 + $0x32c] sm:$0xf]  ;;  %v2968_v21 = vld [vmem:[%s5872_s1 + $0x318] sm:$0xf0] }
 0x108   :  { %2143 = vmatmul.bf16.gmra.mxu3 %v4405_v1  ;;  %2267 = vmatpush.bf16.msra.mxu1 %v2763_v12  ;;  %v2987_v13 = vor.u32 %v3713_v63, %v2984_v10  ;;  %v3649_v14 = vld [vmem:[%s5872_s1 + $0x12c] sm:$0xf]  ;;  %v2712_v10 = vld [vmem:[%s5872_s1 + $0x118] sm:$0xf0] }
 0x109   :  { %2313 = vmatpush.bf16.msra.mxu3 %v3019_v4  ;;  %v2600_v4 = vld [vmem:[%s5872_s1 + $0x38] sm:$0xf0]  ;;  %v3613_v28 = vld [vmem:[%s5872_s1 + $0xc] sm:$0xf] }
 0x10a   :  { %v5377_v15 = vpop.f32.mrf.mxu2  ;;  %v5381_v19 = vpop.f32.mrf.mxu0  ;;  %2291 = vmatpush.bf16.msra.mxu2 %v2875_v17  ;;  %v2603_v12 = vor.u32 %v3617_v59, %v2600_v4  ;;  %v2728_v17 = vld [vmem:[%s5872_s1 + $0x138] sm:$0xf0]  ;;  %v3709_v46 = vld [vmem:[%s5872_s1 + $0x30c] sm:$0xf] }
 0x10b   :  { %v5379_v18 = vpop.f32.mrf.mxu3  ;;  %v5383_v20 = vpop.f32.mrf.mxu1  ;;  %2245 = vmatpush.bf16.msra.mxu0 %v2619_v25  ;;  %v2731_v23 = vor.u32 %v3649_v14, %v2728_v17  ;;  %v3677_v25 = vld [vmem:[%s5872_s1 + $0x20c] sm:$0xf]  ;;  %v2971_v4 = vor.u32 %v3709_v46, %v2968_v21  ;;  %v3592_v21 = vld [vmem:[%s5872_s1 + $0x7f8] sm:$0xf0] }
 0x10c   :  { %2268 = vmatpush.bf16.msra.mxu1 %v2747_v26  ;;  %v2584_v26 = vld [vmem:[%s5872_s1 + $0x18] sm:$0xf0]  ;;  %v3645_v63 = vld [vmem:[%s5872_s1 + $0x10c] sm:$0xf] }
 0x10d   :  { %2314 = vmatpush.bf16.msra.mxu3 %v3003_v32  ;;  %v2843_v32 = vor.u32 %v3677_v25, %v2840_v27  ;;  %v3865_v46 = vld [vmem:[%s5872_s1 + $0x7ec] sm:$0xf] }
 0x10e   :  { %2292 = vmatpush.bf16.msra.mxu2 %v2859_v5  ;;  %v2587_v5 = vor.u32 %v3613_v28, %v2584_v26  ;;  %v3464_v28 = vld [vmem:[%s5872_s1 + $0x6f8] sm:$0xf0] }
 0x10f   :  { %2246 = vmatpush.bf16.msra.mxu0 %v2603_v12  ;;  %v2715_v12 = vor.u32 %v3645_v63, %v2712_v10  ;;  %v1884_v10 = vadd.f32 %v5381_v19, %v5496_v22 }
 0x110   :  { %2269 = vmatpush.bf16.msra.mxu1 %v2731_v23 }
 0x111   :  { %2315 = vmatpush.bf16.msra.mxu3 %v2987_v13  ;;  %v1882_v13 = vadd.f32 %v5339_v38, %v5496_v22  ;;  %v3833_v38 = vld [vmem:[%s5872_s1 + $0x6ec] sm:$0xf]  ;;  %v1907_v19 = vadd.f32 %v5383_v20, %v1884_v10 }
 0x112   :  { %v5421_v36 = vpop.f32.mrf.mxu2  ;;  %v5425_v8 = vpop.f32.mrf.mxu0  ;;  %2293 = vmatpush.bf16.msra.mxu2 %v2843_v32  ;;  %v3769_v32 = vld [vmem:[%s5872_s1 + $0x4ec] sm:$0xf]  ;;  %v3467_v26 = vor.u32 %v3833_v38, %v3464_v28 }
 0x113   :  { %v5423_v7 = vpop.f32.mrf.mxu3  ;;  %v5433_v11 = vpop.f32.mrf.mxu1  ;;  %2247 = vmatpush.bf16.msra.mxu0 %v2587_v5  ;;  %v1905_v17 = vadd.f32 %v5341_v39, %v1882_v13  ;;  %v3208_v39 = vld [vmem:[%s5872_s1 + $0x4f8] sm:$0xf0]  ;;  %v3801_v28 = vld [vmem:[%s5872_s1 + $0x5ec] sm:$0xf] }
 0x114   :  { %2270 = vmatpush.bf16.msra.mxu1 %v2715_v12  ;;  %v3211_v5 = vor.u32 %v3769_v32, %v3208_v39  ;;  %v3765_v39 = vld [vmem:[%s5872_s1 + $0x4cc] sm:$0xf] }
 0x115   :  { %2156 = vmatmul.bf16.vlgmr.msrb.gmra.mxu0 %v4513_v60  ;;  %2316 = vmatpush.bf16.msra.mxu3 %v2971_v4  ;;  %v3595_v4 = vor.u32 %v3865_v46, %v3592_v21  ;;  %v1928_v63 = vadd.f32 %v5377_v15, %v1905_v17  ;;  %v3336_v15 = vld [vmem:[%s5872_s1 + $0x5f8] sm:$0xf0]  ;;  %v3829_v17 = vld [vmem:[%s5872_s1 + $0x6cc] sm:$0xf]  ;;  %v1887_v21 = vadd.f32 %v5425_v8, %v5496_v22 }
 0x116   :  { %2179 = vmatmul.bf16.vlgmr.msrb.gmra.mxu1 %v4515_v0  ;;  %v3192_v46 = vld [vmem:[%s5872_s1 + $0x4d8] sm:$0xf0]  ;;  %v3797_v10 = vld [vmem:[%s5872_s1 + $0x5cc] sm:$0xf] }
 0x117   :  { %2202 = vmatmul.bf16.vlgmr.msrb.gmra.mxu2 %v4517_v2  ;;  %2332 = vmatpush.bf16.msrb.mxu0 %v3211_v5  ;;  %v1951_v13 = vadd.f32 %v5379_v18, %v1928_v63  ;;  %v3448_v18 = vld [vmem:[%s5872_s1 + $0x6d8] sm:$0xf0]  ;;  %v3195_v5 = vor.u32 %v3765_v39, %v3192_v46 }
 0x118   :  { %2225 = vmatmul.bf16.vlgmr.msrb.gmra.mxu3 %v4519_v3  ;;  %2378 = vmatpush.bf16.msrb.mxu2 %v3467_v26  ;;  %v3339_v26 = vor.u32 %v3801_v28, %v3336_v15  ;;  %v3451_v20 = vor.u32 %v3829_v17, %v3448_v18  ;;  %v3576_v63 = vld [vmem:[%s5872_s1 + $0x7d8] sm:$0xf0]  ;;  %v1910_v28 = vadd.f32 %v5433_v11, %v1887_v21 }
 0x119   :  { %2401 = vmatpush.bf16.msrb.mxu3 %v3595_v4  ;;  %v3861_v4 = vld [vmem:[%s5872_s1 + $0x7cc] sm:$0xf]  ;;  %v3432_v11 = vld [vmem:[%s5872_s1 + $0x6b8] sm:$0xf0] }
 0x11a   :  { %v5463_v31 = vpop.f32.mrf.mxu2  ;;  %v5467_v35 = vpop.f32.mrf.mxu0  ;;  %v3579_v8 = vor.u32 %v3861_v4, %v3576_v63  ;;  %2355 = vmatpush.bf16.msrb.mxu1 %v3339_v26  ;;  %v3560_v4 = vld [vmem:[%s5872_s1 + $0x7b8] sm:$0xf0] }
 0x11b   :  { %v5465_v34 = vpop.f32.mrf.mxu3  ;;  %v5469_v37 = vpop.f32.mrf.mxu1  ;;  %2333 = vmatpush.bf16.msrb.mxu0 %v3195_v5  ;;  %v3857_v5 = vld [vmem:[%s5872_s1 + $0x7ac] sm:$0xf]  ;;  %v1933_v63 = vadd.f32 %v5463_v31, %v1910_v28  ;;  %v3416_v31 = vld [vmem:[%s5872_s1 + $0x698] sm:$0xf0] }
 0x11c   :  { %2379 = vmatpush.bf16.msrb.mxu2 %v3451_v20  ;;  %v3176_v20 = vld [vmem:[%s5872_s1 + $0x4b8] sm:$0xf0] }
 0x11d   :  { %2402 = vmatpush.bf16.msrb.mxu3 %v3579_v8  ;;  %v3793_v8 = vld [vmem:[%s5872_s1 + $0x5ac] sm:$0xf] }
 0x122   :  { %v5498_v24 = vpop.f32.mrf.mxu2  ;;  %v5511_v30 = vpop.f32.mrf.mxu0 }
 0x123   :  { %v5509_v33 = vpop.f32.mrf.mxu3  ;;  %v5522_v59 = vpop.f32.mrf.mxu1 }
 0x125   :  { %2161 = vmatmul.bf16.gmra.mxu0 %v4615_v47 }
 0x126   :  { %2184 = vmatmul.bf16.gmra.mxu1 %v4617_v49 }
 0x127   :  { %2207 = vmatmul.bf16.gmra.mxu2 %v4619_v55 }
 0x128   :  { %2230 = vmatmul.bf16.gmra.mxu3 %v4621_v58 }
 0x12a   :  { %v5536_v14 = vpop.f32.mrf.mxu2  ;;  %v1893_v25 = vpop.f32.mrf.mxu0 }
 0x12b   :  { %v5539_v23 = vpop.f32.mrf.mxu3  ;;  %v1916_v27 = vpop.f32.mrf.mxu1 }
 0x132   :  { %v1939_v12 = vpop.f32.mrf.mxu2  ;;  %v1973_v27 = vpop.f32.mrf.mxu0 }
 0x133   :  { %v1962_v25 = vpop.f32.mrf.mxu3  ;;  %v1996_v38 = vpop.f32.mrf.mxu1  ;;  %v1974_v32 = vadd.f32 %v1973_v27, %v1951_v13  ;;  %v1930_v12 = vadd.f32 %v5421_v36, %v1907_v19  ;;  %v3320_v13 = vld [vmem:[%s5872_s1 + $0x5d8] sm:$0xf0]  ;;  %v2444_v36 = vmul.f32 0.01, %v5156_v29 }
 0x134   :  { %v3323_v25 = vor.u32 %v3797_v10, %v3320_v13  ;;  %v3304_v13 = vld [vmem:[%s5872_s1 + $0x5b8] sm:$0xf0] }
 0x135   :  { %2166 = vmatmul.bf16.gmra.mxu0 %v4699_v41  ;;  %v1997_v27 = vadd.f32 %v1996_v38, %v1974_v32  ;;  %v1953_v17 = vadd.f32 %v5423_v7, %v1930_v12  ;;  %v3825_v38 = vld [vmem:[%s5872_s1 + $0x6ac] sm:$0xf]  ;;  %v3563_v12 = vor.u32 %v3857_v5, %v3560_v4  ;;  %v2464_v28 = vsel %vm2424_vm0, %v5156_v29, %v2444_v36  ;;  %v3160_v36 = vld [vmem:[%s5872_s1 + $0x498] sm:$0xf0] }
 0x136   :  { %2189 = vmatmul.bf16.gmra.mxu1 %v4701_v42  ;;  %v3761_v32 = vld [vmem:[%s5872_s1 + $0x4ac] sm:$0xf]  ;;  %v3435_v7 = vor.u32 %v3825_v38, %v3432_v11  ;;  %v1956_v11 = vadd.f32 %v5465_v34, %v1933_v63  ;;  %v3544_v34 = vld [vmem:[%s5872_s1 + $0x798] sm:$0xf0] }
 0x137   :  { %2212 = vmatmul.bf16.gmra.mxu2 %v4703_v43  ;;  %2356 = vmatpush.bf16.msrb.mxu1 %v3323_v25  ;;  %v3179_v10 = vor.u32 %v3761_v32, %v3176_v20  ;;  %v3821_v25 = vld [vmem:[%s5872_s1 + $0x68c] sm:$0xf]  ;;  %v3288_v4 = vld [vmem:[%s5872_s1 + $0x598] sm:$0xf0] }
 0x138   :  { %2235 = vmatmul.bf16.gmra.mxu3 %v4705_v45  ;;  %2380 = vmatpush.bf16.msrb.mxu2 %v3435_v7  ;;  %v3757_v29 = vld [vmem:[%s5872_s1 + $0x48c] sm:$0xf] }
 0x139   :  { %2334 = vmatpush.bf16.msrb.mxu0 %v3179_v10  ;;  %2403 = vmatpush.bf16.msrb.mxu3 %v3563_v12  ;;  %v3853_v20 = vld [vmem:[%s5872_s1 + $0x78c] sm:$0xf] }
 0x13a   :  { %v2019_v15 = vpop.f32.mrf.mxu2  ;;  %v1975_v39 = vpop.f32.mrf.mxu0  ;;  %v3789_v5 = vld [vmem:[%s5872_s1 + $0x58c] sm:$0xf]  ;;  %v3547_v12 = vor.u32 %v3853_v20, %v3544_v34 }
 0x13b   :  { %v2020_v19 = vadd.f32 %v2019_v15, %v1997_v27  ;;  %v2042_v18 = vpop.f32.mrf.mxu3  ;;  %v1998_v46 = vpop.f32.mrf.mxu1  ;;  %v1976_v21 = vadd.f32 %v1975_v39, %v1953_v17  ;;  %v3307_v15 = vor.u32 %v3793_v8, %v3304_v13  ;;  %v3419_v17 = vor.u32 %v3821_v25, %v3416_v31  ;;  %v3817_v13 = vld [vmem:[%s5872_s1 + $0x66c] sm:$0xf]  ;;  %v3400_v25 = vld [vmem:[%s5872_s1 + $0x678] sm:$0xf0] }
 0x13c   :  { %v3291_v8 = vor.u32 %v3789_v5, %v3288_v4  ;;  %v3256_v4 = vld [vmem:[%s5872_s1 + $0x558] sm:$0xf0] }
 0x13d   :  { %v2043_v26 = vadd.f32 %v2042_v18, %v2020_v19  ;;  %v2448_v19 = vmul.f32 0.01, %v5195_v16  ;;  %v1889_v18 = vadd.f32 %v5467_v35, %v5496_v22  ;;  %v1999_v38 = vadd.f32 %v1998_v46, %v1976_v21  ;;  %2357 = vmatpush.bf16.msrb.mxu1 %v3307_v15  ;;  %2381 = vmatpush.bf16.msrb.mxu2 %v3419_v17  ;;  %v3144_v17 = vld [vmem:[%s5872_s1 + $0x478] sm:$0xf0] }
 0x13e   :  { %v3163_v21 = vor.u32 %v3757_v29, %v3160_v36  ;;  %2404 = vmatpush.bf16.msrb.mxu3 %v3547_v12  ;;  %v1892_v29 = vadd.f32 %v5511_v30, %v5496_v22  ;;  %v3384_v22 = vld [vmem:[%s5872_s1 + $0x658] sm:$0xf0] }
 0x13f   :  { %vm2425_vm1 = vcmp.gt.f32.partialorder %v2043_v26, 0.0  ;;  %v2445_v27 = vmul.f32 0.01, %v2043_v26  ;;  %v1912_v15 = vadd.f32 %v5469_v37, %v1889_v18  ;;  %v3785_v18 = vld [vmem:[%s5872_s1 + $0x56c] sm:$0xf]  ;;  %v2468_v20 = vsel %vm2428_vm2, %v5195_v16, %v2448_v19 }
 0x140   :  { %2335 = vmatpush.bf16.msrb.mxu0 %v3163_v21 }
 0x141   :  { %v2465_v39 = vsel %vm2425_vm1, %v2043_v26, %v2445_v27  ;;  %v3753_v27 = vld [vmem:[%s5872_s1 + $0x46c] sm:$0xf]  ;;  %2358 = vmatpush.bf16.msrb.mxu1 %v3291_v8 }
 0x142   :  { %v2484_v32 = vpack.c.bf16 %v2465_v39, %v2464_v28  ;;  %v2021_v7 = vpop.f32.mrf.mxu2  ;;  %v1978_v46 = vpop.f32.mrf.mxu0  ;;  %v3403_v28 = vor.u32 %v3817_v13, %v3400_v25  ;;  %v3849_v39 = vld [vmem:[%s5872_s1 + $0x76c] sm:$0xf]  ;;  %v2452_v25 = vmul.f32 0.01, %v5232_v6 }
 0x143   :  { %v2022_v35 = vadd.f32 %v2021_v7, %v1999_v38  ;;  %v2044_v26 = vpop.f32.mrf.mxu3  ;;  %v1979_v63 = vadd.f32 %v1978_v46, %v1956_v11  ;;  %v2001_v10 = vpop.f32.mrf.mxu1  ;;  %v3528_v38 = vld [vmem:[%s5872_s1 + $0x778] sm:$0xf0]  ;;  %v3147_v11 = vor.u32 %v3753_v27, %v3144_v17  ;;  %v1935_v7 = vadd.f32 %v5498_v24, %v1912_v15  ;;  %v3781_v46 = vld [vmem:[%s5872_s1 + $0x54c] sm:$0xf] }
 0x144   :  { %2494 = vst [vmem:[%s5875_s3] sm:$0xff] %v2484_v32  ;;  %v3531_v37 = vor.u32 %v3849_v39, %v3528_v38  ;;  %v3272_v32 = vld [vmem:[%s5872_s1 + $0x578] sm:$0xf0]  ;;  %2382 = vmatpush.bf16.msrb.mxu2 %v3403_v28  ;;  %v3259_v15 = vor.u32 %v3781_v46, %v3256_v4  ;;  %v3745_v39 = vld [vmem:[%s5872_s1 + $0x42c] sm:$0xf] }
 0x145   :  { %v2045_v31 = vadd.f32 %v2044_v26, %v2022_v35  ;;  %2248 = vmatmul.bf16.vlgmr.msra.gmra.mxu0 %v4126_v48  ;;  %v3813_v48 = vld [vmem:[%s5872_s1 + $0x64c] sm:$0xf]  ;;  %v2002_v35 = vadd.f32 %v2001_v10, %v1979_v63  ;;  %v3275_v24 = vor.u32 %v3785_v18, %v3272_v32  ;;  %v3512_v26 = vld [vmem:[%s5872_s1 + $0x758] sm:$0xf0]  ;;  %v1958_v63 = vadd.f32 %v5509_v33, %v1935_v7 }
 0x146   :  { %2271 = vmatmul.bf16.vlgmr.msra.gmra.mxu1 %v4137_v53  ;;  %v3749_v53 = vld [vmem:[%s5872_s1 + $0x44c] sm:$0xf]  ;;  %2336 = vmatpush.bf16.msrb.mxu0 %v3147_v11  ;;  %v3387_v16 = vor.u32 %v3813_v48, %v3384_v22  ;;  %v1915_v10 = vadd.f32 %v5522_v59, %v1892_v29  ;;  %v3368_v59 = vld [vmem:[%s5872_s1 + $0x638] sm:$0xf0]  ;;  %v2472_v29 = vsel %vm2432_vm4, %v5232_v6, %v2452_v25 }
 0x147   :  { %vm2429_vm3 = vcmp.gt.f32.partialorder %v2045_v31, 0.0  ;;  %v2449_v36 = vmul.f32 0.01, %v2045_v31  ;;  %2294 = vmatmul.bf16.vlgmr.msra.gmra.mxu2 %v4139_v54  ;;  %v3128_v54 = vld [vmem:[%s5872_s1 + $0x458] sm:$0xf0]  ;;  %2405 = vmatpush.bf16.msrb.mxu3 %v3531_v37 }
 0x148   :  { %2317 = vmatmul.bf16.vlgmr.msra.gmra.mxu3 %v4147_v57  ;;  %v3131_v19 = vor.u32 %v3749_v53, %v3128_v54  ;;  %v3845_v57 = vld [vmem:[%s5872_s1 + $0x74c] sm:$0xf]  ;;  %2359 = vmatpush.bf16.msrb.mxu1 %v3275_v24  ;;  %v3112_v38 = vld [vmem:[%s5872_s1 + $0x438] sm:$0xf0]  ;;  %v1938_v37 = vadd.f32 %v5536_v14, %v1915_v10 }
 0x149   :  { %v2469_v30 = vsel %vm2429_vm3, %v2045_v31, %v2449_v36  ;;  %v3515_v5 = vor.u32 %v3845_v57, %v3512_v26  ;;  %2383 = vmatpush.bf16.msrb.mxu2 %v3387_v16  ;;  %v3809_v33 = vld [vmem:[%s5872_s1 + $0x62c] sm:$0xf]  ;;  %v3115_v32 = vor.u32 %v3745_v39, %v3112_v38  ;;  %v3496_v7 = vld [vmem:[%s5872_s1 + $0x738] sm:$0xf0] }
 0x14a   :  { %v2486_v21 = vpack.c.bf16 %v2469_v30, %v2468_v20  ;;  %v2024_v34 = vpop.f32.mrf.mxu2  ;;  %v1980_v13 = vpop.f32.mrf.mxu0  ;;  %2337 = vmatpush.bf16.msrb.mxu0 %v3131_v19  ;;  %v3371_v17 = vor.u32 %v3809_v33, %v3368_v59  ;;  %v3841_v11 = vld [vmem:[%s5872_s1 + $0x72c] sm:$0xf]  ;;  %v3240_v14 = vld [vmem:[%s5872_s1 + $0x538] sm:$0xf0]  ;;  %v1961_v26 = vadd.f32 %v5539_v23, %v1938_v37 }
 0x14b   :  { %v2025_v12 = vadd.f32 %v2024_v34, %v2002_v35  ;;  %v2047_v8 = vpop.f32.mrf.mxu3  ;;  %v2003_v27 = vpop.f32.mrf.mxu1  ;;  %v1981_v28 = vadd.f32 %v1980_v13, %v1958_v63  ;;  %2406 = vmatpush.bf16.msrb.mxu3 %v3515_v5  ;;  %v3499_v36 = vor.u32 %v3841_v11, %v3496_v7  ;;  %v3777_v48 = vld [vmem:[%s5872_s1 + $0x52c] sm:$0xf]  ;;  %v3352_v6 = vld [vmem:[%s5872_s1 + $0x618] sm:$0xf0]  ;;  %v2456_v13 = vmul.f32 0.01, %v5283_v40 }
 0x14c   :  { %2496 = vst [vmem:[%s5875_s3 + $0x10] sm:$0xff] %v2486_v21  ;;  %2360 = vmatpush.bf16.msrb.mxu1 %v3259_v15  ;;  %v3805_v20 = vld [vmem:[%s5872_s1 + $0x60c] sm:$0xf]  ;;  %v3243_v22 = vor.u32 %v3777_v48, %v3240_v14  ;;  %v3096_v19 = vld [vmem:[%s5872_s1 + $0x418] sm:$0xf0] }
 0x14d   :  { %v2048_v31 = vadd.f32 %v2047_v8, %v2025_v12  ;;  %v2004_v24 = vadd.f32 %v2003_v27, %v1981_v28  ;;  %2384 = vmatpush.bf16.msrb.mxu2 %v3371_v17  ;;  %v3355_v30 = vor.u32 %v3805_v20, %v3352_v6  ;;  %v3741_v16 = vld [vmem:[%s5872_s1 + $0x40c] sm:$0xf]  ;;  %v3480_v4 = vld [vmem:[%s5872_s1 + $0x718] sm:$0xf0] }
 0x14e   :  { %2338 = vmatpush.bf16.msrb.mxu0 %v3115_v32  ;;  %v3837_v57 = vld [vmem:[%s5872_s1 + $0x70c] sm:$0xf]  ;;  %v3099_v5 = vor.u32 %v3741_v16, %v3096_v19  ;;  %v3224_v10 = vld [vmem:[%s5872_s1 + $0x518] sm:$0xf0] }
 0x14f   :  { %vm2433_vm5 = vcmp.gt.f32.partialorder %v2048_v31, 0.0  ;;  %v2453_v18 = vmul.f32 0.01, %v2048_v31  ;;  %2407 = vmatpush.bf16.msrb.mxu3 %v3499_v36  ;;  %v3773_v63 = vld [vmem:[%s5872_s1 + $0x50c] sm:$0xf]  ;;  %v3483_v12 = vor.u32 %v3837_v57, %v3480_v4 }
 0x150   :  { %2361 = vmatpush.bf16.msrb.mxu1 %v3243_v22  ;;  %v3227_v8 = vor.u32 %v3773_v63, %v3224_v10 }
 0x151   :  { %v2473_v35 = vsel %vm2433_vm5, %v2048_v31, %v2453_v18  ;;  %2385 = vmatpush.bf16.msrb.mxu2 %v3355_v30  ;;  %v2476_v31 = vsel %vm2436_vm6, %v5283_v40, %v2456_v13  ;;  %v5802_v40 = vld [vmem:[%s5874_s2] sm:$0xf] }
 0x152   :  { %v2488_v53 = vpack.c.bf16 %v2473_v35, %v2472_v29  ;;  %v2026_v54 = vpop.f32.mrf.mxu2  ;;  %v1983_v34 = vpop.f32.mrf.mxu0  ;;  %2339 = vmatpush.bf16.msrb.mxu0 %v3099_v5  ;;  %v294_v37 = vperm.slane %v5802_v40, 2 }
 0x153   :  { %v2027_v46 = vadd.f32 %v2026_v54, %v2004_v24  ;;  %v2049_v21 = vpop.f32.mrf.mxu3  ;;  %v2006_v23 = vpop.f32.mrf.mxu1  ;;  %v1984_v27 = vadd.f32 %v1983_v34, %v1961_v26  ;;  %2408 = vmatpush.bf16.msrb.mxu3 %v3483_v12 }
 0x154   :  { %2498 = vst [vmem:[%s5875_s3 + $0x20] sm:$0xff] %v2488_v53  ;;  %2362 = vmatpush.bf16.msrb.mxu1 %v3227_v8 }
 0x155   :  { %v2050_v25 = vadd.f32 %v2049_v21, %v2027_v46  ;;  %2253 = vmatmul.bf16.gmra.mxu0 %v4258_v44  ;;  %v2007_v33 = vadd.f32 %v2006_v23, %v1984_v27 }
 0x156   :  { %2276 = vmatmul.bf16.gmra.mxu1 %v4269_v50  ;;  %v2460_v50 = vmul.f32 0.01, %v5307_v9 }
 0x157   :  { %vm2437_vm7 = vcmp.gt.f32.partialorder %v2050_v25, 0.0  ;;  %v2457_v15 = vmul.f32 0.01, %v2050_v25  ;;  %2299 = vmatmul.bf16.gmra.mxu2 %v4271_v51 }
 0x158   :  { %2322 = vmatmul.bf16.gmra.mxu3 %v4279_v56  ;;  %v2480_v18 = vsel %vm2440_vm8, %v5307_v9, %v2460_v50 }
 0x159   :  { %v2477_v28 = vsel %vm2437_vm7, %v2050_v25, %v2457_v15 }
 0x15a   :  { %v2490_v59 = vpack.c.bf16 %v2477_v28, %v2476_v31  ;;  %v2029_v17 = vpop.f32.mrf.mxu2  ;;  %v1985_v11 = vpop.f32.mrf.mxu0 }
 0x15b   :  { %v2030_v39 = vadd.f32 %v2029_v17, %v2007_v33  ;;  %v2052_v38 = vpop.f32.mrf.mxu3  ;;  %v2008_v44 = vpop.f32.mrf.mxu1 }
 0x15c   :  { %2500 = vst [vmem:[%s5875_s3 + $0x30] sm:$0xff] %v2490_v59 }
 0x15d   :  { %v2053_v51 = vadd.f32 %v2052_v38, %v2030_v39 }
 0x15f   :  { %vm2441_vm9 = vcmp.gt.f32.partialorder %v2053_v51, 0.0  ;;  %v2461_v56 = vmul.f32 0.01, %v2053_v51 }
 0x161   :  { %v2481_v32 = vsel %vm2441_vm9, %v2053_v51, %v2461_v56 }
 0x162   :  { %v2492_v7 = vpack.c.bf16 %v2481_v32, %v2480_v18  ;;  %v2031_v29 = vpop.f32.mrf.mxu2  ;;  %v2065_v48 = vpop.f32.mrf.mxu0 }
 0x163   :  { %v2054_v36 = vpop.f32.mrf.mxu3  ;;  %v2066_v14 = vadd.f32 %v2065_v48, %v294_v37  ;;  %v2088_v20 = vpop.f32.mrf.mxu1 }
 0x164   :  { %2502 = vst [vmem:[%s5875_s3 + $0x40] sm:$0xff] %v2492_v7 }
 0x165   :  { %v2089_v35 = vadd.f32 %v2088_v20, %v2066_v14  ;;  %2258 = vmatmul.bf16.gmra.mxu0 %v4384_v52 }
 0x166   :  { %2281 = vmatmul.bf16.gmra.mxu1 %v4395_v61 }
 0x167   :  { %2304 = vmatmul.bf16.gmra.mxu2 %v4397_v62 }
 0x168   :  { %2327 = vmatmul.bf16.gmra.mxu3 %v4405_v1 }
 0x16a   :  { %v2111_v9 = vpop.f32.mrf.mxu2  ;;  %v2067_v6 = vpop.f32.mrf.mxu0 }
 0x16b   :  { %v2112_v24 = vadd.f32 %v2111_v9, %v2089_v35  ;;  %v2134_v22 = vpop.f32.mrf.mxu3  ;;  %v2068_v53 = vadd.f32 %v2067_v6, %v294_v37  ;;  %v2090_v54 = vpop.f32.mrf.mxu1 }
 0x16d   :  { %v2135_v30 = vadd.f32 %v2134_v22, %v2112_v24  ;;  %v2091_v16 = vadd.f32 %v2090_v54, %v2068_v53 }
 0x172   :  { %v2113_v19 = vpop.f32.mrf.mxu2  ;;  %v2070_v46 = vpop.f32.mrf.mxu0 }
 0x173   :  { %v2114_v57 = vadd.f32 %v2113_v19, %v2091_v16  ;;  %v2136_v26 = vpop.f32.mrf.mxu3  ;;  %v2071_v21 = vadd.f32 %v2070_v46, %v294_v37  ;;  %v2093_v52 = vpop.f32.mrf.mxu1 }
 0x175   :  { %v2137_v34 = vadd.f32 %v2136_v26, %v2114_v57  ;;  %v2094_v61 = vadd.f32 %v2093_v52, %v2071_v21  ;;  %2340 = vmatmul.bf16.vlgmr.msrb.gmra.mxu0 %v4513_v60 }
 0x176   :  { %2363 = vmatmul.bf16.vlgmr.msrb.gmra.mxu1 %v4515_v0 }
 0x177   :  { %2386 = vmatmul.bf16.vlgmr.msrb.gmra.mxu2 %v4517_v2 }
 0x178   :  { %2409 = vmatmul.bf16.vlgmr.msrb.gmra.mxu3 %v4519_v3 }
 0x17a   :  { %v2116_v62 = vpop.f32.mrf.mxu2  ;;  %v2072_v4 = vpop.f32.mrf.mxu0 }
 0x17b   :  { %v2117_v1 = vadd.f32 %v2116_v62, %v2094_v61  ;;  %v2139_v5 = vpop.f32.mrf.mxu3  ;;  %v2073_v63 = vadd.f32 %v2072_v4, %v294_v37  ;;  %v2095_v10 = vpop.f32.mrf.mxu1 }
 0x17d   :  { %v2140_v23 = vadd.f32 %v2139_v5, %v2117_v1  ;;  %v2096_v12 = vadd.f32 %v2095_v10, %v2073_v63 }
 0x182   :  { %v2118_v8 = vpop.f32.mrf.mxu2  ;;  %v2075_v27 = vpop.f32.mrf.mxu0 }
 0x183   :  { %v2119_v13 = vadd.f32 %v2118_v8, %v2096_v12  ;;  %v2141_v25 = vpop.f32.mrf.mxu3  ;;  %v2076_v15 = vadd.f32 %v2075_v27, %v294_v37  ;;  %v2098_v60 = vpop.f32.mrf.mxu1 }
 0x185   :  { %v2142_v31 = vadd.f32 %v2141_v25, %v2119_v13  ;;  %v2099_v0 = vadd.f32 %v2098_v60, %v2076_v15  ;;  %2345 = vmatmul.bf16.gmra.mxu0 %v4615_v47 }
 0x186   :  { %2368 = vmatmul.bf16.gmra.mxu1 %v4617_v49 }
 0x187   :  { %2391 = vmatmul.bf16.gmra.mxu2 %v4619_v55 }
 0x188   :  { %2414 = vmatmul.bf16.gmra.mxu3 %v4621_v58 }
 0x18a   :  { %v2121_v2 = vpop.f32.mrf.mxu2  ;;  %v2077_v33 = vpop.f32.mrf.mxu0 }
 0x18b   :  { %v2122_v3 = vadd.f32 %v2121_v2, %v2099_v0  ;;  %v2144_v28 = vpop.f32.mrf.mxu3  ;;  %v2100_v59 = vpop.f32.mrf.mxu1 }
 0x18c   :  { %v295_v59 = vperm.slane %v5802_v40, 3 }
 0x18d   :  { %v2145_v17 = vadd.f32 %v2144_v28, %v2122_v3 }
 0x192   :  { %v2123_v39 = vpop.f32.mrf.mxu2  ;;  %v2157_v11 = vpop.f32.mrf.mxu0 }
 0x193   :  { %v2146_v38 = vpop.f32.mrf.mxu3  ;;  %v2158_v44 = vadd.f32 %v2157_v11, %v2135_v30  ;;  %v2180_v50 = vpop.f32.mrf.mxu1 }
 0x195   :  { %v2181_v51 = vadd.f32 %v2180_v50, %v2158_v44  ;;  %2350 = vmatmul.bf16.gmra.mxu0 %v4699_v41 }
 0x196   :  { %2373 = vmatmul.bf16.gmra.mxu1 %v4701_v42 }
 0x197   :  { %2396 = vmatmul.bf16.gmra.mxu2 %v4703_v43 }
 0x198   :  { %2419 = vmatmul.bf16.gmra.mxu3 %v4705_v45 }
 0x19a   :  { %v2203_v47 = vpop.f32.mrf.mxu2  ;;  %v2159_v58 = vpop.f32.mrf.mxu0 }
 0x19b   :  { %v2204_v49 = vadd.f32 %v2203_v47, %v2181_v51  ;;  %v2226_v55 = vpop.f32.mrf.mxu3  ;;  %v2160_v56 = vadd.f32 %v2159_v58, %v2137_v34  ;;  %v2182_v37 = vpop.f32.mrf.mxu1 }
 0x19d   :  { %v5825_v18 = vadd.f32 %v2226_v55, %v2204_v49  ;;  %v2183_v32 = vadd.f32 %v2182_v37, %v2160_v56 }
 0x19f   :  { %vm2426_vm10 = vcmp.gt.f32.partialorder %v5825_v18, 0.0 }
 0x1a2   :  { %v2205_v7 = vpop.f32.mrf.mxu2  ;;  %v2162_v48 = vpop.f32.mrf.mxu0 }
 0x1a3   :  { %v2206_v29 = vadd.f32 %v2205_v7, %v2183_v32  ;;  %v2228_v36 = vpop.f32.mrf.mxu3  ;;  %v2163_v41 = vadd.f32 %v2162_v48, %v2140_v23  ;;  %v2185_v14 = vpop.f32.mrf.mxu1 }
 0x1a5   :  { %v5827_v42 = vadd.f32 %v2228_v36, %v2206_v29  ;;  %v2186_v43 = vadd.f32 %v2185_v14, %v2163_v41 }
 0x1a7   :  { %vm2430_vm12 = vcmp.gt.f32.partialorder %v5827_v42, 0.0 }
 0x1aa   :  { %v2208_v20 = vpop.f32.mrf.mxu2  ;;  %v2164_v9 = vpop.f32.mrf.mxu0 }
 0x1ab   :  { %v2209_v45 = vadd.f32 %v2208_v20, %v2186_v43  ;;  %v2231_v35 = vpop.f32.mrf.mxu3  ;;  %v2165_v24 = vadd.f32 %v2164_v9, %v2142_v31  ;;  %v2187_v22 = vpop.f32.mrf.mxu1 }
 0x1ad   :  { %v5829_v6 = vadd.f32 %v2231_v35, %v2209_v45  ;;  %v2188_v53 = vadd.f32 %v2187_v22, %v2165_v24 }
 0x1af   :  { %vm2434_vm14 = vcmp.gt.f32.partialorder %v5829_v6, 0.0 }
 0x1b2   :  { %v2210_v54 = vpop.f32.mrf.mxu2  ;;  %v2167_v19 = vpop.f32.mrf.mxu0 }
 0x1b3   :  { %v2211_v30 = vadd.f32 %v2210_v54, %v2188_v53  ;;  %v2233_v16 = vpop.f32.mrf.mxu3  ;;  %v2168_v57 = vadd.f32 %v2167_v19, %v2145_v17  ;;  %v2190_v26 = vpop.f32.mrf.mxu1  ;;  %v2446_v53 = vmul.f32 0.01, %v5825_v18 }
 0x1b5   :  { %v5831_v46 = vadd.f32 %v2233_v16, %v2211_v30  ;;  %v2191_v21 = vadd.f32 %v2190_v26, %v2168_v57  ;;  %v2466_v57 = vsel %vm2426_vm10, %v5825_v18, %v2446_v53 }
 0x1b7   :  { %vm2438_vm0 = vcmp.gt.f32.partialorder %v5831_v46, 0.0 }
 0x1ba   :  { %v2213_v52 = vpop.f32.mrf.mxu2  ;;  %v2169_v62 = vpop.f32.mrf.mxu0 }
 0x1bb   :  { %v2214_v34 = vadd.f32 %v2213_v52, %v2191_v21  ;;  %v2236_v61 = vpop.f32.mrf.mxu3  ;;  %v2192_v1 = vpop.f32.mrf.mxu1 }
 0x1bd   :  { %v5833_v5 = vadd.f32 %v2236_v61, %v2214_v34 }
 0x1bf   :  { %v2462_v53 = vmul.f32 0.01, %v5833_v5  ;;  %vm2442_vm2 = vcmp.gt.f32.partialorder %v5833_v5, 0.0 }
 0x1c2   :  { %v2215_v4 = vpop.f32.mrf.mxu2  ;;  %v2249_v10 = vpop.f32.mrf.mxu0 }
 0x1c3   :  { %v2238_v63 = vpop.f32.mrf.mxu3  ;;  %v2272_v23 = vpop.f32.mrf.mxu1  ;;  %v2250_v11 = vadd.f32 %v2249_v10, %v295_v59 }
 0x1c5   :  { %v2273_v50 = vadd.f32 %v2272_v23, %v2250_v11  ;;  %v2450_v23 = vmul.f32 0.01, %v5827_v42 }
 0x1ca   :  { %v2295_v12 = vpop.f32.mrf.mxu2  ;;  %v2251_v13 = vpop.f32.mrf.mxu0 }
 0x1cb   :  { %v2318_v8 = vpop.f32.mrf.mxu3  ;;  %v2274_v25 = vpop.f32.mrf.mxu1  ;;  %v2296_v55 = vadd.f32 %v2295_v12, %v2273_v50  ;;  %v2252_v58 = vadd.f32 %v2251_v13, %v295_v59 }
 0x1cd   :  { %v2319_v37 = vadd.f32 %v2318_v8, %v2296_v55  ;;  %v2275_v36 = vadd.f32 %v2274_v25, %v2252_v58 }
 0x1d2   :  { %v2297_v27 = vpop.f32.mrf.mxu2  ;;  %v2254_v60 = vpop.f32.mrf.mxu0 }
 0x1d3   :  { %v2320_v15 = vpop.f32.mrf.mxu3  ;;  %v2277_v31 = vpop.f32.mrf.mxu1  ;;  %v2298_v48 = vadd.f32 %v2297_v27, %v2275_v36  ;;  %v2255_v41 = vadd.f32 %v2254_v60, %v295_v59 }
 0x1d5   :  { %v2321_v20 = vadd.f32 %v2320_v15, %v2298_v48  ;;  %v2278_v45 = vadd.f32 %v2277_v31, %v2255_v41  ;;  %v2470_v15 = vsel %vm2430_vm12, %v5827_v42, %v2450_v23 }
 0x1da   :  { %v2300_v0 = vpop.f32.mrf.mxu2  ;;  %v2256_v3 = vpop.f32.mrf.mxu0 }
 0x1db   :  { %v2323_v2 = vpop.f32.mrf.mxu3  ;;  %v2279_v28 = vpop.f32.mrf.mxu1  ;;  %v2301_v16 = vadd.f32 %v2300_v0, %v2278_v45  ;;  %v2257_v26 = vadd.f32 %v2256_v3, %v295_v59 }
 0x1dd   :  { %v2324_v62 = vadd.f32 %v2323_v2, %v2301_v16  ;;  %v2280_v12 = vadd.f32 %v2279_v28, %v2257_v26 }
 0x1e2   :  { %v2302_v33 = vpop.f32.mrf.mxu2  ;;  %v2259_v39 = vpop.f32.mrf.mxu0 }
 0x1e3   :  { %v2325_v17 = vpop.f32.mrf.mxu3  ;;  %v2282_v38 = vpop.f32.mrf.mxu1  ;;  %v2303_v18 = vadd.f32 %v2302_v33, %v2280_v12  ;;  %v2260_v25 = vadd.f32 %v2259_v39, %v295_v59  ;;  %v2454_v33 = vmul.f32 0.01, %v5829_v6 }
 0x1e5   :  { %v2326_v3 = vadd.f32 %v2325_v17, %v2303_v18  ;;  %v2283_v11 = vadd.f32 %v2282_v38, %v2260_v25  ;;  %v2474_v17 = vsel %vm2434_vm14, %v5829_v6, %v2454_v33 }
 0x1ea   :  { %v5836_v44 = vpop.f32.mrf.mxu2  ;;  %v2261_v47 = vpop.f32.mrf.mxu0 }
 0x1eb   :  { %v5838_v51 = vpop.f32.mrf.mxu3  ;;  %v2284_v49 = vpop.f32.mrf.mxu1  ;;  %v2306_v42 = vadd.f32 %v5836_v44, %v2283_v11  ;;  %v2458_v44 = vmul.f32 0.01, %v5831_v46 }
 0x1f2   :  { %v2307_v56 = vpop.f32.mrf.mxu2  ;;  %v2341_v7 = vpop.f32.mrf.mxu0 }
 0x1f3   :  { %v2330_v32 = vpop.f32.mrf.mxu3  ;;  %v2364_v29 = vpop.f32.mrf.mxu1  ;;  %v2342_v40 = vadd.f32 %v2341_v7, %v2319_v37 }
 0x1f4   :  { %v2329_v32 = vadd.f32 %v5838_v51, %v2306_v42 }
 0x1f5   :  { %v2365_v14 = vadd.f32 %v2364_v29, %v2342_v40 }
 0x1fa   :  { %v2387_v43 = vpop.f32.mrf.mxu2  ;;  %v2343_v24 = vpop.f32.mrf.mxu0 }
 0x1fb   :  { %v2388_v35 = vadd.f32 %v2387_v43, %v2365_v14  ;;  %v2410_v9 = vpop.f32.mrf.mxu3  ;;  %v2366_v22 = vpop.f32.mrf.mxu1  ;;  %v2344_v30 = vadd.f32 %v2343_v24, %v2321_v20  ;;  %v2478_v14 = vsel %vm2438_vm0, %v5831_v46, %v2458_v44  ;;  %v2482_v46 = vsel %vm2442_vm2, %v5833_v5, %v2462_v53 }
 0x1fd   :  { %v2411_v54 = vadd.f32 %v2410_v9, %v2388_v35  ;;  %v2367_v52 = vadd.f32 %v2366_v22, %v2344_v30 }
 0x1ff   :  { %vm2427_vm11 = vcmp.gt.f32.partialorder %v2411_v54, 0.0  ;;  %v2447_v19 = vmul.f32 0.01, %v2411_v54 }
 0x201   :  { %v2467_v21 = vsel %vm2427_vm11, %v2411_v54, %v2447_v19 }
 0x202   :  { %v2485_v34 = vpack.c.bf16 %v2467_v21, %v2466_v57  ;;  %v2389_v61 = vpop.f32.mrf.mxu2  ;;  %v2346_v63 = vpop.f32.mrf.mxu0 }
 0x203   :  { %v2390_v1 = vadd.f32 %v2389_v61, %v2367_v52  ;;  %v2412_v4 = vpop.f32.mrf.mxu3  ;;  %v2369_v10 = vpop.f32.mrf.mxu1  ;;  %v2347_v13 = vadd.f32 %v2346_v63, %v2324_v62 }
 0x204   :  { %2495 = vst [vmem:[%s5875_s3 + $0x8] sm:$0xff] %v2485_v34 }
 0x205   :  { %v2413_v8 = vadd.f32 %v2412_v4, %v2390_v1  ;;  %v2370_v31 = vadd.f32 %v2369_v10, %v2347_v13 }
 0x207   :  { %vm2431_vm13 = vcmp.gt.f32.partialorder %v2413_v8, 0.0  ;;  %v2451_v27 = vmul.f32 0.01, %v2413_v8 }
 0x209   :  { %v2471_v60 = vsel %vm2431_vm13, %v2413_v8, %v2451_v27 }
 0x20a   :  { %v2487_v0 = vpack.c.bf16 %v2471_v60, %v2470_v15  ;;  %v2392_v2 = vpop.f32.mrf.mxu2  ;;  %v2348_v49 = vpop.f32.mrf.mxu0 }
 0x20b   :  { %v2393_v50 = vadd.f32 %v2392_v2, %v2370_v31  ;;  %v2415_v47 = vpop.f32.mrf.mxu3  ;;  %v2371_v28 = vpop.f32.mrf.mxu1  ;;  %v2349_v39 = vadd.f32 %v2348_v49, %v2326_v3 }
 0x20c   :  { %2497 = vst [vmem:[%s5875_s3 + $0x18] sm:$0xff] %v2487_v0 }
 0x20d   :  { %v2416_v59 = vadd.f32 %v2415_v47, %v2393_v50  ;;  %v2372_v58 = vadd.f32 %v2371_v28, %v2349_v39 }
 0x20f   :  { %vm2435_vm15 = vcmp.gt.f32.partialorder %v2416_v59, 0.0  ;;  %v2455_v55 = vmul.f32 0.01, %v2416_v59 }
 0x211   :  { %v2475_v38 = vsel %vm2435_vm15, %v2416_v59, %v2455_v55 }
 0x212   :  { %v2489_v56 = vpack.c.bf16 %v2475_v38, %v2474_v17  ;;  %v2394_v37 = vpop.f32.mrf.mxu2  ;;  %v2351_v36 = vpop.f32.mrf.mxu0 }
 0x213   :  { %v2395_v7 = vadd.f32 %v2394_v37, %v2372_v58  ;;  %v2417_v29 = vpop.f32.mrf.mxu3  ;;  %v2374_v40 = vpop.f32.mrf.mxu1  ;;  %v2352_v41 = vadd.f32 %v2351_v36, %v2329_v32 }
 0x214   :  { %2499 = vst [vmem:[%s5875_s3 + $0x28] sm:$0xff] %v2489_v56 }
 0x215   :  { %v2418_v48 = vadd.f32 %v2417_v29, %v2395_v7  ;;  %v2375_v51 = vadd.f32 %v2374_v40, %v2352_v41 }
 0x217   :  { %vm2439_vm1 = vcmp.gt.f32.partialorder %v2418_v48, 0.0  ;;  %v2459_v6 = vmul.f32 0.01, %v2418_v48 }
 0x219   :  { %v2479_v43 = vsel %vm2439_vm1, %v2418_v48, %v2459_v6 }
 0x21a   :  { %v2491_v20 = vpack.c.bf16 %v2479_v43, %v2478_v14  ;;  %v2397_v45 = vpop.f32.mrf.mxu2  ;;  %v2353_v24 = vpop.f32.mrf.mxu0 }
 0x21b   :  { %v2398_v35 = vadd.f32 %v2397_v45, %v2375_v51  ;;  %v2420_v9 = vpop.f32.mrf.mxu3  ;;  %v2376_v22 = vpop.f32.mrf.mxu1 }
 0x21c   :  { %2501 = vst [vmem:[%s5875_s3 + $0x38] sm:$0xff] %v2491_v20 }
 0x21d   :  { %v2421_v54 = vadd.f32 %v2420_v9, %v2398_v35 }
 0x21f   :  { %vm2443_vm3 = vcmp.gt.f32.partialorder %v2421_v54, 0.0  ;;  %v2463_v30 = vmul.f32 0.01, %v2421_v54 }
 0x221   :  { %v2483_v16 = vsel %vm2443_vm3, %v2421_v54, %v2463_v30 }
 0x222   :  { %v2493_v19 = vpack.c.bf16 %v2483_v16, %v2482_v46  ;;  %v2399_v57 = vpop.f32.mrf.mxu2 }
 0x223   :  { %v2422_v26 = vpop.f32.mrf.mxu3 }
 0x224   :  { %2503 = vst [vmem:[%s5875_s3 + $0x48] sm:$0xff] %v2493_v19 }

</bundles_post_ra>
